<compile_context>
chip_gen: v6e
topology: v6e:2x2x1
jax: 0.10.0
libtpu: 0.0.40
codegen_flags: <defaults>
</compile_context>

<pallas_src>
import functools
import math

import jax
import jax.numpy as jnp
from jax.experimental import pallas as pl


# ---------------------------------------------------------------------------
# Pallas kernels (grid-less: whole operands live in VMEM)
# ---------------------------------------------------------------------------
def _mm_kernel(a_ref, b_ref, bias_ref, *rest, relu, has_res):
    """out = act(A @ B + bias [+ res]).  Orientation picked by the wrapper
    (bias pre-shaped (R,1) or (1,L)); no accumulator, no reduction axis."""
    if has_res:
        res_ref, o_ref = rest
    else:
        (o_ref,) = rest
    y = jnp.dot(a_ref[...], b_ref[...], preferred_element_type=jnp.float32)
    y = y + bias_ref[...]
    if has_res:
        y = y + res_ref[...]
    if relu:
        y = jnp.maximum(y, 0.0)
    o_ref[...] = y.astype(o_ref.dtype)


def _block_tail_kernel(p_ref, w2_ref, b2_ref, w3_ref, b3_ref, *rest,
                       weights_first, proj):
    """Fused bottleneck tail:
         h2  = relu(conv2_3x3(im2col patches) + b2)          (BN folded)
         y   = conv3_1x1(h2) + b3 + residual                  (identity or
                                                               1x1 projection)
         out = relu(y)                                         (post_relu)
    weights_first=True  -> channels-major (C, M) operands (W @ X)
    weights_first=False -> spatial-major  (M, C) operands (X @ W^T)."""
    if proj:
        xs_ref, ws_ref, bs_ref, o_ref = rest
    else:
        res_ref, o_ref = rest

    def mm(a, b):
        return jnp.dot(a, b, preferred_element_type=jnp.float32)

    if weights_first:
        h2 = jnp.maximum(mm(w2_ref[...], p_ref[...]) + b2_ref[...], 0.0)
        y = mm(w3_ref[...], h2) + b3_ref[...]
        if proj:
            y = y + mm(ws_ref[...], xs_ref[...]) + bs_ref[...]
        else:
            y = y + res_ref[...]
    else:
        h2 = jnp.maximum(mm(p_ref[...], w2_ref[...]) + b2_ref[...], 0.0)
        y = mm(h2, w3_ref[...]) + b3_ref[...]
        if proj:
            y = y + mm(xs_ref[...], ws_ref[...]) + bs_ref[...]
        else:
            y = y + res_ref[...]
    o_ref[...] = jnp.maximum(y, 0.0).astype(o_ref.dtype)


def _maxpool_kernel(x_ref, o_ref):
    # x: (9, C, M) pooling taps -> elementwise max over the 9 taps.
    o_ref[...] = jnp.max(x_ref[...], axis=0)


def _pool_fc_kernel(x_ref, w_ref, bias_ref, o_ref):
    # AvgPool2d(input_size//32) + view + SlimmableLinear, fused.
    # x: (HW, N, C) -> mean over HW -> (N, C) @ (C, O) + (1, O)
    feat = jnp.mean(x_ref[...], axis=0)
    o_ref[...] = (jnp.dot(feat, w_ref[...],
                          preferred_element_type=jnp.float32)
                  + bias_ref[...]).astype(o_ref.dtype)


# ---------------------------------------------------------------------------
# Pallas wrappers
# ---------------------------------------------------------------------------
def _mm_call(a, b, bias2d, res=None, relu=False, out_dtype=jnp.float32):
    kernel = functools.partial(_mm_kernel, relu=relu, has_res=res is not None)
    args = [a, b, bias2d] + ([res] if res is not None else [])
    return pl.pallas_call(
        kernel,
        out_shape=jax.ShapeDtypeStruct((a.shape[0], b.shape[1]), out_dtype),
    )(*args)


def _block_tail_call(p, w2, b2, w3, b3, *, res=None, xs=None, ws=None, bs=None,
                     weights_first):
    proj = xs is not None
    oshape = (w3.shape[0], p.shape[1]) if weights_first else (p.shape[0],
                                                              w3.shape[1])
    kernel = functools.partial(_block_tail_kernel,
                               weights_first=weights_first, proj=proj)
    args = [p, w2, b2, w3, b3]
    args += [xs, ws, bs] if proj else [res]
    return pl.pallas_call(
        kernel, out_shape=jax.ShapeDtypeStruct(oshape, jnp.float32))(*args)


def _out_hw(h, w, k, stride, pad):
    return (h + 2 * pad - k) // stride + 1, (w + 2 * pad - k) // stride + 1


def _im2col_cm(x, k, stride, pad):
    """x: (C, N, H, W) -> (k*k*C, N*Ho*Wo) patches (tap-major rows)."""
    C, N, H, W = x.shape
    Ho, Wo = _out_hw(H, W, k, stride, pad)
    M = N * Ho * Wo
    if k == 1 and pad == 0:
        xs = x if stride == 1 else x[:, :, ::stride, ::stride]
        return xs.reshape(C, M)
    xp = jnp.pad(x, ((0, 0), (0, 0), (pad, pad), (pad, pad)))
    cols = [xp[:, :, dh:dh + stride * (Ho - 1) + 1:stride,
               dw:dw + stride * (Wo - 1) + 1:stride].reshape(C, M)
            for dh in range(k) for dw in range(k)]
    return jnp.concatenate(cols, axis=0)


def _im2col_mc(x, k, stride, pad):
    """x: (N, H, W, C) -> (N*Ho*Wo, k*k*C) patches (tap-major columns)."""
    N, H, W, C = x.shape
    Ho, Wo = _out_hw(H, W, k, stride, pad)
    M = N * Ho * Wo
    if k == 1 and pad == 0:
        xs = x if stride == 1 else x[:, ::stride, ::stride, :]
        return xs.reshape(M, C)
    xp = jnp.pad(x, ((0, 0), (pad, pad), (pad, pad), (0, 0)))
    cols = [xp[:, dh:dh + stride * (Ho - 1) + 1:stride,
               dw:dw + stride * (Wo - 1) + 1:stride, :].reshape(M, C)
            for dh in range(k) for dw in range(k)]
    return jnp.concatenate(cols, axis=1)


def conv_cm(x, w, bias, k, stride, pad, relu):
    """SlimmableConv2d + folded SwitchableBatchNorm2d (+ReLU), (C,N,H,W) layout."""
    C, N, H, W = x.shape
    Cout = w.shape[0]
    Ho, Wo = _out_hw(H, W, k, stride, pad)
    patches = _im2col_cm(x, k, stride, pad)
    y = _mm_call(w.reshape(Cout, -1), patches, bias.reshape(Cout, 1), relu=relu)
    return y.reshape(Cout, N, Ho, Wo)


def maxpool_3x3_s2_p1_cm(x):
    """MaxPool2d(3, 2, 1) on (C, N, H, W); 9 taps, single whole-tile kernel."""
    C, N, H, W = x.shape
    Ho, Wo = _out_hw(H, W, 3, 2, 1)
    M = N * Ho * Wo
    xp = jnp.pad(x, ((0, 0), (0, 0), (1, 1), (1, 1)),
                 constant_values=-jnp.inf)
    taps = [xp[:, :, dh:dh + 2 * (Ho - 1) + 1:2,
               dw:dw + 2 * (Wo - 1) + 1:2].reshape(C, M)
            for dh in range(3) for dw in range(3)]
    stacked = jnp.stack(taps, axis=0)                       # (9, C, M)
    out = pl.pallas_call(
        _maxpool_kernel,
        out_shape=jax.ShapeDtypeStruct((C, M), x.dtype))(stacked)
    return out.reshape(C, N, Ho, Wo)


# ---------------------------------------------------------------------------
# Model: Block + Model.forward
# ---------------------------------------------------------------------------
def block_cm(x, bp, stride):
    """Bottleneck in channels-major (C, N, H, W) layout: 2 pallas_calls."""
    Cin, N, H, W = x.shape
    Cm1, Cm2, Cout = bp['w1'].shape[0], bp['w2'].shape[0], bp['w3'].shape[0]
    Ho, Wo = _out_hw(H, W, 3, stride, 1)
    # conv1 (1x1) + BN + ReLU
    h1 = _mm_call(bp['w1'].reshape(Cm1, Cin), x.reshape(Cin, N * H * W),
                  bp['b1'].reshape(Cm1, 1), relu=True)
    patches = _im2col_cm(h1.reshape(Cm1, N, H, W), 3, stride, 1)
    w2 = bp['w2'].reshape(Cm2, 9 * Cm1)
    w3 = bp['w3'].reshape(Cout, Cm2)
    if 'ws' in bp:                                          # projection shortcut
        out = _block_tail_call(
            patches, w2, bp['b2'].reshape(Cm2, 1), w3, bp['b3'].reshape(Cout, 1),
            xs=_im2col_cm(x, 1, stride, 0), ws=bp['ws'].reshape(Cout, Cin),
            bs=bp['bs'].reshape(Cout, 1), weights_first=True)
    else:                                                   # identity residual
        out = _block_tail_call(
            patches, w2, bp['b2'].reshape(Cm2, 1), w3, bp['b3'].reshape(Cout, 1),
            res=x.reshape(Cin, N * H * W), weights_first=True)
    return out.reshape(Cout, N, Ho, Wo)


def block_mc(x, bp, stride):
    """Bottleneck in spatial-major (N, H, W, C) layout (channels on lanes)."""
    N, H, W, Cin = x.shape
    Cm1, Cm2, Cout = bp['w1'].shape[0], bp['w2'].shape[0], bp['w3'].shape[0]
    Ho, Wo = _out_hw(H, W, 3, stride, 1)
    h1 = _mm_call(x.reshape(N * H * W, Cin), bp['w1'].reshape(Cm1, Cin).T,
                  bp['b1'].reshape(1, Cm1), relu=True)
    patches = _im2col_mc(h1.reshape(N, H, W, Cm1), 3, stride, 1)
    w2t = bp['w2'].reshape(Cm2, 9 * Cm1).T
    w3t = bp['w3'].reshape(Cout, Cm2).T
    if 'ws' in bp:
        out = _block_tail_call(
            patches, w2t, bp['b2'].reshape(1, Cm2), w3t, bp['b3'].reshape(1, Cout),
            xs=_im2col_mc(x, 1, stride, 0), ws=bp['ws'].reshape(Cout, Cin).T,
            bs=bp['bs'].reshape(1, Cout), weights_first=False)
    else:
        out = _block_tail_call(
            patches, w2t, bp['b2'].reshape(1, Cm2), w3t, bp['b3'].reshape(1, Cout),
            res=x.reshape(N * H * W, Cin), weights_first=False)
    return out.reshape(N, Ho, Wo, Cout)


def model_forward(x_nchw, params):
    # NCHW -> channels-leading (C, N, H, W) f32 for the high-M early layers.
    x = jnp.transpose(x_nchw, (1, 0, 2, 3)).astype(jnp.float32)

    # stem: conv7x7 s2 p3 + BN + ReLU, then MaxPool(3, 2, 1)
    x = conv_cm(x, params['stem_w'], params['stem_b'], 7, 2, 3, relu=True)
    x = maxpool_3x3_s2_p1_cm(x)

    mc = False
    for bp, stride, sid in zip(params['blocks'], params['strides'],
                               params['stage_ids']):
        if sid >= 1 and not mc:
            # M = N*H*W drops below 128 from stage 2 on: switch to (N,H,W,C)
            # so Cout (32/64/128) sits on the 128-lane axis.
            x = jnp.transpose(x, (1, 2, 3, 0))
            mc = True
        x = block_mc(x, bp, stride) if mc else block_cm(x, bp, stride)

    # AvgPool2d(input_size // 32) + view(-1, C) + SlimmableLinear, fused.
    N, H, W, C = x.shape
    x_taps = x.reshape(N, H * W, C).transpose(1, 0, 2)      # (HW, N, C)
    num_classes = params['fc_w'].shape[0]
    logits = pl.pallas_call(
        _pool_fc_kernel,
        out_shape=jax.ShapeDtypeStruct((N, num_classes), jnp.float32),
    )(x_taps, params['fc_w'].T, params['fc_b'].reshape(1, num_classes))
    return logits                                            # (N, num_classes)


# ---------------------------------------------------------------------------
# Deterministic parameter construction (mirrors Model.reset_parameters)
# ---------------------------------------------------------------------------
def _fold_bn(key, c, eps=1e-5):
    # reset_parameters: gamma = 1, beta = 0.  Running stats are perturbed
    # deterministically so the folded affine path is exercised.
    k1, k2 = jax.random.split(key)
    gamma = jnp.ones((c,), jnp.float32)
    beta = jnp.zeros((c,), jnp.float32)
    mean = 0.1 * jax.random.normal(k1, (c,), jnp.float32)
    var = 1.0 + 0.1 * jax.random.uniform(k2, (c,), jnp.float32)
    scale = gamma / jnp.sqrt(var + eps)
    bias = beta - mean * scale
    return scale, bias


def _make_conv_bn(w_key, bn_key, k, cin, cout):
    """Conv weight (Kaiming, sqrt(2/(k*k*cout))) with BN scale folded in."""
    std = math.sqrt(2.0 / (k * k * cout))
    w = std * jax.random.normal(w_key, (cout, k * k, cin), jnp.float32)
    scale, bias = _fold_bn(bn_key, cout)
    return w * scale[:, None, None], bias


def build_params(key, num_classes=10):
    keys = iter(jax.random.split(key, 512))
    nk = lambda: next(keys)
    params = {}

    block_setting = [3, 4, 6, 3]          # depth = 50
    stage_mid = [4, 8, 16, 32]            # slimmed (AutoSlim) channel widths
    stage_out = [16, 32, 64, 128]
    stem_c = 8

    params['stem_w'], params['stem_b'] = _make_conv_bn(nk(), nk(), 7, 3, stem_c)

    blocks, strides, stage_ids = [], [], []
    channels = stem_c
    for stage_id, n in enumerate(block_setting):
        for i in range(n):
            stride = 2 if (i == 0 and stage_id != 0) else 1
            midp = stage_mid[stage_id]
            outp = stage_out[stage_id]
            bp = {}
            bp['w1'], bp['b1'] = _make_conv_bn(nk(), nk(), 1, channels, midp)
            bp['w2'], bp['b2'] = _make_conv_bn(nk(), nk(), 3, midp, midp)
            bp['w3'], bp['b3'] = _make_conv_bn(nk(), nk(), 1, midp, outp)
            if not (stride == 1 and channels == outp):      # projection shortcut
                bp['ws'], bp['bs'] = _make_conv_bn(nk(), nk(), 1, channels, outp)
            blocks.append(bp)
            strides.append(stride)
            stage_ids.append(stage_id)
            channels = outp
    params['blocks'] = blocks
    params['strides'] = strides
    params['stage_ids'] = stage_ids

    # SlimmableLinear: weight ~ N(0, 0.01), bias = 0.  Stored (out, in).
    params['fc_w'] = 0.01 * jax.random.normal(nk(), (num_classes, channels),
                                              jnp.float32)
    params['fc_b'] = jnp.zeros((num_classes,), jnp.float32)
    return params


if __name__ == "__main__":
    key = jax.random.PRNGKey(0)
    kp, kx = jax.random.split(key)
    params = build_params(kp, num_classes=10)

    # Small ImageNet-style input: N=2, C=3, H=W=32 (input_size % 32 == 0).
    x = jax.random.normal(kx, (2, 3, 32, 32), jnp.float32)

    fwd = jax.jit(lambda inp: model_forward(inp, params))
    out = fwd(x)
    jax.block_until_ready(out)
    assert out.shape == (2, 10), out.shape
    assert bool(jnp.all(jnp.isfinite(out)))
    print("KERNEL_OK")
</pallas_src>

<mosaic_0001>
module attributes {stable_mosaic.version = 11 : i64} {
  func.func @_mm_kernel(%arg0: memref<8x147xf32, #tpu.memory_space<vmem>>, %arg1: memref<147x512xf32, #tpu.memory_space<vmem>>, %arg2: memref<8x1xf32, #tpu.memory_space<vmem>>, %arg3: memref<8x512xf32, #tpu.memory_space<vmem>>) attributes {dimension_semantics = [], scalar_prefetch = 0 : i64, scratch_operands = 0 : i64, tpu.core_type = #tpu.core_type<tc>} {
    %c0 = arith.constant 0 : index
    %c0_0 = arith.constant 0 : index
    %0 = vector.load %arg0[%c0, %c0_0] : memref<8x147xf32, #tpu.memory_space<vmem>>, vector<8x147xf32>
    %c0_1 = arith.constant 0 : index
    %c0_2 = arith.constant 0 : index
    %1 = vector.load %arg1[%c0_1, %c0_2] : memref<147x512xf32, #tpu.memory_space<vmem>>, vector<147x512xf32>
    %cst = arith.constant dense<0.000000e+00> : vector<8x512xf32>
    %2 = tpu.matmul %0, %1, %cst {dimension_numbers = #tpu.dot_dimension_numbers<[1], [0], [0], [1], [0, 0, 1, 1], [], []>} : vector<8x147xf32>, vector<147x512xf32>, vector<8x512xf32> -> vector<8x512xf32>
    %c0_3 = arith.constant 0 : index
    %c0_4 = arith.constant 0 : index
    %3 = vector.load %arg2[%c0_3, %c0_4] : memref<8x1xf32, #tpu.memory_space<vmem>>, vector<8x1xf32>
    %4 = vector.broadcast %3 : vector<8x1xf32> to vector<8x512xf32>
    %5 = arith.addf %2, %4 : vector<8x512xf32>
    %cst_5 = arith.constant 0.000000e+00 : f32
    %6 = vector.broadcast %cst_5 : f32 to vector<8x512xf32>
    %7 = arith.maximumf %5, %6 : vector<8x512xf32>
    %c0_6 = arith.constant 0 : index
    %c0_7 = arith.constant 0 : index
    %8 = vector.load %arg3[%c0_6, %c0_7] : memref<8x512xf32, #tpu.memory_space<vmem>>, vector<8x512xf32>
    tpu.vector_store %arg3[%c0_6, %c0_7], %7 {strides = array<i32>} : memref<8x512xf32, #tpu.memory_space<vmem>>, vector<8x512xf32>,
    return
  }
}

module attributes {stable_mosaic.version = 11 : i64} {
  func.func @_maxpool_kernel(%arg0: memref<9x8x128xf32, #tpu.memory_space<vmem>>, %arg1: memref<8x128xf32, #tpu.memory_space<vmem>>) attributes {dimension_semantics = [], scalar_prefetch = 0 : i64, scratch_operands = 0 : i64, tpu.core_type = #tpu.core_type<tc>} {
    %c0 = arith.constant 0 : index
    %c0_0 = arith.constant 0 : index
    %c0_1 = arith.constant 0 : index
    %0 = vector.load %arg0[%c0, %c0_0, %c0_1] : memref<9x8x128xf32, #tpu.memory_space<vmem>>, vector<9x8x128xf32>
    %cst = arith.constant dense<0xFF800000> : vector<8x128xf32>
    %1 = vector.multi_reduction <maximumf>, %0, %cst [0] : vector<9x8x128xf32> to vector<8x128xf32>
    %c0_2 = arith.constant 0 : index
    %c0_3 = arith.constant 0 : index
    %2 = vector.load %arg1[%c0_2, %c0_3] : memref<8x128xf32, #tpu.memory_space<vmem>>, vector<8x128xf32>
    tpu.vector_store %arg1[%c0_2, %c0_3], %1 {strides = array<i32>} : memref<8x128xf32, #tpu.memory_space<vmem>>, vector<8x128xf32>,
    return
  }
}

module attributes {stable_mosaic.version = 11 : i64} {
  func.func @_mm_kernel(%arg0: memref<4x8xf32, #tpu.memory_space<vmem>>, %arg1: memref<8x128xf32, #tpu.memory_space<vmem>>, %arg2: memref<4x1xf32, #tpu.memory_space<vmem>>, %arg3: memref<4x128xf32, #tpu.memory_space<vmem>>) attributes {dimension_semantics = [], scalar_prefetch = 0 : i64, scratch_operands = 0 : i64, tpu.core_type = #tpu.core_type<tc>} {
    %c0 = arith.constant 0 : index
    %c0_0 = arith.constant 0 : index
    %0 = vector.load %arg0[%c0, %c0_0] : memref<4x8xf32, #tpu.memory_space<vmem>>, vector<4x8xf32>
    %c0_1 = arith.constant 0 : index
    %c0_2 = arith.constant 0 : index
    %1 = vector.load %arg1[%c0_1, %c0_2] : memref<8x128xf32, #tpu.memory_space<vmem>>, vector<8x128xf32>
    %cst = arith.constant dense<0.000000e+00> : vector<4x128xf32>
    %2 = tpu.matmul %0, %1, %cst {dimension_numbers = #tpu.dot_dimension_numbers<[1], [0], [0], [1], [0, 0, 1, 1], [], []>} : vector<4x8xf32>, vector<8x128xf32>, vector<4x128xf32> -> vector<4x128xf32>
    %c0_3 = arith.constant 0 : index
    %c0_4 = arith.constant 0 : index
    %3 = vector.load %arg2[%c0_3, %c0_4] : memref<4x1xf32, #tpu.memory_space<vmem>>, vector<4x1xf32>
    %4 = vector.broadcast %3 : vector<4x1xf32> to vector<4x128xf32>
    %5 = arith.addf %2, %4 : vector<4x128xf32>
    %cst_5 = arith.constant 0.000000e+00 : f32
    %6 = vector.broadcast %cst_5 : f32 to vector<4x128xf32>
    %7 = arith.maximumf %5, %6 : vector<4x128xf32>
    %c0_6 = arith.constant 0 : index
    %c0_7 = arith.constant 0 : index
    %8 = vector.load %arg3[%c0_6, %c0_7] : memref<4x128xf32, #tpu.memory_space<vmem>>, vector<4x128xf32>
    tpu.vector_store %arg3[%c0_6, %c0_7], %7 {strides = array<i32>} : memref<4x128xf32, #tpu.memory_space<vmem>>, vector<4x128xf32>,
    return
  }
}

module attributes {stable_mosaic.version = 11 : i64} {
  func.func @_block_tail_kernel(%arg0: memref<36x128xf32, #tpu.memory_space<vmem>>, %arg1: memref<4x36xf32, #tpu.memory_space<vmem>>, %arg2: memref<4x1xf32, #tpu.memory_space<vmem>>, %arg3: memref<16x4xf32, #tpu.memory_space<vmem>>, %arg4: memref<16x1xf32, #tpu.memory_space<vmem>>, %arg5: memref<8x128xf32, #tpu.memory_space<vmem>>, %arg6: memref<16x8xf32, #tpu.memory_space<vmem>>, %arg7: memref<16x1xf32, #tpu.memory_space<vmem>>, %arg8: memref<16x128xf32, #tpu.memory_space<vmem>>) attributes {dimension_semantics = [], scalar_prefetch = 0 : i64, scratch_operands = 0 : i64, tpu.core_type = #tpu.core_type<tc>} {
    %c0 = arith.constant 0 : index
    %c0_0 = arith.constant 0 : index
    %0 = vector.load %arg1[%c0, %c0_0] : memref<4x36xf32, #tpu.memory_space<vmem>>, vector<4x36xf32>
    %c0_1 = arith.constant 0 : index
    %c0_2 = arith.constant 0 : index
    %1 = vector.load %arg0[%c0_1, %c0_2] : memref<36x128xf32, #tpu.memory_space<vmem>>, vector<36x128xf32>
    %cst = arith.constant dense<0.000000e+00> : vector<4x128xf32>
    %2 = tpu.matmul %0, %1, %cst {dimension_numbers = #tpu.dot_dimension_numbers<[1], [0], [0], [1], [0, 0, 1, 1], [], []>} : vector<4x36xf32>, vector<36x128xf32>, vector<4x128xf32> -> vector<4x128xf32>
    %c0_3 = arith.constant 0 : index
    %c0_4 = arith.constant 0 : index
    %3 = vector.load %arg2[%c0_3, %c0_4] : memref<4x1xf32, #tpu.memory_space<vmem>>, vector<4x1xf32>
    %4 = vector.broadcast %3 : vector<4x1xf32> to vector<4x128xf32>
    %5 = arith.addf %2, %4 : vector<4x128xf32>
    %cst_5 = arith.constant 0.000000e+00 : f32
    %6 = vector.broadcast %cst_5 : f32 to vector<4x128xf32>
    %7 = arith.maximumf %5, %6 : vector<4x128xf32>
    %c0_6 = arith.constant 0 : index
    %c0_7 = arith.constant 0 : index
    %8 = vector.load %arg3[%c0_6, %c0_7] : memref<16x4xf32, #tpu.memory_space<vmem>>, vector<16x4xf32>
    %cst_8 = arith.constant dense<0.000000e+00> : vector<16x128xf32>
    %9 = tpu.matmul %8, %7, %cst_8 {dimension_numbers = #tpu.dot_dimension_numbers<[1], [0], [0], [1], [0, 0, 1, 1], [], []>} : vector<16x4xf32>, vector<4x128xf32>, vector<16x128xf32> -> vector<16x128xf32>
    %c0_9 = arith.constant 0 : index
    %c0_10 = arith.constant 0 : index
    %10 = vector.load %arg4[%c0_9, %c0_10] : memref<16x1xf32, #tpu.memory_space<vmem>>, vector<16x1xf32>
    %11 = vector.broadcast %10 : vector<16x1xf32> to vector<16x128xf32>
    %12 = arith.addf %9, %11 : vector<16x128xf32>
    %c0_11 = arith.constant 0 : index
    %c0_12 = arith.constant 0 : index
    %13 = vector.load %arg6[%c0_11, %c0_12] : memref<16x8xf32, #tpu.memory_space<vmem>>, vector<16x8xf32>
    %c0_13 = arith.constant 0 : index
    %c0_14 = arith.constant 0 : index
    %14 = vector.load %arg5[%c0_13, %c0_14] : memref<8x128xf32, #tpu.memory_space<vmem>>, vector<8x128xf32>
    %cst_15 = arith.constant dense<0.000000e+00> : vector<16x128xf32>
    %15 = tpu.matmul %13, %14, %cst_15 {dimension_numbers = #tpu.dot_dimension_numbers<[1], [0], [0], [1], [0, 0, 1, 1], [], []>} : vector<16x8xf32>, vector<8x128xf32>, vector<16x128xf32> -> vector<16x128xf32>
    %16 = arith.addf %12, %15 : vector<16x128xf32>
    %c0_16 = arith.constant 0 : index
    %c0_17 = arith.constant 0 : index
    %17 = vector.load %arg7[%c0_16, %c0_17] : memref<16x1xf32, #tpu.memory_space<vmem>>, vector<16x1xf32>
    %18 = vector.broadcast %17 : vector<16x1xf32> to vector<16x128xf32>
    %19 = arith.addf %16, %18 : vector<16x128xf32>
    %cst_18 = arith.constant 0.000000e+00 : f32
    %20 = vector.broadcast %cst_18 : f32 to vector<16x128xf32>
    %21 = arith.maximumf %19, %20 : vector<16x128xf32>
    %c0_19 = arith.constant 0 : index
    %c0_20 = arith.constant 0 : index
    %22 = vector.load %arg8[%c0_19, %c0_20] : memref<16x128xf32, #tpu.memory_space<vmem>>, vector<16x128xf32>
    tpu.vector_store %arg8[%c0_19, %c0_20], %21 {strides = array<i32>} : memref<16x128xf32, #tpu.memory_space<vmem>>, vector<16x128xf32>,
    return
  }
}

module attributes {stable_mosaic.version = 11 : i64} {
  func.func @_mm_kernel(%arg0: memref<4x16xf32, #tpu.memory_space<vmem>>, %arg1: memref<16x128xf32, #tpu.memory_space<vmem>>, %arg2: memref<4x1xf32, #tpu.memory_space<vmem>>, %arg3: memref<4x128xf32, #tpu.memory_space<vmem>>) attributes {dimension_semantics = [], scalar_prefetch = 0 : i64, scratch_operands = 0 : i64, tpu.core_type = #tpu.core_type<tc>} {
    %c0 = arith.constant 0 : index
    %c0_0 = arith.constant 0 : index
    %0 = vector.load %arg0[%c0, %c0_0] : memref<4x16xf32, #tpu.memory_space<vmem>>, vector<4x16xf32>
    %c0_1 = arith.constant 0 : index
    %c0_2 = arith.constant 0 : index
    %1 = vector.load %arg1[%c0_1, %c0_2] : memref<16x128xf32, #tpu.memory_space<vmem>>, vector<16x128xf32>
    %cst = arith.constant dense<0.000000e+00> : vector<4x128xf32>
    %2 = tpu.matmul %0, %1, %cst {dimension_numbers = #tpu.dot_dimension_numbers<[1], [0], [0], [1], [0, 0, 1, 1], [], []>} : vector<4x16xf32>, vector<16x128xf32>, vector<4x128xf32> -> vector<4x128xf32>
    %c0_3 = arith.constant 0 : index
    %c0_4 = arith.constant 0 : index
    %3 = vector.load %arg2[%c0_3, %c0_4] : memref<4x1xf32, #tpu.memory_space<vmem>>, vector<4x1xf32>
    %4 = vector.broadcast %3 : vector<4x1xf32> to vector<4x128xf32>
    %5 = arith.addf %2, %4 : vector<4x128xf32>
    %cst_5 = arith.constant 0.000000e+00 : f32
    %6 = vector.broadcast %cst_5 : f32 to vector<4x128xf32>
    %7 = arith.maximumf %5, %6 : vector<4x128xf32>
    %c0_6 = arith.constant 0 : index
    %c0_7 = arith.constant 0 : index
    %8 = vector.load %arg3[%c0_6, %c0_7] : memref<4x128xf32, #tpu.memory_space<vmem>>, vector<4x128xf32>
    tpu.vector_store %arg3[%c0_6, %c0_7], %7 {strides = array<i32>} : memref<4x128xf32, #tpu.memory_space<vmem>>, vector<4x128xf32>,
    return
  }
}

module attributes {stable_mosaic.version = 11 : i64} {
  func.func @_block_tail_kernel(%arg0: memref<36x128xf32, #tpu.memory_space<vmem>>, %arg1: memref<4x36xf32, #tpu.memory_space<vmem>>, %arg2: memref<4x1xf32, #tpu.memory_space<vmem>>, %arg3: memref<16x4xf32, #tpu.memory_space<vmem>>, %arg4: memref<16x1xf32, #tpu.memory_space<vmem>>, %arg5: memref<16x128xf32, #tpu.memory_space<vmem>>, %arg6: memref<16x128xf32, #tpu.memory_space<vmem>>) attributes {dimension_semantics = [], scalar_prefetch = 0 : i64, scratch_operands = 0 : i64, tpu.core_type = #tpu.core_type<tc>} {
    %c0 = arith.constant 0 : index
    %c0_0 = arith.constant 0 : index
    %0 = vector.load %arg1[%c0, %c0_0] : memref<4x36xf32, #tpu.memory_space<vmem>>, vector<4x36xf32>
    %c0_1 = arith.constant 0 : index
    %c0_2 = arith.constant 0 : index
    %1 = vector.load %arg0[%c0_1, %c0_2] : memref<36x128xf32, #tpu.memory_space<vmem>>, vector<36x128xf32>
    %cst = arith.constant dense<0.000000e+00> : vector<4x128xf32>
    %2 = tpu.matmul %0, %1, %cst {dimension_numbers = #tpu.dot_dimension_numbers<[1], [0], [0], [1], [0, 0, 1, 1], [], []>} : vector<4x36xf32>, vector<36x128xf32>, vector<4x128xf32> -> vector<4x128xf32>
    %c0_3 = arith.constant 0 : index
    %c0_4 = arith.constant 0 : index
    %3 = vector.load %arg2[%c0_3, %c0_4] : memref<4x1xf32, #tpu.memory_space<vmem>>, vector<4x1xf32>
    %4 = vector.broadcast %3 : vector<4x1xf32> to vector<4x128xf32>
    %5 = arith.addf %2, %4 : vector<4x128xf32>
    %cst_5 = arith.constant 0.000000e+00 : f32
    %6 = vector.broadcast %cst_5 : f32 to vector<4x128xf32>
    %7 = arith.maximumf %5, %6 : vector<4x128xf32>
    %c0_6 = arith.constant 0 : index
    %c0_7 = arith.constant 0 : index
    %8 = vector.load %arg3[%c0_6, %c0_7] : memref<16x4xf32, #tpu.memory_space<vmem>>, vector<16x4xf32>
    %cst_8 = arith.constant dense<0.000000e+00> : vector<16x128xf32>
    %9 = tpu.matmul %8, %7, %cst_8 {dimension_numbers = #tpu.dot_dimension_numbers<[1], [0], [0], [1], [0, 0, 1, 1], [], []>} : vector<16x4xf32>, vector<4x128xf32>, vector<16x128xf32> -> vector<16x128xf32>
    %c0_9 = arith.constant 0 : index
    %c0_10 = arith.constant 0 : index
    %10 = vector.load %arg4[%c0_9, %c0_10] : memref<16x1xf32, #tpu.memory_space<vmem>>, vector<16x1xf32>
    %11 = vector.broadcast %10 : vector<16x1xf32> to vector<16x128xf32>
    %12 = arith.addf %9, %11 : vector<16x128xf32>
    %c0_11 = arith.constant 0 : index
    %c0_12 = arith.constant 0 : index
    %13 = vector.load %arg5[%c0_11, %c0_12] : memref<16x128xf32, #tpu.memory_space<vmem>>, vector<16x128xf32>
    %14 = arith.addf %12, %13 : vector<16x128xf32>
    %cst_13 = arith.constant 0.000000e+00 : f32
    %15 = vector.broadcast %cst_13 : f32 to vector<16x128xf32>
    %16 = arith.maximumf %14, %15 : vector<16x128xf32>
    %c0_14 = arith.constant 0 : index
    %c0_15 = arith.constant 0 : index
    %17 = vector.load %arg6[%c0_14, %c0_15] : memref<16x128xf32, #tpu.memory_space<vmem>>, vector<16x128xf32>
    tpu.vector_store %arg6[%c0_14, %c0_15], %16 {strides = array<i32>} : memref<16x128xf32, #tpu.memory_space<vmem>>, vector<16x128xf32>,
    return
  }
}

module attributes {stable_mosaic.version = 11 : i64} {
  func.func @_mm_kernel(%arg0: memref<128x16xf32, #tpu.memory_space<vmem>>, %arg1: memref<16x8xf32, #tpu.memory_space<vmem>>, %arg2: memref<1x8xf32, #tpu.memory_space<vmem>>, %arg3: memref<128x8xf32, #tpu.memory_space<vmem>>) attributes {dimension_semantics = [], scalar_prefetch = 0 : i64, scratch_operands = 0 : i64, tpu.core_type = #tpu.core_type<tc>} {
    %c0 = arith.constant 0 : index
    %c0_0 = arith.constant 0 : index
    %0 = vector.load %arg0[%c0, %c0_0] : memref<128x16xf32, #tpu.memory_space<vmem>>, vector<128x16xf32>
    %c0_1 = arith.constant 0 : index
    %c0_2 = arith.constant 0 : index
    %1 = vector.load %arg1[%c0_1, %c0_2] : memref<16x8xf32, #tpu.memory_space<vmem>>, vector<16x8xf32>
    %cst = arith.constant dense<0.000000e+00> : vector<128x8xf32>
    %2 = tpu.matmul %0, %1, %cst {dimension_numbers = #tpu.dot_dimension_numbers<[1], [0], [0], [1], [0, 0, 1, 1], [], []>} : vector<128x16xf32>, vector<16x8xf32>, vector<128x8xf32> -> vector<128x8xf32>
    %c0_3 = arith.constant 0 : index
    %c0_4 = arith.constant 0 : index
    %3 = vector.load %arg2[%c0_3, %c0_4] : memref<1x8xf32, #tpu.memory_space<vmem>>, vector<1x8xf32>
    %4 = vector.broadcast %3 : vector<1x8xf32> to vector<128x8xf32>
    %5 = arith.addf %2, %4 : vector<128x8xf32>
    %cst_5 = arith.constant 0.000000e+00 : f32
    %6 = vector.broadcast %cst_5 : f32 to vector<128x8xf32>
    %7 = arith.maximumf %5, %6 : vector<128x8xf32>
    %c0_6 = arith.constant 0 : index
    %c0_7 = arith.constant 0 : index
    %8 = vector.load %arg3[%c0_6, %c0_7] : memref<128x8xf32, #tpu.memory_space<vmem>>, vector<128x8xf32>
    tpu.vector_store %arg3[%c0_6, %c0_7], %7 {strides = array<i32>} : memref<128x8xf32, #tpu.memory_space<vmem>>, vector<128x8xf32>,
    return
  }
}

module attributes {stable_mosaic.version = 11 : i64} {
  func.func @_block_tail_kernel(%arg0: memref<32x72xf32, #tpu.memory_space<vmem>>, %arg1: memref<72x8xf32, #tpu.memory_space<vmem>>, %arg2: memref<1x8xf32, #tpu.memory_space<vmem>>, %arg3: memref<8x32xf32, #tpu.memory_space<vmem>>, %arg4: memref<1x32xf32, #tpu.memory_space<vmem>>, %arg5: memref<32x16xf32, #tpu.memory_space<vmem>>, %arg6: memref<16x32xf32, #tpu.memory_space<vmem>>, %arg7: memref<1x32xf32, #tpu.memory_space<vmem>>, %arg8: memref<32x32xf32, #tpu.memory_space<vmem>>) attributes {dimension_semantics = [], scalar_prefetch = 0 : i64, scratch_operands = 0 : i64, tpu.core_type = #tpu.core_type<tc>} {
    %c0 = arith.constant 0 : index
    %c0_0 = arith.constant 0 : index
    %0 = vector.load %arg0[%c0, %c0_0] : memref<32x72xf32, #tpu.memory_space<vmem>>, vector<32x72xf32>
    %c0_1 = arith.constant 0 : index
    %c0_2 = arith.constant 0 : index
    %1 = vector.load %arg1[%c0_1, %c0_2] : memref<72x8xf32, #tpu.memory_space<vmem>>, vector<72x8xf32>
    %cst = arith.constant dense<0.000000e+00> : vector<32x8xf32>
    %2 = tpu.matmul %0, %1, %cst {dimension_numbers = #tpu.dot_dimension_numbers<[1], [0], [0], [1], [0, 0, 1, 1], [], []>} : vector<32x72xf32>, vector<72x8xf32>, vector<32x8xf32> -> vector<32x8xf32>
    %c0_3 = arith.constant 0 : index
    %c0_4 = arith.constant 0 : index
    %3 = vector.load %arg2[%c0_3, %c0_4] : memref<1x8xf32, #tpu.memory_space<vmem>>, vector<1x8xf32>
    %4 = vector.broadcast %3 : vector<1x8xf32> to vector<32x8xf32>
    %5 = arith.addf %2, %4 : vector<32x8xf32>
    %cst_5 = arith.constant 0.000000e+00 : f32
    %6 = vector.broadcast %cst_5 : f32 to vector<32x8xf32>
    %7 = arith.maximumf %5, %6 : vector<32x8xf32>
    %c0_6 = arith.constant 0 : index
    %c0_7 = arith.constant 0 : index
    %8 = vector.load %arg3[%c0_6, %c0_7] : memref<8x32xf32, #tpu.memory_space<vmem>>, vector<8x32xf32>
    %cst_8 = arith.constant dense<0.000000e+00> : vector<32x32xf32>
    %9 = tpu.matmul %7, %8, %cst_8 {dimension_numbers = #tpu.dot_dimension_numbers<[1], [0], [0], [1], [0, 0, 1, 1], [], []>} : vector<32x8xf32>, vector<8x32xf32>, vector<32x32xf32> -> vector<32x32xf32>
    %c0_9 = arith.constant 0 : index
    %c0_10 = arith.constant 0 : index
    %10 = vector.load %arg4[%c0_9, %c0_10] : memref<1x32xf32, #tpu.memory_space<vmem>>, vector<1x32xf32>
    %11 = vector.broadcast %10 : vector<1x32xf32> to vector<32x32xf32>
    %12 = arith.addf %9, %11 : vector<32x32xf32>
    %c0_11 = arith.constant 0 : index
    %c0_12 = arith.constant 0 : index
    %13 = vector.load %arg5[%c0_11, %c0_12] : memref<32x16xf32, #tpu.memory_space<vmem>>, vector<32x16xf32>
    %c0_13 = arith.constant 0 : index
    %c0_14 = arith.constant 0 : index
    %14 = vector.load %arg6[%c0_13, %c0_14] : memref<16x32xf32, #tpu.memory_space<vmem>>, vector<16x32xf32>
    %cst_15 = arith.constant dense<0.000000e+00> : vector<32x32xf32>
    %15 = tpu.matmul %13, %14, %cst_15 {dimension_numbers = #tpu.dot_dimension_numbers<[1], [0], [0], [1], [0, 0, 1, 1], [], []>} : vector<32x16xf32>, vector<16x32xf32>, vector<32x32xf32> -> vector<32x32xf32>
    %16 = arith.addf %12, %15 : vector<32x32xf32>
    %c0_16 = arith.constant 0 : index
    %c0_17 = arith.constant 0 : index
    %17 = vector.load %arg7[%c0_16, %c0_17] : memref<1x32xf32, #tpu.memory_space<vmem>>, vector<1x32xf32>
    %18 = vector.broadcast %17 : vector<1x32xf32> to vector<32x32xf32>
    %19 = arith.addf %16, %18 : vector<32x32xf32>
    %cst_18 = arith.constant 0.000000e+00 : f32
    %20 = vector.broadcast %cst_18 : f32 to vector<32x32xf32>
    %21 = arith.maximumf %19, %20 : vector<32x32xf32>
    %c0_19 = arith.constant 0 : index
    %c0_20 = arith.constant 0 : index
    %22 = vector.load %arg8[%c0_19, %c0_20] : memref<32x32xf32, #tpu.memory_space<vmem>>, vector<32x32xf32>
    tpu.vector_store %arg8[%c0_19, %c0_20], %21 {strides = array<i32>} : memref<32x32xf32, #tpu.memory_space<vmem>>, vector<32x32xf32>,
    return
  }
}

module attributes {stable_mosaic.version = 11 : i64} {
  func.func @_mm_kernel(%arg0: memref<32x32xf32, #tpu.memory_space<vmem>>, %arg1: memref<32x8xf32, #tpu.memory_space<vmem>>, %arg2: memref<1x8xf32, #tpu.memory_space<vmem>>, %arg3: memref<32x8xf32, #tpu.memory_space<vmem>>) attributes {dimension_semantics = [], scalar_prefetch = 0 : i64, scratch_operands = 0 : i64, tpu.core_type = #tpu.core_type<tc>} {
    %c0 = arith.constant 0 : index
    %c0_0 = arith.constant 0 : index
    %0 = vector.load %arg0[%c0, %c0_0] : memref<32x32xf32, #tpu.memory_space<vmem>>, vector<32x32xf32>
    %c0_1 = arith.constant 0 : index
    %c0_2 = arith.constant 0 : index
    %1 = vector.load %arg1[%c0_1, %c0_2] : memref<32x8xf32, #tpu.memory_space<vmem>>, vector<32x8xf32>
    %cst = arith.constant dense<0.000000e+00> : vector<32x8xf32>
    %2 = tpu.matmul %0, %1, %cst {dimension_numbers = #tpu.dot_dimension_numbers<[1], [0], [0], [1], [0, 0, 1, 1], [], []>} : vector<32x32xf32>, vector<32x8xf32>, vector<32x8xf32> -> vector<32x8xf32>
    %c0_3 = arith.constant 0 : index
    %c0_4 = arith.constant 0 : index
    %3 = vector.load %arg2[%c0_3, %c0_4] : memref<1x8xf32, #tpu.memory_space<vmem>>, vector<1x8xf32>
    %4 = vector.broadcast %3 : vector<1x8xf32> to vector<32x8xf32>
    %5 = arith.addf %2, %4 : vector<32x8xf32>
    %cst_5 = arith.constant 0.000000e+00 : f32
    %6 = vector.broadcast %cst_5 : f32 to vector<32x8xf32>
    %7 = arith.maximumf %5, %6 : vector<32x8xf32>
    %c0_6 = arith.constant 0 : index
    %c0_7 = arith.constant 0 : index
    %8 = vector.load %arg3[%c0_6, %c0_7] : memref<32x8xf32, #tpu.memory_space<vmem>>, vector<32x8xf32>
    tpu.vector_store %arg3[%c0_6, %c0_7], %7 {strides = array<i32>} : memref<32x8xf32, #tpu.memory_space<vmem>>, vector<32x8xf32>,
    return
  }
}

module attributes {stable_mosaic.version = 11 : i64} {
  func.func @_block_tail_kernel(%arg0: memref<32x72xf32, #tpu.memory_space<vmem>>, %arg1: memref<72x8xf32, #tpu.memory_space<vmem>>, %arg2: memref<1x8xf32, #tpu.memory_space<vmem>>, %arg3: memref<8x32xf32, #tpu.memory_space<vmem>>, %arg4: memref<1x32xf32, #tpu.memory_space<vmem>>, %arg5: memref<32x32xf32, #tpu.memory_space<vmem>>, %arg6: memref<32x32xf32, #tpu.memory_space<vmem>>) attributes {dimension_semantics = [], scalar_prefetch = 0 : i64, scratch_operands = 0 : i64, tpu.core_type = #tpu.core_type<tc>} {
    %c0 = arith.constant 0 : index
    %c0_0 = arith.constant 0 : index
    %0 = vector.load %arg0[%c0, %c0_0] : memref<32x72xf32, #tpu.memory_space<vmem>>, vector<32x72xf32>
    %c0_1 = arith.constant 0 : index
    %c0_2 = arith.constant 0 : index
    %1 = vector.load %arg1[%c0_1, %c0_2] : memref<72x8xf32, #tpu.memory_space<vmem>>, vector<72x8xf32>
    %cst = arith.constant dense<0.000000e+00> : vector<32x8xf32>
    %2 = tpu.matmul %0, %1, %cst {dimension_numbers = #tpu.dot_dimension_numbers<[1], [0], [0], [1], [0, 0, 1, 1], [], []>} : vector<32x72xf32>, vector<72x8xf32>, vector<32x8xf32> -> vector<32x8xf32>
    %c0_3 = arith.constant 0 : index
    %c0_4 = arith.constant 0 : index
    %3 = vector.load %arg2[%c0_3, %c0_4] : memref<1x8xf32, #tpu.memory_space<vmem>>, vector<1x8xf32>
    %4 = vector.broadcast %3 : vector<1x8xf32> to vector<32x8xf32>
    %5 = arith.addf %2, %4 : vector<32x8xf32>
    %cst_5 = arith.constant 0.000000e+00 : f32
    %6 = vector.broadcast %cst_5 : f32 to vector<32x8xf32>
    %7 = arith.maximumf %5, %6 : vector<32x8xf32>
    %c0_6 = arith.constant 0 : index
    %c0_7 = arith.constant 0 : index
    %8 = vector.load %arg3[%c0_6, %c0_7] : memref<8x32xf32, #tpu.memory_space<vmem>>, vector<8x32xf32>
    %cst_8 = arith.constant dense<0.000000e+00> : vector<32x32xf32>
    %9 = tpu.matmul %7, %8, %cst_8 {dimension_numbers = #tpu.dot_dimension_numbers<[1], [0], [0], [1], [0, 0, 1, 1], [], []>} : vector<32x8xf32>, vector<8x32xf32>, vector<32x32xf32> -> vector<32x32xf32>
    %c0_9 = arith.constant 0 : index
    %c0_10 = arith.constant 0 : index
    %10 = vector.load %arg4[%c0_9, %c0_10] : memref<1x32xf32, #tpu.memory_space<vmem>>, vector<1x32xf32>
    %11 = vector.broadcast %10 : vector<1x32xf32> to vector<32x32xf32>
    %12 = arith.addf %9, %11 : vector<32x32xf32>
    %c0_11 = arith.constant 0 : index
    %c0_12 = arith.constant 0 : index
    %13 = vector.load %arg5[%c0_11, %c0_12] : memref<32x32xf32, #tpu.memory_space<vmem>>, vector<32x32xf32>
    %14 = arith.addf %12, %13 : vector<32x32xf32>
    %cst_13 = arith.constant 0.000000e+00 : f32
    %15 = vector.broadcast %cst_13 : f32 to vector<32x32xf32>
    %16 = arith.maximumf %14, %15 : vector<32x32xf32>
    %c0_14 = arith.constant 0 : index
    %c0_15 = arith.constant 0 : index
    %17 = vector.load %arg6[%c0_14, %c0_15] : memref<32x32xf32, #tpu.memory_space<vmem>>, vector<32x32xf32>
    tpu.vector_store %arg6[%c0_14, %c0_15], %16 {strides = array<i32>} : memref<32x32xf32, #tpu.memory_space<vmem>>, vector<32x32xf32>,
    return
  }
}

module attributes {stable_mosaic.version = 11 : i64} {
  func.func @_mm_kernel(%arg0: memref<32x32xf32, #tpu.memory_space<vmem>>, %arg1: memref<32x16xf32, #tpu.memory_space<vmem>>, %arg2: memref<1x16xf32, #tpu.memory_space<vmem>>, %arg3: memref<32x16xf32, #tpu.memory_space<vmem>>) attributes {dimension_semantics = [], scalar_prefetch = 0 : i64, scratch_operands = 0 : i64, tpu.core_type = #tpu.core_type<tc>} {
    %c0 = arith.constant 0 : index
    %c0_0 = arith.constant 0 : index
    %0 = vector.load %arg0[%c0, %c0_0] : memref<32x32xf32, #tpu.memory_space<vmem>>, vector<32x32xf32>
    %c0_1 = arith.constant 0 : index
    %c0_2 = arith.constant 0 : index
    %1 = vector.load %arg1[%c0_1, %c0_2] : memref<32x16xf32, #tpu.memory_space<vmem>>, vector<32x16xf32>
    %cst = arith.constant dense<0.000000e+00> : vector<32x16xf32>
    %2 = tpu.matmul %0, %1, %cst {dimension_numbers = #tpu.dot_dimension_numbers<[1], [0], [0], [1], [0, 0, 1, 1], [], []>} : vector<32x32xf32>, vector<32x16xf32>, vector<32x16xf32> -> vector<32x16xf32>
    %c0_3 = arith.constant 0 : index
    %c0_4 = arith.constant 0 : index
    %3 = vector.load %arg2[%c0_3, %c0_4] : memref<1x16xf32, #tpu.memory_space<vmem>>, vector<1x16xf32>
    %4 = vector.broadcast %3 : vector<1x16xf32> to vector<32x16xf32>
    %5 = arith.addf %2, %4 : vector<32x16xf32>
    %cst_5 = arith.constant 0.000000e+00 : f32
    %6 = vector.broadcast %cst_5 : f32 to vector<32x16xf32>
    %7 = arith.maximumf %5, %6 : vector<32x16xf32>
    %c0_6 = arith.constant 0 : index
    %c0_7 = arith.constant 0 : index
    %8 = vector.load %arg3[%c0_6, %c0_7] : memref<32x16xf32, #tpu.memory_space<vmem>>, vector<32x16xf32>
    tpu.vector_store %arg3[%c0_6, %c0_7], %7 {strides = array<i32>} : memref<32x16xf32, #tpu.memory_space<vmem>>, vector<32x16xf32>,
    return
  }
}

module attributes {stable_mosaic.version = 11 : i64} {
  func.func @_block_tail_kernel(%arg0: memref<8x144xf32, #tpu.memory_space<vmem>>, %arg1: memref<144x16xf32, #tpu.memory_space<vmem>>, %arg2: memref<1x16xf32, #tpu.memory_space<vmem>>, %arg3: memref<16x64xf32, #tpu.memory_space<vmem>>, %arg4: memref<1x64xf32, #tpu.memory_space<vmem>>, %arg5: memref<8x32xf32, #tpu.memory_space<vmem>>, %arg6: memref<32x64xf32, #tpu.memory_space<vmem>>, %arg7: memref<1x64xf32, #tpu.memory_space<vmem>>, %arg8: memref<8x64xf32, #tpu.memory_space<vmem>>) attributes {dimension_semantics = [], scalar_prefetch = 0 : i64, scratch_operands = 0 : i64, tpu.core_type = #tpu.core_type<tc>} {
    %c0 = arith.constant 0 : index
    %c0_0 = arith.constant 0 : index
    %0 = vector.load %arg0[%c0, %c0_0] : memref<8x144xf32, #tpu.memory_space<vmem>>, vector<8x144xf32>
    %c0_1 = arith.constant 0 : index
    %c0_2 = arith.constant 0 : index
    %1 = vector.load %arg1[%c0_1, %c0_2] : memref<144x16xf32, #tpu.memory_space<vmem>>, vector<144x16xf32>
    %cst = arith.constant dense<0.000000e+00> : vector<8x16xf32>
    %2 = tpu.matmul %0, %1, %cst {dimension_numbers = #tpu.dot_dimension_numbers<[1], [0], [0], [1], [0, 0, 1, 1], [], []>} : vector<8x144xf32>, vector<144x16xf32>, vector<8x16xf32> -> vector<8x16xf32>
    %c0_3 = arith.constant 0 : index
    %c0_4 = arith.constant 0 : index
    %3 = vector.load %arg2[%c0_3, %c0_4] : memref<1x16xf32, #tpu.memory_space<vmem>>, vector<1x16xf32>
    %4 = vector.broadcast %3 : vector<1x16xf32> to vector<8x16xf32>
    %5 = arith.addf %2, %4 : vector<8x16xf32>
    %cst_5 = arith.constant 0.000000e+00 : f32
    %6 = vector.broadcast %cst_5 : f32 to vector<8x16xf32>
    %7 = arith.maximumf %5, %6 : vector<8x16xf32>
    %c0_6 = arith.constant 0 : index
    %c0_7 = arith.constant 0 : index
    %8 = vector.load %arg3[%c0_6, %c0_7] : memref<16x64xf32, #tpu.memory_space<vmem>>, vector<16x64xf32>
    %cst_8 = arith.constant dense<0.000000e+00> : vector<8x64xf32>
    %9 = tpu.matmul %7, %8, %cst_8 {dimension_numbers = #tpu.dot_dimension_numbers<[1], [0], [0], [1], [0, 0, 1, 1], [], []>} : vector<8x16xf32>, vector<16x64xf32>, vector<8x64xf32> -> vector<8x64xf32>
    %c0_9 = arith.constant 0 : index
    %c0_10 = arith.constant 0 : index
    %10 = vector.load %arg4[%c0_9, %c0_10] : memref<1x64xf32, #tpu.memory_space<vmem>>, vector<1x64xf32>
    %11 = vector.broadcast %10 : vector<1x64xf32> to vector<8x64xf32>
    %12 = arith.addf %9, %11 : vector<8x64xf32>
    %c0_11 = arith.constant 0 : index
    %c0_12 = arith.constant 0 : index
    %13 = vector.load %arg5[%c0_11, %c0_12] : memref<8x32xf32, #tpu.memory_space<vmem>>, vector<8x32xf32>
    %c0_13 = arith.constant 0 : index
    %c0_14 = arith.constant 0 : index
    %14 = vector.load %arg6[%c0_13, %c0_14] : memref<32x64xf32, #tpu.memory_space<vmem>>, vector<32x64xf32>
    %cst_15 = arith.constant dense<0.000000e+00> : vector<8x64xf32>
    %15 = tpu.matmul %13, %14, %cst_15 {dimension_numbers = #tpu.dot_dimension_numbers<[1], [0], [0], [1], [0, 0, 1, 1], [], []>} : vector<8x32xf32>, vector<32x64xf32>, vector<8x64xf32> -> vector<8x64xf32>
    %16 = arith.addf %12, %15 : vector<8x64xf32>
    %c0_16 = arith.constant 0 : index
    %c0_17 = arith.constant 0 : index
    %17 = vector.load %arg7[%c0_16, %c0_17] : memref<1x64xf32, #tpu.memory_space<vmem>>, vector<1x64xf32>
    %18 = vector.broadcast %17 : vector<1x64xf32> to vector<8x64xf32>
    %19 = arith.addf %16, %18 : vector<8x64xf32>
    %cst_18 = arith.constant 0.000000e+00 : f32
    %20 = vector.broadcast %cst_18 : f32 to vector<8x64xf32>
    %21 = arith.maximumf %19, %20 : vector<8x64xf32>
    %c0_19 = arith.constant 0 : index
    %c0_20 = arith.constant 0 : index
    %22 = vector.load %arg8[%c0_19, %c0_20] : memref<8x64xf32, #tpu.memory_space<vmem>>, vector<8x64xf32>
    tpu.vector_store %arg8[%c0_19, %c0_20], %21 {strides = array<i32>} : memref<8x64xf32, #tpu.memory_space<vmem>>, vector<8x64xf32>,
    return
  }
}

module attributes {stable_mosaic.version = 11 : i64} {
  func.func @_mm_kernel(%arg0: memref<8x64xf32, #tpu.memory_space<vmem>>, %arg1: memref<64x16xf32, #tpu.memory_space<vmem>>, %arg2: memref<1x16xf32, #tpu.memory_space<vmem>>, %arg3: memref<8x16xf32, #tpu.memory_space<vmem>>) attributes {dimension_semantics = [], scalar_prefetch = 0 : i64, scratch_operands = 0 : i64, tpu.core_type = #tpu.core_type<tc>} {
    %c0 = arith.constant 0 : index
    %c0_0 = arith.constant 0 : index
    %0 = vector.load %arg0[%c0, %c0_0] : memref<8x64xf32, #tpu.memory_space<vmem>>, vector<8x64xf32>
    %c0_1 = arith.constant 0 : index
    %c0_2 = arith.constant 0 : index
    %1 = vector.load %arg1[%c0_1, %c0_2] : memref<64x16xf32, #tpu.memory_space<vmem>>, vector<64x16xf32>
    %cst = arith.constant dense<0.000000e+00> : vector<8x16xf32>
    %2 = tpu.matmul %0, %1, %cst {dimension_numbers = #tpu.dot_dimension_numbers<[1], [0], [0], [1], [0, 0, 1, 1], [], []>} : vector<8x64xf32>, vector<64x16xf32>, vector<8x16xf32> -> vector<8x16xf32>
    %c0_3 = arith.constant 0 : index
    %c0_4 = arith.constant 0 : index
    %3 = vector.load %arg2[%c0_3, %c0_4] : memref<1x16xf32, #tpu.memory_space<vmem>>, vector<1x16xf32>
    %4 = vector.broadcast %3 : vector<1x16xf32> to vector<8x16xf32>
    %5 = arith.addf %2, %4 : vector<8x16xf32>
    %cst_5 = arith.constant 0.000000e+00 : f32
    %6 = vector.broadcast %cst_5 : f32 to vector<8x16xf32>
    %7 = arith.maximumf %5, %6 : vector<8x16xf32>
    %c0_6 = arith.constant 0 : index
    %c0_7 = arith.constant 0 : index
    %8 = vector.load %arg3[%c0_6, %c0_7] : memref<8x16xf32, #tpu.memory_space<vmem>>, vector<8x16xf32>
    tpu.vector_store %arg3[%c0_6, %c0_7], %7 {strides = array<i32>} : memref<8x16xf32, #tpu.memory_space<vmem>>, vector<8x16xf32>,
    return
  }
}

module attributes {stable_mosaic.version = 11 : i64} {
  func.func @_block_tail_kernel(%arg0: memref<8x144xf32, #tpu.memory_space<vmem>>, %arg1: memref<144x16xf32, #tpu.memory_space<vmem>>, %arg2: memref<1x16xf32, #tpu.memory_space<vmem>>, %arg3: memref<16x64xf32, #tpu.memory_space<vmem>>, %arg4: memref<1x64xf32, #tpu.memory_space<vmem>>, %arg5: memref<8x64xf32, #tpu.memory_space<vmem>>, %arg6: memref<8x64xf32, #tpu.memory_space<vmem>>) attributes {dimension_semantics = [], scalar_prefetch = 0 : i64, scratch_operands = 0 : i64, tpu.core_type = #tpu.core_type<tc>} {
    %c0 = arith.constant 0 : index
    %c0_0 = arith.constant 0 : index
    %0 = vector.load %arg0[%c0, %c0_0] : memref<8x144xf32, #tpu.memory_space<vmem>>, vector<8x144xf32>
    %c0_1 = arith.constant 0 : index
    %c0_2 = arith.constant 0 : index
    %1 = vector.load %arg1[%c0_1, %c0_2] : memref<144x16xf32, #tpu.memory_space<vmem>>, vector<144x16xf32>
    %cst = arith.constant dense<0.000000e+00> : vector<8x16xf32>
    %2 = tpu.matmul %0, %1, %cst {dimension_numbers = #tpu.dot_dimension_numbers<[1], [0], [0], [1], [0, 0, 1, 1], [], []>} : vector<8x144xf32>, vector<144x16xf32>, vector<8x16xf32> -> vector<8x16xf32>
    %c0_3 = arith.constant 0 : index
    %c0_4 = arith.constant 0 : index
    %3 = vector.load %arg2[%c0_3, %c0_4] : memref<1x16xf32, #tpu.memory_space<vmem>>, vector<1x16xf32>
    %4 = vector.broadcast %3 : vector<1x16xf32> to vector<8x16xf32>
    %5 = arith.addf %2, %4 : vector<8x16xf32>
    %cst_5 = arith.constant 0.000000e+00 : f32
    %6 = vector.broadcast %cst_5 : f32 to vector<8x16xf32>
    %7 = arith.maximumf %5, %6 : vector<8x16xf32>
    %c0_6 = arith.constant 0 : index
    %c0_7 = arith.constant 0 : index
    %8 = vector.load %arg3[%c0_6, %c0_7] : memref<16x64xf32, #tpu.memory_space<vmem>>, vector<16x64xf32>
    %cst_8 = arith.constant dense<0.000000e+00> : vector<8x64xf32>
    %9 = tpu.matmul %7, %8, %cst_8 {dimension_numbers = #tpu.dot_dimension_numbers<[1], [0], [0], [1], [0, 0, 1, 1], [], []>} : vector<8x16xf32>, vector<16x64xf32>, vector<8x64xf32> -> vector<8x64xf32>
    %c0_9 = arith.constant 0 : index
    %c0_10 = arith.constant 0 : index
    %10 = vector.load %arg4[%c0_9, %c0_10] : memref<1x64xf32, #tpu.memory_space<vmem>>, vector<1x64xf32>
    %11 = vector.broadcast %10 : vector<1x64xf32> to vector<8x64xf32>
    %12 = arith.addf %9, %11 : vector<8x64xf32>
    %c0_11 = arith.constant 0 : index
    %c0_12 = arith.constant 0 : index
    %13 = vector.load %arg5[%c0_11, %c0_12] : memref<8x64xf32, #tpu.memory_space<vmem>>, vector<8x64xf32>
    %14 = arith.addf %12, %13 : vector<8x64xf32>
    %cst_13 = arith.constant 0.000000e+00 : f32
    %15 = vector.broadcast %cst_13 : f32 to vector<8x64xf32>
    %16 = arith.maximumf %14, %15 : vector<8x64xf32>
    %c0_14 = arith.constant 0 : index
    %c0_15 = arith.constant 0 : index
    %17 = vector.load %arg6[%c0_14, %c0_15] : memref<8x64xf32, #tpu.memory_space<vmem>>, vector<8x64xf32>
    tpu.vector_store %arg6[%c0_14, %c0_15], %16 {strides = array<i32>} : memref<8x64xf32, #tpu.memory_space<vmem>>, vector<8x64xf32>,
    return
  }
}

module attributes {stable_mosaic.version = 11 : i64} {
  func.func @_mm_kernel(%arg0: memref<8x64xf32, #tpu.memory_space<vmem>>, %arg1: memref<64x32xf32, #tpu.memory_space<vmem>>, %arg2: memref<1x32xf32, #tpu.memory_space<vmem>>, %arg3: memref<8x32xf32, #tpu.memory_space<vmem>>) attributes {dimension_semantics = [], scalar_prefetch = 0 : i64, scratch_operands = 0 : i64, tpu.core_type = #tpu.core_type<tc>} {
    %c0 = arith.constant 0 : index
    %c0_0 = arith.constant 0 : index
    %0 = vector.load %arg0[%c0, %c0_0] : memref<8x64xf32, #tpu.memory_space<vmem>>, vector<8x64xf32>
    %c0_1 = arith.constant 0 : index
    %c0_2 = arith.constant 0 : index
    %1 = vector.load %arg1[%c0_1, %c0_2] : memref<64x32xf32, #tpu.memory_space<vmem>>, vector<64x32xf32>
    %cst = arith.constant dense<0.000000e+00> : vector<8x32xf32>
    %2 = tpu.matmul %0, %1, %cst {dimension_numbers = #tpu.dot_dimension_numbers<[1], [0], [0], [1], [0, 0, 1, 1], [], []>} : vector<8x64xf32>, vector<64x32xf32>, vector<8x32xf32> -> vector<8x32xf32>
    %c0_3 = arith.constant 0 : index
    %c0_4 = arith.constant 0 : index
    %3 = vector.load %arg2[%c0_3, %c0_4] : memref<1x32xf32, #tpu.memory_space<vmem>>, vector<1x32xf32>
    %4 = vector.broadcast %3 : vector<1x32xf32> to vector<8x32xf32>
    %5 = arith.addf %2, %4 : vector<8x32xf32>
    %cst_5 = arith.constant 0.000000e+00 : f32
    %6 = vector.broadcast %cst_5 : f32 to vector<8x32xf32>
    %7 = arith.maximumf %5, %6 : vector<8x32xf32>
    %c0_6 = arith.constant 0 : index
    %c0_7 = arith.constant 0 : index
    %8 = vector.load %arg3[%c0_6, %c0_7] : memref<8x32xf32, #tpu.memory_space<vmem>>, vector<8x32xf32>
    tpu.vector_store %arg3[%c0_6, %c0_7], %7 {strides = array<i32>} : memref<8x32xf32, #tpu.memory_space<vmem>>, vector<8x32xf32>,
    return
  }
}

module attributes {stable_mosaic.version = 11 : i64} {
  func.func @_block_tail_kernel(%arg0: memref<2x288xf32, #tpu.memory_space<vmem>>, %arg1: memref<288x32xf32, #tpu.memory_space<vmem>>, %arg2: memref<1x32xf32, #tpu.memory_space<vmem>>, %arg3: memref<32x128xf32, #tpu.memory_space<vmem>>, %arg4: memref<1x128xf32, #tpu.memory_space<vmem>>, %arg5: memref<2x64xf32, #tpu.memory_space<vmem>>, %arg6: memref<64x128xf32, #tpu.memory_space<vmem>>, %arg7: memref<1x128xf32, #tpu.memory_space<vmem>>, %arg8: memref<2x128xf32, #tpu.memory_space<vmem>>) attributes {dimension_semantics = [], scalar_prefetch = 0 : i64, scratch_operands = 0 : i64, tpu.core_type = #tpu.core_type<tc>} {
    %c0 = arith.constant 0 : index
    %c0_0 = arith.constant 0 : index
    %0 = vector.load %arg0[%c0, %c0_0] : memref<2x288xf32, #tpu.memory_space<vmem>>, vector<2x288xf32>
    %c0_1 = arith.constant 0 : index
    %c0_2 = arith.constant 0 : index
    %1 = vector.load %arg1[%c0_1, %c0_2] : memref<288x32xf32, #tpu.memory_space<vmem>>, vector<288x32xf32>
    %cst = arith.constant dense<0.000000e+00> : vector<2x32xf32>
    %2 = tpu.matmul %0, %1, %cst {dimension_numbers = #tpu.dot_dimension_numbers<[1], [0], [0], [1], [0, 0, 1, 1], [], []>} : vector<2x288xf32>, vector<288x32xf32>, vector<2x32xf32> -> vector<2x32xf32>
    %c0_3 = arith.constant 0 : index
    %c0_4 = arith.constant 0 : index
    %3 = vector.load %arg2[%c0_3, %c0_4] : memref<1x32xf32, #tpu.memory_space<vmem>>, vector<1x32xf32>
    %4 = vector.broadcast %3 : vector<1x32xf32> to vector<2x32xf32>
    %5 = arith.addf %2, %4 : vector<2x32xf32>
    %cst_5 = arith.constant 0.000000e+00 : f32
    %6 = vector.broadcast %cst_5 : f32 to vector<2x32xf32>
    %7 = arith.maximumf %5, %6 : vector<2x32xf32>
    %c0_6 = arith.constant 0 : index
    %c0_7 = arith.constant 0 : index
    %8 = vector.load %arg3[%c0_6, %c0_7] : memref<32x128xf32, #tpu.memory_space<vmem>>, vector<32x128xf32>
    %cst_8 = arith.constant dense<0.000000e+00> : vector<2x128xf32>
    %9 = tpu.matmul %7, %8, %cst_8 {dimension_numbers = #tpu.dot_dimension_numbers<[1], [0], [0], [1], [0, 0, 1, 1], [], []>} : vector<2x32xf32>, vector<32x128xf32>, vector<2x128xf32> -> vector<2x128xf32>
    %c0_9 = arith.constant 0 : index
    %c0_10 = arith.constant 0 : index
    %10 = vector.load %arg4[%c0_9, %c0_10] : memref<1x128xf32, #tpu.memory_space<vmem>>, vector<1x128xf32>
    %11 = vector.broadcast %10 : vector<1x128xf32> to vector<2x128xf32>
    %12 = arith.addf %9, %11 : vector<2x128xf32>
    %c0_11 = arith.constant 0 : index
    %c0_12 = arith.constant 0 : index
    %13 = vector.load %arg5[%c0_11, %c0_12] : memref<2x64xf32, #tpu.memory_space<vmem>>, vector<2x64xf32>
    %c0_13 = arith.constant 0 : index
    %c0_14 = arith.constant 0 : index
    %14 = vector.load %arg6[%c0_13, %c0_14] : memref<64x128xf32, #tpu.memory_space<vmem>>, vector<64x128xf32>
    %cst_15 = arith.constant dense<0.000000e+00> : vector<2x128xf32>
    %15 = tpu.matmul %13, %14, %cst_15 {dimension_numbers = #tpu.dot_dimension_numbers<[1], [0], [0], [1], [0, 0, 1, 1], [], []>} : vector<2x64xf32>, vector<64x128xf32>, vector<2x128xf32> -> vector<2x128xf32>
    %16 = arith.addf %12, %15 : vector<2x128xf32>
    %c0_16 = arith.constant 0 : index
    %c0_17 = arith.constant 0 : index
    %17 = vector.load %arg7[%c0_16, %c0_17] : memref<1x128xf32, #tpu.memory_space<vmem>>, vector<1x128xf32>
    %18 = vector.broadcast %17 : vector<1x128xf32> to vector<2x128xf32>
    %19 = arith.addf %16, %18 : vector<2x128xf32>
    %cst_18 = arith.constant 0.000000e+00 : f32
    %20 = vector.broadcast %cst_18 : f32 to vector<2x128xf32>
    %21 = arith.maximumf %19, %20 : vector<2x128xf32>
    %c0_19 = arith.constant 0 : index
    %c0_20 = arith.constant 0 : index
    %22 = vector.load %arg8[%c0_19, %c0_20] : memref<2x128xf32, #tpu.memory_space<vmem>>, vector<2x128xf32>
    tpu.vector_store %arg8[%c0_19, %c0_20], %21 {strides = array<i32>} : memref<2x128xf32, #tpu.memory_space<vmem>>, vector<2x128xf32>,
    return
  }
}

module attributes {stable_mosaic.version = 11 : i64} {
  func.func @_mm_kernel(%arg0: memref<2x128xf32, #tpu.memory_space<vmem>>, %arg1: memref<128x32xf32, #tpu.memory_space<vmem>>, %arg2: memref<1x32xf32, #tpu.memory_space<vmem>>, %arg3: memref<2x32xf32, #tpu.memory_space<vmem>>) attributes {dimension_semantics = [], scalar_prefetch = 0 : i64, scratch_operands = 0 : i64, tpu.core_type = #tpu.core_type<tc>} {
    %c0 = arith.constant 0 : index
    %c0_0 = arith.constant 0 : index
    %0 = vector.load %arg0[%c0, %c0_0] : memref<2x128xf32, #tpu.memory_space<vmem>>, vector<2x128xf32>
    %c0_1 = arith.constant 0 : index
    %c0_2 = arith.constant 0 : index
    %1 = vector.load %arg1[%c0_1, %c0_2] : memref<128x32xf32, #tpu.memory_space<vmem>>, vector<128x32xf32>
    %cst = arith.constant dense<0.000000e+00> : vector<2x32xf32>
    %2 = tpu.matmul %0, %1, %cst {dimension_numbers = #tpu.dot_dimension_numbers<[1], [0], [0], [1], [0, 0, 1, 1], [], []>} : vector<2x128xf32>, vector<128x32xf32>, vector<2x32xf32> -> vector<2x32xf32>
    %c0_3 = arith.constant 0 : index
    %c0_4 = arith.constant 0 : index
    %3 = vector.load %arg2[%c0_3, %c0_4] : memref<1x32xf32, #tpu.memory_space<vmem>>, vector<1x32xf32>
    %4 = vector.broadcast %3 : vector<1x32xf32> to vector<2x32xf32>
    %5 = arith.addf %2, %4 : vector<2x32xf32>
    %cst_5 = arith.constant 0.000000e+00 : f32
    %6 = vector.broadcast %cst_5 : f32 to vector<2x32xf32>
    %7 = arith.maximumf %5, %6 : vector<2x32xf32>
    %c0_6 = arith.constant 0 : index
    %c0_7 = arith.constant 0 : index
    %8 = vector.load %arg3[%c0_6, %c0_7] : memref<2x32xf32, #tpu.memory_space<vmem>>, vector<2x32xf32>
    tpu.vector_store %arg3[%c0_6, %c0_7], %7 {strides = array<i32>} : memref<2x32xf32, #tpu.memory_space<vmem>>, vector<2x32xf32>,
    return
  }
}

module attributes {stable_mosaic.version = 11 : i64} {
  func.func @_block_tail_kernel(%arg0: memref<2x288xf32, #tpu.memory_space<vmem>>, %arg1: memref<288x32xf32, #tpu.memory_space<vmem>>, %arg2: memref<1x32xf32, #tpu.memory_space<vmem>>, %arg3: memref<32x128xf32, #tpu.memory_space<vmem>>, %arg4: memref<1x128xf32, #tpu.memory_space<vmem>>, %arg5: memref<2x128xf32, #tpu.memory_space<vmem>>, %arg6: memref<2x128xf32, #tpu.memory_space<vmem>>) attributes {dimension_semantics = [], scalar_prefetch = 0 : i64, scratch_operands = 0 : i64, tpu.core_type = #tpu.core_type<tc>} {
    %c0 = arith.constant 0 : index
    %c0_0 = arith.constant 0 : index
    %0 = vector.load %arg0[%c0, %c0_0] : memref<2x288xf32, #tpu.memory_space<vmem>>, vector<2x288xf32>
    %c0_1 = arith.constant 0 : index
    %c0_2 = arith.constant 0 : index
    %1 = vector.load %arg1[%c0_1, %c0_2] : memref<288x32xf32, #tpu.memory_space<vmem>>, vector<288x32xf32>
    %cst = arith.constant dense<0.000000e+00> : vector<2x32xf32>
    %2 = tpu.matmul %0, %1, %cst {dimension_numbers = #tpu.dot_dimension_numbers<[1], [0], [0], [1], [0, 0, 1, 1], [], []>} : vector<2x288xf32>, vector<288x32xf32>, vector<2x32xf32> -> vector<2x32xf32>
    %c0_3 = arith.constant 0 : index
    %c0_4 = arith.constant 0 : index
    %3 = vector.load %arg2[%c0_3, %c0_4] : memref<1x32xf32, #tpu.memory_space<vmem>>, vector<1x32xf32>
    %4 = vector.broadcast %3 : vector<1x32xf32> to vector<2x32xf32>
    %5 = arith.addf %2, %4 : vector<2x32xf32>
    %cst_5 = arith.constant 0.000000e+00 : f32
    %6 = vector.broadcast %cst_5 : f32 to vector<2x32xf32>
    %7 = arith.maximumf %5, %6 : vector<2x32xf32>
    %c0_6 = arith.constant 0 : index
    %c0_7 = arith.constant 0 : index
    %8 = vector.load %arg3[%c0_6, %c0_7] : memref<32x128xf32, #tpu.memory_space<vmem>>, vector<32x128xf32>
    %cst_8 = arith.constant dense<0.000000e+00> : vector<2x128xf32>
    %9 = tpu.matmul %7, %8, %cst_8 {dimension_numbers = #tpu.dot_dimension_numbers<[1], [0], [0], [1], [0, 0, 1, 1], [], []>} : vector<2x32xf32>, vector<32x128xf32>, vector<2x128xf32> -> vector<2x128xf32>
    %c0_9 = arith.constant 0 : index
    %c0_10 = arith.constant 0 : index
    %10 = vector.load %arg4[%c0_9, %c0_10] : memref<1x128xf32, #tpu.memory_space<vmem>>, vector<1x128xf32>
    %11 = vector.broadcast %10 : vector<1x128xf32> to vector<2x128xf32>
    %12 = arith.addf %9, %11 : vector<2x128xf32>
    %c0_11 = arith.constant 0 : index
    %c0_12 = arith.constant 0 : index
    %13 = vector.load %arg5[%c0_11, %c0_12] : memref<2x128xf32, #tpu.memory_space<vmem>>, vector<2x128xf32>
    %14 = arith.addf %12, %13 : vector<2x128xf32>
    %cst_13 = arith.constant 0.000000e+00 : f32
    %15 = vector.broadcast %cst_13 : f32 to vector<2x128xf32>
    %16 = arith.maximumf %14, %15 : vector<2x128xf32>
    %c0_14 = arith.constant 0 : index
    %c0_15 = arith.constant 0 : index
    %17 = vector.load %arg6[%c0_14, %c0_15] : memref<2x128xf32, #tpu.memory_space<vmem>>, vector<2x128xf32>
    tpu.vector_store %arg6[%c0_14, %c0_15], %16 {strides = array<i32>} : memref<2x128xf32, #tpu.memory_space<vmem>>, vector<2x128xf32>,
    return
  }
}

module attributes {stable_mosaic.version = 11 : i64} {
  func.func @_pool_fc_kernel(%arg0: memref<1x2x128xf32, #tpu.memory_space<vmem>>, %arg1: memref<128x10xf32, #tpu.memory_space<vmem>>, %arg2: memref<1x10xf32, #tpu.memory_space<vmem>>, %arg3: memref<2x10xf32, #tpu.memory_space<vmem>>) attributes {dimension_semantics = [], scalar_prefetch = 0 : i64, scratch_operands = 0 : i64, tpu.core_type = #tpu.core_type<tc>} {
    %c0 = arith.constant 0 : index
    %c0_0 = arith.constant 0 : index
    %c0_1 = arith.constant 0 : index
    %0 = vector.load %arg0[%c0, %c0_0, %c0_1] : memref<1x2x128xf32, #tpu.memory_space<vmem>>, vector<1x2x128xf32>
    %cst = arith.constant dense<0.000000e+00> : vector<2x128xf32>
    %1 = vector.multi_reduction <add>, %0, %cst [0] : vector<1x2x128xf32> to vector<2x128xf32>
    %cst_2 = arith.constant 1.000000e+00 : f32
    %2 = vector.broadcast %cst_2 : f32 to vector<2x128xf32>
    %3 = arith.divf %1, %2 : vector<2x128xf32>
    %c0_3 = arith.constant 0 : index
    %c0_4 = arith.constant 0 : index
    %4 = vector.load %arg1[%c0_3, %c0_4] : memref<128x10xf32, #tpu.memory_space<vmem>>, vector<128x10xf32>
    %cst_5 = arith.constant dense<0.000000e+00> : vector<2x10xf32>
    %5 = tpu.matmul %3, %4, %cst_5 {dimension_numbers = #tpu.dot_dimension_numbers<[1], [0], [0], [1], [0, 0, 1, 1], [], []>} : vector<2x128xf32>, vector<128x10xf32>, vector<2x10xf32> -> vector<2x10xf32>
    %c0_6 = arith.constant 0 : index
    %c0_7 = arith.constant 0 : index
    %6 = vector.load %arg2[%c0_6, %c0_7] : memref<1x10xf32, #tpu.memory_space<vmem>>, vector<1x10xf32>
    %7 = vector.broadcast %6 : vector<1x10xf32> to vector<2x10xf32>
    %8 = arith.addf %5, %7 : vector<2x10xf32>
    %c0_8 = arith.constant 0 : index
    %c0_9 = arith.constant 0 : index
    %9 = vector.load %arg3[%c0_8, %c0_9] : memref<2x10xf32, #tpu.memory_space<vmem>>, vector<2x10xf32>
    tpu.vector_store %arg3[%c0_8, %c0_9], %8 {strides = array<i32>} : memref<2x10xf32, #tpu.memory_space<vmem>>, vector<2x10xf32>,
    return
  }
}

</mosaic_0001>

<bundles_post_ra>
// kernel: _lambda_.35
= control target key start
LH: loop header
LB: loop body
LE: loop exit
PB: predicated region body
PF: predicated region fallthrough
CT: control target
= control target key end

     0   :  { %v277_v3 = vmov 0   ;;  %vm102_vm0 = vcmask 1042432   ;;  %vm98_vm1 = vcmask 154624   ;;  %s551_s1 = inlined_call_operand.vmem [shape: f32[147,512], index: 1, kind: input, shape index: {}]   ;;  %s552_s0 = inlined_call_operand.vmem [shape: f32[8,147], index: 0, kind: input, shape index: {}]   ;;  %s553_s2 = inlined_call_operand.vmem [shape: f32[8,1], index: 2, kind: input, shape index: {}]   ;;  %s554_s3 = inlined_call_operand.vmem [shape: f32[8,512], index: 3, kind: output, shape index: {}]  }
   0x1   :  { %v77_v0 = vld [vmem:[%s551_s1 + $0x1e8] sm:$0xff]  ;;  %v79_v1 = vld [vmem:[%s551_s1 + $0x1f8] sm:$0xff]  ;;  %v76_v2 = vld [vmem:[%s551_s1 + $0x1e0] sm:$0xff]  ;;  %276 = vset.pattern.permute.xlu0 %v277_v3 }
   0x2   :  { %115 = vmatprep.subr.mxu0 %v77_v0  ;;  %186 = vmatprep.subr.mxu1 %v79_v1  ;;  %v78_v4 = vld [vmem:[%s551_s1 + $0x1f0] sm:$0xff]  ;;  %v73_v5 = vld [vmem:[%s551_s1 + $0x1c8] sm:$0xff]  ;;  %v75_v6 = vld [vmem:[%s551_s1 + $0x1d8] sm:$0xff] }
   0x3   :  { %116 = vmatpush1.msra.mxu0 %v76_v2  ;;  %187 = vmatpush1.msra.mxu1 %v78_v4  ;;  %v72_v7 = vld [vmem:[%s551_s1 + $0x1c0] sm:$0xff]  ;;  %v74_v8 = vld [vmem:[%s551_s1 + $0x1d0] sm:$0xff]  ;;  %v69_v9 = vld [vmem:[%s551_s1 + $0x1a8] sm:$0xff] }
   0x4   :  { %117 = vmatprep.subr.mxu0 %v73_v5  ;;  %188 = vmatprep.subr.mxu1 %v75_v6  ;;  %v71_v10 = vld [vmem:[%s551_s1 + $0x1b8] sm:$0xff]  ;;  %v68_v11 = vld [vmem:[%s551_s1 + $0x1a0] sm:$0xff]  ;;  %v70_v12 = vld [vmem:[%s551_s1 + $0x1b0] sm:$0xff] }
   0x5   :  { %118 = vmatpush1.msra.mxu0 %v72_v7  ;;  %189 = vmatpush1.msra.mxu1 %v74_v8  ;;  %v65_v13 = vld [vmem:[%s551_s1 + $0x188] sm:$0xff]  ;;  %v67_v14 = vld [vmem:[%s551_s1 + $0x198] sm:$0xff]  ;;  %v64_v15 = vld [vmem:[%s551_s1 + $0x180] sm:$0xff] }
   0x6   :  { %119 = vmatprep.subr.mxu0 %v69_v9  ;;  %190 = vmatprep.subr.mxu1 %v71_v10  ;;  %v66_v16 = vld [vmem:[%s551_s1 + $0x190] sm:$0xff]  ;;  %v61_v17 = vld [vmem:[%s551_s1 + $0x168] sm:$0xff]  ;;  %v63_v18 = vld [vmem:[%s551_s1 + $0x178] sm:$0xff] }
   0x7   :  { %120 = vmatpush1.msra.mxu0 %v68_v11  ;;  %191 = vmatpush1.msra.mxu1 %v70_v12  ;;  %v60_v19 = vld [vmem:[%s551_s1 + $0x160] sm:$0xff]  ;;  %v62_v20 = vld [vmem:[%s551_s1 + $0x170] sm:$0xff]  ;;  %v57_v21 = vld [vmem:[%s551_s1 + $0x148] sm:$0xff] }
   0x8   :  { %121 = vmatprep.subr.mxu0 %v65_v13  ;;  %192 = vmatprep.subr.mxu1 %v67_v14  ;;  %v59_v22 = vld [vmem:[%s551_s1 + $0x158] sm:$0xff]  ;;  %v56_v23 = vld [vmem:[%s551_s1 + $0x140] sm:$0xff]  ;;  %v58_v24 = vld [vmem:[%s551_s1 + $0x150] sm:$0xff] }
   0x9   :  { %122 = vmatpush1.msra.mxu0 %v64_v15  ;;  %193 = vmatpush1.msra.mxu1 %v66_v16  ;;  %v53_v25 = vld [vmem:[%s551_s1 + $0x128] sm:$0xff]  ;;  %v55_v26 = vld [vmem:[%s551_s1 + $0x138] sm:$0xff]  ;;  %v52_v27 = vld [vmem:[%s551_s1 + $0x120] sm:$0xff] }
   0xa   :  { %123 = vmatprep.subr.mxu0 %v61_v17  ;;  %194 = vmatprep.subr.mxu1 %v63_v18  ;;  %v54_v28 = vld [vmem:[%s551_s1 + $0x130] sm:$0xff]  ;;  %v49_v29 = vld [vmem:[%s551_s1 + $0x108] sm:$0xff]  ;;  %v51_v30 = vld [vmem:[%s551_s1 + $0x118] sm:$0xff] }
   0xb   :  { %124 = vmatpush1.msra.mxu0 %v60_v19  ;;  %195 = vmatpush1.msra.mxu1 %v62_v20  ;;  %v48_v31 = vld [vmem:[%s551_s1 + $0x100] sm:$0xff]  ;;  %v50_v32 = vld [vmem:[%s551_s1 + $0x110] sm:$0xff]  ;;  %v45_v33 = vld [vmem:[%s551_s1 + $0xe8] sm:$0xff] }
   0xc   :  { %125 = vmatprep.subr.mxu0 %v57_v21  ;;  %196 = vmatprep.subr.mxu1 %v59_v22  ;;  %v47_v34 = vld [vmem:[%s551_s1 + $0xf8] sm:$0xff]  ;;  %v44_v35 = vld [vmem:[%s551_s1 + $0xe0] sm:$0xff]  ;;  %v46_v36 = vld [vmem:[%s551_s1 + $0xf0] sm:$0xff] }
   0xd   :  { %126 = vmatpush1.msra.mxu0 %v56_v23  ;;  %197 = vmatpush1.msra.mxu1 %v58_v24  ;;  %v41_v37 = vld [vmem:[%s551_s1 + $0xc8] sm:$0xff]  ;;  %v43_v38 = vld [vmem:[%s551_s1 + $0xd8] sm:$0xff]  ;;  %v40_v39 = vld [vmem:[%s551_s1 + $0xc0] sm:$0xff] }
   0xe   :  { %127 = vmatprep.subr.mxu0 %v53_v25  ;;  %198 = vmatprep.subr.mxu1 %v55_v26  ;;  %v42_v40 = vld [vmem:[%s551_s1 + $0xd0] sm:$0xff]  ;;  %v37_v41 = vld [vmem:[%s551_s1 + $0xa8] sm:$0xff]  ;;  %v39_v42 = vld [vmem:[%s551_s1 + $0xb8] sm:$0xff] }
   0xf   :  { %128 = vmatpush1.msra.mxu0 %v52_v27  ;;  %199 = vmatpush1.msra.mxu1 %v54_v28  ;;  %v36_v43 = vld [vmem:[%s551_s1 + $0xa0] sm:$0xff]  ;;  %v38_v44 = vld [vmem:[%s551_s1 + $0xb0] sm:$0xff]  ;;  %v33_v45 = vld [vmem:[%s551_s1 + $0x88] sm:$0xff] }
  0x10   :  { %129 = vmatprep.subr.mxu0 %v49_v29  ;;  %200 = vmatprep.subr.mxu1 %v51_v30  ;;  %v35_v46 = vld [vmem:[%s551_s1 + $0x98] sm:$0xff]  ;;  %v32_v47 = vld [vmem:[%s551_s1 + $0x80] sm:$0xff]  ;;  %v34_v48 = vld [vmem:[%s551_s1 + $0x90] sm:$0xff] }
  0x11   :  { %130 = vmatpush1.msra.mxu0 %v48_v31  ;;  %201 = vmatpush1.msra.mxu1 %v50_v32  ;;  %v29_v49 = vld [vmem:[%s551_s1 + $0x68] sm:$0xff]  ;;  %v31_v50 = vld [vmem:[%s551_s1 + $0x78] sm:$0xff]  ;;  %v28_v51 = vld [vmem:[%s551_s1 + $0x60] sm:$0xff] }
  0x12   :  { %131 = vmatprep.subr.mxu0 %v45_v33  ;;  %202 = vmatprep.subr.mxu1 %v47_v34  ;;  %v30_v52 = vld [vmem:[%s551_s1 + $0x70] sm:$0xff]  ;;  %v25_v53 = vld [vmem:[%s551_s1 + $0x48] sm:$0xff]  ;;  %v27_v54 = vld [vmem:[%s551_s1 + $0x58] sm:$0xff] }
  0x13   :  { %132 = vmatpush1.msra.mxu0 %v44_v35  ;;  %203 = vmatpush1.msra.mxu1 %v46_v36  ;;  %v24_v55 = vld [vmem:[%s551_s1 + $0x40] sm:$0xff]  ;;  %v26_v56 = vld [vmem:[%s551_s1 + $0x50] sm:$0xff]  ;;  %v21_v57 = vld [vmem:[%s551_s1 + $0x28] sm:$0xff] }
  0x14   :  { %133 = vmatprep.subr.mxu0 %v41_v37  ;;  %204 = vmatprep.subr.mxu1 %v43_v38  ;;  %v23_v58 = vld [vmem:[%s551_s1 + $0x38] sm:$0xff]  ;;  %v20_v59 = vld [vmem:[%s551_s1 + $0x20] sm:$0xff]  ;;  %v22_v60 = vld [vmem:[%s551_s1 + $0x30] sm:$0xff] }
  0x15   :  { %134 = vmatpush1.msra.mxu0 %v40_v39  ;;  %205 = vmatpush1.msra.mxu1 %v42_v40  ;;  %v17_v61 = vld [vmem:[%s551_s1 + $0x8] sm:$0xff]  ;;  %v19_v62 = vld [vmem:[%s551_s1 + $0x18] sm:$0xff]  ;;  %v16_v63 = vld [vmem:[%s551_s1] sm:$0xff] }
  0x16   :  { %135 = vmatprep.subr.mxu0 %v37_v41  ;;  %206 = vmatprep.subr.mxu1 %v39_v42  ;;  %v18_v0 = vld [vmem:[%s551_s1 + $0x10] sm:$0xff]  ;;  %v89_v1 = vld [vmem:[%s551_s1 + $0x248] sm:$0x7]  ;;  %v91_v2 = vld [vmem:[%s551_s1 + $0x258] sm:$0x7] }
  0x17   :  { %136 = vmatpush1.msra.mxu0 %v36_v43  ;;  %207 = vmatpush1.msra.mxu1 %v38_v44  ;;  %v88_v3 = vld [vmem:[%s551_s1 + $0x240] sm:$0x7]  ;;  %v90_v4 = vld [vmem:[%s551_s1 + $0x250] sm:$0x7]  ;;  %v85_v5 = vld [vmem:[%s551_s1 + $0x228] sm:$0xff] }
  0x18   :  { %137 = vmatprep.subr.mxu0 %v33_v45  ;;  %208 = vmatprep.subr.mxu1 %v35_v46  ;;  %v87_v6 = vld [vmem:[%s551_s1 + $0x238] sm:$0xff]  ;;  %v84_v7 = vld [vmem:[%s551_s1 + $0x220] sm:$0xff]  ;;  %v86_v8 = vld [vmem:[%s551_s1 + $0x230] sm:$0xff] }
  0x19   :  { %138 = vmatpush1.msra.mxu0 %v32_v47  ;;  %209 = vmatpush1.msra.mxu1 %v34_v48  ;;  %v81_v9 = vld [vmem:[%s551_s1 + $0x208] sm:$0xff]  ;;  %v83_v10 = vld [vmem:[%s551_s1 + $0x218] sm:$0xff]  ;;  %v80_v11 = vld [vmem:[%s551_s1 + $0x200] sm:$0xff] }
  0x1a   :  { %139 = vmatprep.subr.mxu0 %v29_v49  ;;  %210 = vmatprep.subr.mxu1 %v31_v50  ;;  %v15_v12 = vld [vmem:[%s552_s0 + $0x8] sm:$0xff]  ;;  %v82_v13 = vld [vmem:[%s551_s1 + $0x210] sm:$0xff]  ;;  %v14_v14 = vld [vmem:[%s552_s0] sm:$0xff] }
  0x1b   :  { %140 = vmatpush1.msra.mxu0 %v28_v51  ;;  %211 = vmatpush1.msra.mxu1 %v30_v52  ;;  %v92_v15 = vld [vmem:[%s553_s2] sm:$0xff] }
  0x1c   :  { %141 = vmatprep.subr.mxu0 %v25_v53  ;;  %212 = vmatprep.subr.mxu1 %v27_v54 }
  0x1d   :  { %142 = vmatpush1.msra.mxu0 %v24_v55  ;;  %213 = vmatpush1.msra.mxu1 %v26_v56 }
  0x1e   :  { %143 = vmatprep.subr.mxu0 %v21_v57  ;;  %214 = vmatprep.subr.mxu1 %v23_v58 }
  0x1f   :  { %144 = vmatpush1.msra.mxu0 %v20_v59  ;;  %215 = vmatpush1.msra.mxu1 %v22_v60 }
  0x20   :  { %145 = vmatprep.subr.mxu0 %v17_v61  ;;  %216 = vmatprep.subr.mxu1 %v19_v62 }
  0x21   :  { %146 = vmatpush1.msra.mxu0 %v16_v63  ;;  %217 = vmatpush1.msra.mxu1 %v18_v0 }
  0x22   :  { %269 = vmatprep.subr.msk.mxu0 %vm102_vm0, %v89_v1  ;;  %272 = vmatprep.subr.msk.mxu1 %vm102_vm0, %v91_v2 }
  0x23   :  { %270 = vmatpush2.msk.msra.mxu0 %vm102_vm0, %v88_v3  ;;  %273 = vmatpush2.msk.msra.mxu1 %vm102_vm0, %v90_v4 }
  0x24   :  { %175 = vmatprep.subr.mxu0 %v85_v5  ;;  %246 = vmatprep.subr.mxu1 %v87_v6 }
  0x25   :  { %176 = vmatpush2.msra.mxu0 %v84_v7  ;;  %247 = vmatpush2.msra.mxu1 %v86_v8 }
  0x26   :  { %177 = vmatprep.subr.mxu0 %v81_v9  ;;  %248 = vmatprep.subr.mxu1 %v83_v10 }
  0x27   :  { %178 = vmatpush2.msra.mxu0 %v80_v11  ;;  %271 = vmatprep.mubr.msk.f32.mxu0 %vm98_vm1, %v15_v12 }
  0x28   :  { %249 = vmatpush2.msra.mxu1 %v82_v13  ;;  %274 = vmatprep.mubr.msk.f32.mxu1 %vm98_vm1, %v15_v12 }
  0x29   :  { %180 = vmatmul.mubr.f32.vlgmr.msra.gmra.mxu0 %v14_v14  ;;  %251 = vmatmul.mubr.f32.vlgmr.msra.gmra.mxu1 %v14_v14 }
  0x2a   :  { %95 = vperm.xlu0 %276, %v92_v15  }
  0xa5   :  { %v96_v16 = vpop.permute.xlu0 %95 }
  0xe9   :  { %v181_v17 = vpop.f32.mrf.mxu0  ;;  %v252_v18 = vpop.f32.mrf.mxu1 }
  0xea   :  { %v182_v19 = vadd.f32 %v181_v17, %v96_v16  ;;  %v253_v20 = vadd.f32 %v252_v18, %v96_v16 }
  0xeb   :  { %v183_v21 = vpop.f32.mrf.mxu0  ;;  %v254_v22 = vpop.f32.mrf.mxu1 }
  0xec   :  { %v257_v23 = vmax.f32 %v182_v19, 0.0  ;;  %v259_v24 = vmax.f32 %v253_v20, 0.0  ;;  %v184_v25 = vadd.f32 %v183_v21, %v96_v16  ;;  %v255_v26 = vadd.f32 %v254_v22, %v96_v16 }
  0xee   :  { %261 = vst [vmem:[%s554_s3] sm:$0xff] %v257_v23  ;;  %263 = vst [vmem:[%s554_s3 + $0x10] sm:$0xff] %v259_v24  ;;  %v258_v27 = vmax.f32 %v184_v25, 0.0  ;;  %v260_v28 = vmax.f32 %v255_v26, 0.0 }
  0xf0   :  { %262 = vst [vmem:[%s554_s3 + $0x8] sm:$0xff] %v258_v27  ;;  %264 = vst [vmem:[%s554_s3 + $0x18] sm:$0xff] %v260_v28 }

// kernel: _lambda_.36
= control target key start
LH: loop header
LB: loop body
LE: loop exit
PB: predicated region body
PF: predicated region fallthrough
CT: control target
= control target key end

     0   :  { %s70_s0 = inlined_call_operand.vmem [shape: f32[9,8,128], index: 0, kind: input, shape index: {}]   ;;  %s71_s1 = inlined_call_operand.vmem [shape: f32[8,128], index: 1, kind: output, shape index: {}]  }
   0x1   :  { %v8_v0 = vld [vmem:[%s70_s0] sm:$0xff]  ;;  %v9_v1 = vld [vmem:[%s70_s0 + $0x8] sm:$0xff]  ;;  %v10_v2 = vld [vmem:[%s70_s0 + $0x10] sm:$0xff] }
   0x2   :  { %v11_v3 = vld [vmem:[%s70_s0 + $0x18] sm:$0xff]  ;;  %v12_v4 = vld [vmem:[%s70_s0 + $0x20] sm:$0xff]  ;;  %v13_v5 = vld [vmem:[%s70_s0 + $0x28] sm:$0xff] }
   0x3   :  { %v14_v6 = vld [vmem:[%s70_s0 + $0x30] sm:$0xff]  ;;  %v15_v7 = vld [vmem:[%s70_s0 + $0x38] sm:$0xff]  ;;  %v16_v8 = vld [vmem:[%s70_s0 + $0x40] sm:$0xff]  ;;  %v17_v9 = vmax.f32 %v8_v0, %v12_v4  ;;  %v18_v10 = vmax.f32 %v9_v1, %v13_v5 }
   0x4   :  { %v19_v11 = vmax.f32 %v10_v2, %v14_v6  ;;  %v20_v12 = vmax.f32 %v11_v3, %v15_v7 }
   0x5   :  { %v21_v13 = vmax.f32 %v17_v9, %v16_v8 }
   0x6   :  { %v23_v14 = vmax.f32 %v19_v11, %v20_v12 }
   0x7   :  { %v22_v15 = vmax.f32 %v21_v13, %v18_v10 }
   0x9   :  { %v24_v16 = vmax.f32 %v22_v15, %v23_v14 }
   0xb   :  { %25 = vst [vmem:[%s71_s1] sm:$0xff] %v24_v16 }

// kernel: _lambda_.37
= control target key start
LH: loop header
LB: loop body
LE: loop exit
PB: predicated region body
PF: predicated region fallthrough
CT: control target
= control target key end

     0   :  { %vm22_vm0 = vcmask 64512   ;;  %v114_v0 = vmov 0.0   ;;  %vm115_vm1 = vmmov 0   ;;  %v116_v4 = vmov 0   ;;  %s149_s1 = inlined_call_operand.vmem [shape: f32[8,128], index: 1, kind: input, shape index: {}]   ;;  %s150_s0 = inlined_call_operand.vmem [shape: f32[4,8], index: 0, kind: input, shape index: {}]   ;;  %s151_s2 = inlined_call_operand.vmem [shape: f32[4,1], index: 2, kind: input, shape index: {}]   ;;  %s152_s3 = inlined_call_operand.vmem [shape: f32[4,128], index: 3, kind: output, shape index: {}]  }
   0x1   :  { %105 = vmatprep.subr.mxu0 %v114_v0  ;;  %v15_v1 = vld [vmem:[%s149_s1] sm:$0xff]  ;;  %107 = vmatprep.mubr.msk.f32.mxu0 %vm115_vm1, %v114_v0 }
   0x2   :  { %v14_v2 = vld [vmem:[%s150_s0] sm:$0xf]  ;;  %106 = vmatpush3.msra.mxu0 %v15_v1  ;;  %113 = vset.pattern.permute.xlu0 %v116_v4 }
   0x3   :  { %v16_v3 = vld [vmem:[%s151_s2] sm:$0xf]  ;;  %108 = vmatmul.mubr.msk.f32.vlgmr.msra.gmra.mxu0 %vm22_vm0, %v14_v2 }
   0x4   :  { %19 = vperm.xlu0 %113, %v16_v3  }
  0x7f   :  { %v20_v5 = vpop.permute.xlu0 %19 }
  0xc3   :  { %v92_v6 = vpop.f32.mrf.mxu0 }
  0xc4   :  { %v93_v7 = vadd.f32 %v92_v6, %v20_v5 }
  0xc5   :  { %v109_v8 = vpop.f32.mrf.mxu0 }
  0xc6   :  { %v96_v9 = vmax.f32 %v93_v7, 0.0 }
  0xc8   :  { %97 = vst [vmem:[%s152_s3] sm:$0xf] %v96_v9 }

// kernel: _lambda_.39
= control target key start
LH: loop header
LB: loop body
LE: loop exit
PB: predicated region body
PF: predicated region fallthrough
CT: control target
= control target key end

     0   :  { %v118_v0 = vmov 0.0   ;;  %vm119_vm0 = vmmov 0   ;;  %vm23_vm1 = vcmask 130048   ;;  %v120_v4 = vmov 0   ;;  %s156_s1 = inlined_call_operand.vmem [shape: f32[16,128], index: 1, kind: input, shape index: {}]   ;;  %s157_s0 = inlined_call_operand.vmem [shape: f32[4,16], index: 0, kind: input, shape index: {}]   ;;  %s158_s2 = inlined_call_operand.vmem [shape: f32[4,1], index: 2, kind: input, shape index: {}]   ;;  %s159_s3 = inlined_call_operand.vmem [shape: f32[4,128], index: 3, kind: output, shape index: {}]  }
   0x1   :  { %107 = vmatprep.subr.mxu0 %v118_v0  ;;  %v16_v1 = vld [vmem:[%s156_s1 + $0x8] sm:$0xff]  ;;  %v15_v2 = vld [vmem:[%s156_s1] sm:$0xff]  ;;  %111 = vmatprep.mubr.msk.f32.mxu0 %vm119_vm0, %v118_v0 }
   0x2   :  { %108 = vmatpush3.msra.mxu0 %v16_v1  ;;  %v14_v3 = vld [vmem:[%s157_s0] sm:$0xf]  ;;  %117 = vset.pattern.permute.xlu0 %v120_v4 }
   0x3   :  { %v17_v5 = vld [vmem:[%s158_s2] sm:$0xf]  ;;  %109 = vmatprep.subr.mxu0 %v118_v0 }
   0x4   :  { %20 = vperm.xlu0 %117, %v17_v5   ;;  %110 = vmatpush3.msra.mxu0 %v15_v2 }
   0x5   :  { %112 = vmatmul.mubr.msk.f32.vlgmr.msra.gmra.mxu0 %vm23_vm1, %v14_v3 }
  0x7f   :  { %v21_v6 = vpop.permute.xlu0 %20 }
  0xc5   :  { %v93_v7 = vpop.f32.mrf.mxu0 }
  0xc6   :  { %v94_v8 = vadd.f32 %v93_v7, %v21_v6 }
  0xc7   :  { %v113_v9 = vpop.f32.mrf.mxu0 }
  0xc8   :  { %v97_v10 = vmax.f32 %v94_v8, 0.0 }
  0xca   :  { %98 = vst [vmem:[%s159_s3] sm:$0xf] %v97_v10 }

// kernel: _lambda_.40
= control target key start
LH: loop header
LB: loop body
LE: loop exit
PB: predicated region body
PF: predicated region fallthrough
CT: control target
= control target key end

     0   :  { %vm39_vm0 = vcmask 1043456   ;;  %v262_v0 = vmov 0.0   ;;  %vm263_vm1 = vmmov 0   ;;  %v264_v3 = vmov 0   ;;  %s348_s0 = inlined_call_operand.vmem [shape: f32[36,128], index: 0, kind: input, shape index: {}]   ;;  %s349_s2 = inlined_call_operand.vmem [shape: f32[4,1], index: 2, kind: input, shape index: {}]   ;;  %s350_s4 = inlined_call_operand.vmem [shape: f32[16,1], index: 4, kind: input, shape index: {}]   ;;  %s351_s1 = inlined_call_operand.vmem [shape: f32[4,36], index: 1, kind: input, shape index: {}]   ;;  %s352_s3 = inlined_call_operand.vmem [shape: f32[16,4], index: 3, kind: input, shape index: {}]   ;;  %s353_s5 = inlined_call_operand.vmem [shape: f32[16,128], index: 5, kind: input, shape index: {}]   ;;  %s354_s6 = inlined_call_operand.vmem [shape: f32[16,128], index: 6, kind: output, shape index: {}]  }
   0x1   :  { %239 = vmatprep.subr.mxu0 %v262_v0  ;;  %v28_v1 = vld [vmem:[%s348_s0 + $0x20] sm:$0xf]  ;;  %v27_v2 = vld [vmem:[%s348_s0 + $0x18] sm:$0xff]  ;;  %249 = vmatprep.mubr.msk.f32.mxu0 %vm263_vm1, %v262_v0  ;;  %v26_v4 = vld [vmem:[%s348_s0 + $0x10] sm:$0xff]  ;;  %vm35_vm2 = vcmask 293888   ;;  %vm128_vm3 = vcmask 31744  }
   0x2   :  { %240 = vmatpush3.msk.msra.mxu0 %vm39_vm0, %v28_v1  ;;  %260 = vset.pattern.permute.xlu0 %v264_v3  ;;  %v29_v5 = vld [vmem:[%s349_s2] sm:$0xf]  ;;  %v25_v6 = vld [vmem:[%s348_s0 + $0x8] sm:$0xff] }
   0x3   :  { %241 = vmatprep.subr.mxu0 %v262_v0  ;;  %261 = vset.pattern.permute.xlu1 %v264_v3  ;;  %v116_v7 = vld [vmem:[%s350_s4] sm:$0xff]  ;;  %v117_v11 = vld [vmem:[%s350_s4 + $0x8] sm:$0xff] }
   0x4   :  { %242 = vmatpush3.msra.mxu0 %v27_v2  ;;  %32 = vperm.xlu0 %260, %v29_v5   ;;  %v24_v8 = vld [vmem:[%s348_s0] sm:$0xff]  ;;  %v115_v17 = vld [vmem:[%s352_s3 + $0x8] sm:$0xff] }
   0x5   :  { %243 = vmatprep.subr.mxu0 %v262_v0  ;;  %v23_v9 = vld [vmem:[%s351_s1] sm:$0xf]  ;;  %125 = vperm.xlu1 %261, %v117_v11   ;;  %v214_v20 = vld [vmem:[%s353_s5 + $0x8] sm:$0xff] }
   0x6   :  { %244 = vmatpush3.msra.mxu0 %v26_v4  ;;  %v114_v10 = vld [vmem:[%s352_s3] sm:$0xff] }
   0x7   :  { %245 = vmatprep.subr.mxu0 %v262_v0  ;;  %254 = vmatprep.mubr.msk.f32.mxu1 %vm128_vm3, %v114_v10  ;;  %v213_v24 = vld [vmem:[%s353_s5] sm:$0xff] }
   0x8   :  { %246 = vmatpush3.msra.mxu0 %v25_v6  ;;  %120 = vperm.xlu0 %260, %v116_v7  }
   0x9   :  { %247 = vmatprep.subr.mxu0 %v262_v0 }
   0xa   :  { %248 = vmatpush3.msra.mxu0 %v24_v8 }
   0xb   :  { %250 = vmatmul.mubr.msk.f32.vlgmr.msra.gmra.mxu0 %vm35_vm2, %v23_v9 }
  0x7f   :  { %v33_v12 = vpop.permute.xlu0 %32 }
  0x80   :  { %v126_v18 = vpop.permute.xlu1 %125 }
  0x83   :  { %v121_v22 = vpop.permute.xlu0 %120 }
  0xcb   :  { %v109_v13 = vpop.f32.mrf.mxu0 }
  0xcc   :  { %v110_v14 = vadd.f32 %v109_v13, %v33_v12 }
  0xcd   :  { %v251_v15 = vpop.f32.mrf.mxu0 }
  0xce   :  { %v113_v16 = vmax.f32 %v110_v14, 0.0 }
  0xd0   :  { %252 = vmatprep.subr.msk.mxu1 %vm39_vm0, %v113_v16 }
  0xd1   :  { %253 = vmatpush3.msk.msra.mxu1 %vm39_vm0, %v113_v16 }
  0xd2   :  { %255 = vmatmul.mubr.msk.f32.vlgmr.msra.gmra.mxu1 %vm128_vm3, %v115_v17 }
 0x192   :  { %v256_v19 = vpop.f32.mrf.mxu1 }
 0x193   :  { %v210_v21 = vadd.f32 %v256_v19, %v126_v18 }
 0x194   :  { %v204_v23 = vpop.f32.mrf.mxu1 }
 0x195   :  { %v216_v25 = vadd.f32 %v214_v20, %v210_v21  ;;  %v205_v26 = vadd.f32 %v204_v23, %v121_v22 }
 0x197   :  { %v218_v27 = vmax.f32 %v216_v25, 0.0  ;;  %v215_v28 = vadd.f32 %v213_v24, %v205_v26 }
 0x199   :  { %220 = vst [vmem:[%s354_s6 + $0x8] sm:$0xff] %v218_v27  ;;  %v217_v29 = vmax.f32 %v215_v28, 0.0 }
 0x19b   :  { %219 = vst [vmem:[%s354_s6] sm:$0xff] %v217_v29 }

// kernel: _lambda_.38
= control target key start
LH: loop header
LB: loop body
LE: loop exit
PB: predicated region body
PF: predicated region fallthrough
CT: control target
= control target key end

     0   :  { %vm45_vm0 = vcmask 1043456   ;;  %v375_v0 = vmov 0.0   ;;  %vm376_vm1 = vmmov 0   ;;  %v377_v3 = vmov 0   ;;  %s482_s0 = inlined_call_operand.vmem [shape: f32[36,128], index: 0, kind: input, shape index: {}]   ;;  %s483_s2 = inlined_call_operand.vmem [shape: f32[4,1], index: 2, kind: input, shape index: {}]   ;;  %s484_s4 = inlined_call_operand.vmem [shape: f32[16,1], index: 4, kind: input, shape index: {}]   ;;  %s485_s1 = inlined_call_operand.vmem [shape: f32[4,36], index: 1, kind: input, shape index: {}]   ;;  %s486_s7 = inlined_call_operand.vmem [shape: f32[16,1], index: 7, kind: input, shape index: {}]   ;;  %s487_s3 = inlined_call_operand.vmem [shape: f32[16,4], index: 3, kind: input, shape index: {}]   ;;  %s488_s5 = inlined_call_operand.vmem [shape: f32[8,128], index: 5, kind: input, shape index: {}]   ;;  %s489_s6 = inlined_call_operand.vmem [shape: f32[16,8], index: 6, kind: input, shape index: {}]   ;;  %s490_s8 = inlined_call_operand.vmem [shape: f32[16,128], index: 8, kind: output, shape index: {}]  }
   0x1   :  { %347 = vmatprep.subr.mxu0 %v375_v0  ;;  %v34_v1 = vld [vmem:[%s482_s0 + $0x20] sm:$0xf]  ;;  %v33_v2 = vld [vmem:[%s482_s0 + $0x18] sm:$0xff]  ;;  %357 = vmatprep.mubr.msk.f32.mxu0 %vm376_vm1, %v375_v0  ;;  %v32_v4 = vld [vmem:[%s482_s0 + $0x10] sm:$0xff]  ;;  %vm41_vm2 = vcmask 293888   ;;  %vm134_vm3 = vcmask 31744  }
   0x2   :  { %348 = vmatpush3.msk.msra.mxu0 %vm45_vm0, %v34_v1  ;;  %373 = vset.pattern.permute.xlu0 %v377_v3  ;;  %v35_v5 = vld [vmem:[%s483_s2] sm:$0xf]  ;;  %v31_v6 = vld [vmem:[%s482_s0 + $0x8] sm:$0xff]  ;;  %vm222_vm4 = vcmask 64512  }
   0x3   :  { %349 = vmatprep.subr.mxu0 %v375_v0  ;;  %374 = vset.pattern.permute.xlu1 %v377_v3  ;;  %v122_v7 = vld [vmem:[%s484_s4] sm:$0xff]  ;;  %v307_v10 = vld [vmem:[%s486_s7 + $0x8] sm:$0xff] }
   0x4   :  { %350 = vmatpush3.msra.mxu0 %v33_v2  ;;  %38 = vperm.xlu0 %373, %v35_v5   ;;  %v30_v8 = vld [vmem:[%s482_s0] sm:$0xff]  ;;  %v123_v12 = vld [vmem:[%s484_s4 + $0x8] sm:$0xff] }
   0x5   :  { %351 = vmatprep.subr.mxu0 %v375_v0  ;;  %v29_v9 = vld [vmem:[%s485_s1] sm:$0xf]  ;;  %131 = vperm.xlu1 %374, %v123_v12   ;;  %v121_v19 = vld [vmem:[%s487_s3 + $0x8] sm:$0xff] }
   0x6   :  { %352 = vmatpush3.msra.mxu0 %v32_v4  ;;  %v120_v11 = vld [vmem:[%s487_s3] sm:$0xff]  ;;  %v220_v22 = vld [vmem:[%s489_s6 + $0x8] sm:$0xff] }
   0x7   :  { %353 = vmatprep.subr.mxu0 %v375_v0  ;;  %362 = vmatprep.mubr.msk.f32.mxu1 %vm134_vm3, %v120_v11  ;;  %v306_v13 = vld [vmem:[%s486_s7] sm:$0xff] }
   0x8   :  { %354 = vmatpush3.msra.mxu0 %v31_v6  ;;  %126 = vperm.xlu0 %373, %v122_v7   ;;  %v221_v20 = vld [vmem:[%s488_s5] sm:$0xff] }
   0x9   :  { %355 = vmatprep.subr.mxu0 %v375_v0  ;;  %310 = vperm.xlu1 %374, %v306_v13   ;;  %v219_v21 = vld [vmem:[%s489_s6] sm:$0xff] }
   0xa   :  { %356 = vmatpush3.msra.mxu0 %v30_v8 }
   0xb   :  { %358 = vmatmul.mubr.msk.f32.vlgmr.msra.gmra.mxu0 %vm41_vm2, %v29_v9 }
   0xc   :  { %315 = vperm.xlu0 %373, %v307_v10  }
  0x7f   :  { %v39_v14 = vpop.permute.xlu0 %38 }
  0x80   :  { %v132_v25 = vpop.permute.xlu1 %131 }
  0x83   :  { %v127_v23 = vpop.permute.xlu0 %126 }
  0x84   :  { %v311_v35 = vpop.permute.xlu1 %310 }
  0x87   :  { %v316_v31 = vpop.permute.xlu0 %315 }
  0xcb   :  { %v115_v15 = vpop.f32.mrf.mxu0 }
  0xcc   :  { %v116_v16 = vadd.f32 %v115_v15, %v39_v14 }
  0xcd   :  { %v359_v17 = vpop.f32.mrf.mxu0 }
  0xce   :  { %v119_v18 = vmax.f32 %v116_v16, 0.0 }
  0xd0   :  { %360 = vmatprep.subr.msk.mxu1 %vm45_vm0, %v119_v18 }
  0xd1   :  { %361 = vmatpush3.msk.msra.mxu1 %vm45_vm0, %v119_v18 }
  0xd2   :  { %363 = vmatmul.mubr.msk.f32.vlgmr.msra.gmra.mxu1 %vm134_vm3, %v121_v19  ;;  %365 = vmatprep.subr.mxu1 %v221_v20 }
  0xd3   :  { %366 = vmatpush3.msra.mxu1 %v221_v20  ;;  %367 = vmatprep.mubr.msk.f32.mxu1 %vm222_vm4, %v219_v21 }
  0xd6   :  { %368 = vmatmul.mubr.msk.f32.vlgmr.msra.gmra.mxu1 %vm222_vm4, %v220_v22 }
 0x192   :  { %v364_v24 = vpop.f32.mrf.mxu1 }
 0x193   :  { %v216_v27 = vadd.f32 %v364_v24, %v132_v25 }
 0x194   :  { %v210_v26 = vpop.f32.mrf.mxu1 }
 0x195   :  { %v211_v29 = vadd.f32 %v210_v26, %v127_v23 }
 0x196   :  { %v369_v28 = vpop.f32.mrf.mxu1 }
 0x197   :  { %v305_v30 = vadd.f32 %v369_v28, %v216_v27 }
 0x198   :  { %v295_v32 = vpop.f32.mrf.mxu1 }
 0x199   :  { %v319_v33 = vadd.f32 %v316_v31, %v305_v30  ;;  %v304_v34 = vadd.f32 %v295_v32, %v211_v29 }
 0x19b   :  { %v321_v36 = vmax.f32 %v319_v33, 0.0  ;;  %v318_v37 = vadd.f32 %v311_v35, %v304_v34 }
 0x19d   :  { %323 = vst [vmem:[%s490_s8 + $0x8] sm:$0xff] %v321_v36  ;;  %v320_v38 = vmax.f32 %v318_v37, 0.0 }
 0x19f   :  { %322 = vst [vmem:[%s490_s8] sm:$0xff] %v320_v38 }

// kernel: _lambda_.43
= control target key start
LH: loop header
LB: loop body
LE: loop exit
PB: predicated region body
PF: predicated region fallthrough
CT: control target
= control target key end

     0   :  { %vm39_vm0 = vcmask 130048   ;;  %vm249_vm1 = vcmask 64512   ;;  %s494_s1 = inlined_call_operand.vmem [shape: f32[16,8], index: 1, kind: input, shape index: {}]   ;;  %s495_s0 = inlined_call_operand.vmem [shape: f32[128,16], index: 0, kind: input, shape index: {}]   ;;  %s496_s2 = inlined_call_operand.vmem [shape: f32[1,8], index: 2, kind: input, shape index: {}]   ;;  %s497_s3 = inlined_call_operand.vmem [shape: f32[128,8], index: 3, kind: output, shape index: {}]  }
   0x1   :  { %v31_v0 = vld [vmem:[%s494_s1 + $0x8] sm:$0xff]  ;;  %v30_v1 = vld [vmem:[%s494_s1] sm:$0xff]  ;;  %v16_v6 = vld [vmem:[%s495_s0 + $0x10] sm:$0xff] }
   0x2   :  { %305 = vmatprep.subr.mxu0 %v31_v0  ;;  %333 = vmatprep.subr.mxu1 %v31_v0  ;;  %v14_v2 = vld [vmem:[%s495_s0] sm:$0xff]  ;;  %v15_v4 = vld [vmem:[%s495_s0 + $0x8] sm:$0xff]  ;;  %v24_v7 = vld [vmem:[%s495_s0 + $0x50] sm:$0xff] }
   0x3   :  { %306 = vmatpush3.msra.mxu0 %v31_v0  ;;  %335 = vmatpush3.msra.mxu1 %v31_v0  ;;  %v22_v3 = vld [vmem:[%s495_s0 + $0x40] sm:$0xff]  ;;  %v23_v5 = vld [vmem:[%s495_s0 + $0x48] sm:$0xff]  ;;  %v17_v8 = vld [vmem:[%s495_s0 + $0x18] sm:$0xff] }
   0x4   :  { %307 = vmatprep.subr.mxu0 %v30_v1  ;;  %334 = vmatprep.subr.mxu1 %v30_v1  ;;  %v25_v9 = vld [vmem:[%s495_s0 + $0x58] sm:$0xff]  ;;  %v18_v10 = vld [vmem:[%s495_s0 + $0x20] sm:$0xff]  ;;  %v19_v12 = vld [vmem:[%s495_s0 + $0x28] sm:$0xff] }
   0x5   :  { %308 = vmatpush3.msra.mxu0 %v30_v1  ;;  %336 = vmatpush3.msra.mxu1 %v30_v1  ;;  %v26_v11 = vld [vmem:[%s495_s0 + $0x60] sm:$0xff]  ;;  %v27_v13 = vld [vmem:[%s495_s0 + $0x68] sm:$0xff]  ;;  %v20_v14 = vld [vmem:[%s495_s0 + $0x30] sm:$0xff] }
   0x6   :  { %309 = vmatprep.mubr.msk.f32.mxu0 %vm39_vm0, %v14_v2  ;;  %321 = vmatprep.mubr.msk.f32.mxu1 %vm39_vm0, %v22_v3  ;;  %v28_v15 = vld [vmem:[%s495_s0 + $0x70] sm:$0xff]  ;;  %v21_v16 = vld [vmem:[%s495_s0 + $0x38] sm:$0xff]  ;;  %v270_v18 = vld [vmem:[%s496_s2] ss:$0 sm:$0xff] }
   0x7   :  { %310 = vmatmul.mubr.msk.f32.vlgmr.msra.gmra.mxu0 %vm39_vm0, %v15_v4  ;;  %322 = vmatmul.mubr.msk.f32.vlgmr.msra.gmra.mxu1 %vm39_vm0, %v23_v5  ;;  %v29_v17 = vld [vmem:[%s495_s0 + $0x78] sm:$0xff] }
   0x8   :  { %312 = vmatprep.mubr.msk.f32.mxu0 %vm39_vm0, %v16_v6  ;;  %324 = vmatprep.mubr.msk.f32.mxu1 %vm39_vm0, %v24_v7 }
   0xb   :  { %313 = vmatmul.mubr.msk.f32.gmra.mxu0 %vm39_vm0, %v17_v8  ;;  %325 = vmatmul.mubr.msk.f32.gmra.mxu1 %vm39_vm0, %v25_v9 }
   0xc   :  { %315 = vmatprep.mubr.msk.f32.mxu0 %vm39_vm0, %v18_v10  ;;  %327 = vmatprep.mubr.msk.f32.mxu1 %vm39_vm0, %v26_v11 }
   0xf   :  { %316 = vmatmul.mubr.msk.f32.gmra.mxu0 %vm39_vm0, %v19_v12  ;;  %328 = vmatmul.mubr.msk.f32.gmra.mxu1 %vm39_vm0, %v27_v13 }
  0x10   :  { %318 = vmatprep.mubr.msk.f32.mxu0 %vm39_vm0, %v20_v14  ;;  %330 = vmatprep.mubr.msk.f32.mxu1 %vm39_vm0, %v28_v15 }
  0x13   :  { %319 = vmatmul.mubr.msk.f32.gmra.mxu0 %vm39_vm0, %v21_v16  ;;  %331 = vmatmul.mubr.msk.f32.gmra.mxu1 %vm39_vm0, %v29_v17 }
  0xc7   :  { %v311_v19 = vpop.f32.mrf.mxu0  ;;  %v323_v20 = vpop.f32.mrf.mxu1 }
  0xc8   :  { %v160_v21 = vadd.f32 %v311_v19, %v270_v18  ;;  %v200_v22 = vadd.f32 %v323_v20, %v270_v18 }
  0xc9   :  { %v154_v23 = vpop.f32.mrf.mxu0  ;;  %v194_v24 = vpop.f32.mrf.mxu1 }
  0xca   :  { %v234_v25 = vmax.f32 %v160_v21, 0.0  ;;  %v242_v26 = vmax.f32 %v200_v22, 0.0  ;;  %v155_v27 = vadd.f32 %v270_v18, %v154_v23  ;;  %v195_v28 = vadd.f32 %v270_v18, %v194_v24 }
  0xcb   :  { %v314_v29 = vpop.f32.mrf.mxu0  ;;  %v326_v30 = vpop.f32.mrf.mxu1 }
  0xcc   :  { %251 = vst.msk [vmem:[%s497_s3 + $0x8] sm:$0xff] %vm249_vm1, %v234_v25  ;;  %259 = vst.msk [vmem:[%s497_s3 + $0x48] sm:$0xff] %vm249_vm1, %v242_v26  ;;  %v233_v31 = vmax.f32 %v155_v27, 0.0  ;;  %v241_v32 = vmax.f32 %v195_v28, 0.0  ;;  %v170_v33 = vadd.f32 %v314_v29, %v270_v18  ;;  %v210_v34 = vadd.f32 %v326_v30, %v270_v18 }
  0xcd   :  { %v164_v35 = vpop.f32.mrf.mxu0  ;;  %v204_v36 = vpop.f32.mrf.mxu1 }
  0xce   :  { %250 = vst.msk [vmem:[%s497_s3] sm:$0xff] %vm249_vm1, %v233_v31  ;;  %258 = vst.msk [vmem:[%s497_s3 + $0x40] sm:$0xff] %vm249_vm1, %v241_v32  ;;  %v236_v37 = vmax.f32 %v170_v33, 0.0  ;;  %v244_v38 = vmax.f32 %v210_v34, 0.0  ;;  %v165_v39 = vadd.f32 %v270_v18, %v164_v35  ;;  %v205_v40 = vadd.f32 %v270_v18, %v204_v36 }
  0xcf   :  { %v317_v41 = vpop.f32.mrf.mxu0  ;;  %v329_v42 = vpop.f32.mrf.mxu1 }
  0xd0   :  { %253 = vst.msk [vmem:[%s497_s3 + $0x18] sm:$0xff] %vm249_vm1, %v236_v37  ;;  %261 = vst.msk [vmem:[%s497_s3 + $0x58] sm:$0xff] %vm249_vm1, %v244_v38  ;;  %v235_v43 = vmax.f32 %v165_v39, 0.0  ;;  %v243_v44 = vmax.f32 %v205_v40, 0.0  ;;  %v180_v45 = vadd.f32 %v317_v41, %v270_v18  ;;  %v220_v46 = vadd.f32 %v329_v42, %v270_v18 }
  0xd1   :  { %v174_v47 = vpop.f32.mrf.mxu0  ;;  %v214_v48 = vpop.f32.mrf.mxu1 }
  0xd2   :  { %252 = vst.msk [vmem:[%s497_s3 + $0x10] sm:$0xff] %vm249_vm1, %v235_v43  ;;  %260 = vst.msk [vmem:[%s497_s3 + $0x50] sm:$0xff] %vm249_vm1, %v243_v44  ;;  %v238_v49 = vmax.f32 %v180_v45, 0.0  ;;  %v246_v50 = vmax.f32 %v220_v46, 0.0  ;;  %v175_v51 = vadd.f32 %v270_v18, %v174_v47  ;;  %v215_v52 = vadd.f32 %v270_v18, %v214_v48 }
  0xd3   :  { %v320_v53 = vpop.f32.mrf.mxu0  ;;  %v332_v54 = vpop.f32.mrf.mxu1 }
  0xd4   :  { %255 = vst.msk [vmem:[%s497_s3 + $0x28] sm:$0xff] %vm249_vm1, %v238_v49  ;;  %263 = vst.msk [vmem:[%s497_s3 + $0x68] sm:$0xff] %vm249_vm1, %v246_v50  ;;  %v237_v55 = vmax.f32 %v175_v51, 0.0  ;;  %v245_v56 = vmax.f32 %v215_v52, 0.0  ;;  %v190_v57 = vadd.f32 %v320_v53, %v270_v18  ;;  %v230_v58 = vadd.f32 %v332_v54, %v270_v18 }
  0xd5   :  { %v184_v59 = vpop.f32.mrf.mxu0  ;;  %v224_v60 = vpop.f32.mrf.mxu1 }
  0xd6   :  { %254 = vst.msk [vmem:[%s497_s3 + $0x20] sm:$0xff] %vm249_vm1, %v237_v55  ;;  %262 = vst.msk [vmem:[%s497_s3 + $0x60] sm:$0xff] %vm249_vm1, %v245_v56  ;;  %v240_v61 = vmax.f32 %v190_v57, 0.0  ;;  %v248_v62 = vmax.f32 %v230_v58, 0.0  ;;  %v185_v63 = vadd.f32 %v270_v18, %v184_v59  ;;  %v225_v0 = vadd.f32 %v270_v18, %v224_v60 }
  0xd8   :  { %257 = vst.msk [vmem:[%s497_s3 + $0x38] sm:$0xff] %vm249_vm1, %v240_v61  ;;  %265 = vst.msk [vmem:[%s497_s3 + $0x78] sm:$0xff] %vm249_vm1, %v248_v62  ;;  %v239_v1 = vmax.f32 %v185_v63, 0.0  ;;  %v247_v2 = vmax.f32 %v225_v0, 0.0 }
  0xda   :  { %256 = vst.msk [vmem:[%s497_s3 + $0x30] sm:$0xff] %vm249_vm1, %v239_v1  ;;  %264 = vst.msk [vmem:[%s497_s3 + $0x70] sm:$0xff] %vm249_vm1, %v247_v2 }

// kernel: _lambda_.45
= control target key start
LH: loop header
LB: loop body
LE: loop exit
PB: predicated region body
PF: predicated region fallthrough
CT: control target
= control target key end

     0   :  { %vm29_vm0 = vcmask 261120   ;;  %vm131_vm1 = vcmask 64512   ;;  %s234_s1 = inlined_call_operand.vmem [shape: f32[32,8], index: 1, kind: input, shape index: {}]   ;;  %s235_s0 = inlined_call_operand.vmem [shape: f32[32,32], index: 0, kind: input, shape index: {}]   ;;  %s236_s2 = inlined_call_operand.vmem [shape: f32[1,8], index: 2, kind: input, shape index: {}]   ;;  %s237_s3 = inlined_call_operand.vmem [shape: f32[32,8], index: 3, kind: output, shape index: {}]  }
   0x1   :  { %v21_v0 = vld [vmem:[%s234_s1 + $0x18] sm:$0xff]  ;;  %v20_v1 = vld [vmem:[%s234_s1 + $0x10] sm:$0xff]  ;;  %v19_v2 = vld [vmem:[%s234_s1 + $0x8] sm:$0xff] }
   0x2   :  { %153 = vmatprep.subr.mxu0 %v21_v0  ;;  %167 = vmatprep.subr.mxu1 %v21_v0  ;;  %v18_v3 = vld [vmem:[%s234_s1] sm:$0xff]  ;;  %v16_v5 = vld [vmem:[%s235_s0 + $0x10] sm:$0xff]  ;;  %v15_v6 = vld [vmem:[%s235_s0 + $0x8] sm:$0xff] }
   0x3   :  { %154 = vmatpush3.msra.mxu0 %v21_v0  ;;  %171 = vmatpush3.msra.mxu1 %v21_v0  ;;  %v14_v4 = vld [vmem:[%s235_s0] sm:$0xff]  ;;  %v17_v7 = vld [vmem:[%s235_s0 + $0x18] sm:$0xff] }
   0x4   :  { %155 = vmatprep.subr.mxu0 %v20_v1  ;;  %168 = vmatprep.subr.mxu1 %v20_v1  ;;  %v140_v8 = vld [vmem:[%s236_s2] ss:$0 sm:$0xff] }
   0x5   :  { %156 = vmatpush3.msra.mxu0 %v20_v1  ;;  %172 = vmatpush3.msra.mxu1 %v20_v1 }
   0x6   :  { %157 = vmatprep.subr.mxu0 %v19_v2  ;;  %169 = vmatprep.subr.mxu1 %v19_v2 }
   0x7   :  { %158 = vmatpush3.msra.mxu0 %v19_v2  ;;  %173 = vmatpush3.msra.mxu1 %v19_v2 }
   0x8   :  { %159 = vmatprep.subr.mxu0 %v18_v3  ;;  %170 = vmatprep.subr.mxu1 %v18_v3 }
   0x9   :  { %160 = vmatpush3.msra.mxu0 %v18_v3  ;;  %174 = vmatpush3.msra.mxu1 %v18_v3 }
   0xa   :  { %161 = vmatprep.mubr.msk.f32.mxu0 %vm29_vm0, %v14_v4  ;;  %164 = vmatprep.mubr.msk.f32.mxu1 %vm29_vm0, %v16_v5 }
   0xb   :  { %162 = vmatmul.mubr.msk.f32.vlgmr.msra.gmra.mxu0 %vm29_vm0, %v15_v6  ;;  %165 = vmatmul.mubr.msk.f32.vlgmr.msra.gmra.mxu1 %vm29_vm0, %v17_v7 }
  0xcb   :  { %v163_v9 = vpop.f32.mrf.mxu0  ;;  %v166_v10 = vpop.f32.mrf.mxu1 }
  0xcc   :  { %v114_v11 = vadd.f32 %v163_v9, %v140_v8  ;;  %v124_v12 = vadd.f32 %v166_v10, %v140_v8 }
  0xcd   :  { %v108_v13 = vpop.f32.mrf.mxu0  ;;  %v118_v14 = vpop.f32.mrf.mxu1 }
  0xce   :  { %v128_v15 = vmax.f32 %v114_v11, 0.0  ;;  %v130_v16 = vmax.f32 %v124_v12, 0.0  ;;  %v109_v17 = vadd.f32 %v140_v8, %v108_v13  ;;  %v119_v18 = vadd.f32 %v140_v8, %v118_v14 }
  0xd0   :  { %133 = vst.msk [vmem:[%s237_s3 + $0x8] sm:$0xff] %vm131_vm1, %v128_v15  ;;  %135 = vst.msk [vmem:[%s237_s3 + $0x18] sm:$0xff] %vm131_vm1, %v130_v16  ;;  %v127_v19 = vmax.f32 %v109_v17, 0.0  ;;  %v129_v20 = vmax.f32 %v119_v18, 0.0 }
  0xd2   :  { %132 = vst.msk [vmem:[%s237_s3] sm:$0xff] %vm131_vm1, %v127_v19  ;;  %134 = vst.msk [vmem:[%s237_s3 + $0x10] sm:$0xff] %vm131_vm1, %v129_v20 }

// kernel: _lambda_.44
= control target key start
LH: loop header
LB: loop body
LE: loop exit
PB: predicated region body
PF: predicated region fallthrough
CT: control target
= control target key end

     0   :  { %vm49_vm0 = vcmask 588800   ;;  %vm159_vm1 = vcmask 64512   ;;  %vm263_vm2 = vcmask 130048   ;;  %vm380_vm3 = vcmask 261120   ;;  %s608_s1 = inlined_call_operand.vmem [shape: f32[72,8], index: 1, kind: input, shape index: {}]   ;;  %s609_s0 = inlined_call_operand.vmem [shape: f32[32,72], index: 0, kind: input, shape index: {}]   ;;  %s610_s3 = inlined_call_operand.vmem [shape: f32[8,32], index: 3, kind: input, shape index: {}]   ;;  %s611_s6 = inlined_call_operand.vmem [shape: f32[16,32], index: 6, kind: input, shape index: {}]   ;;  %s612_s2 = inlined_call_operand.vmem [shape: f32[1,8], index: 2, kind: input, shape index: {}]   ;;  %s613_s5 = inlined_call_operand.vmem [shape: f32[32,16], index: 5, kind: input, shape index: {}]   ;;  %s614_s4 = inlined_call_operand.vmem [shape: f32[1,32], index: 4, kind: input, shape index: {}]   ;;  %s615_s7 = inlined_call_operand.vmem [shape: f32[1,32], index: 7, kind: input, shape index: {}]   ;;  %s616_s8 = inlined_call_operand.vmem [shape: f32[32,32], index: 8, kind: output, shape index: {}]  }
   0x1   :  { %v41_v0 = vld [vmem:[%s608_s1 + $0x40] sm:$0xff]  ;;  %v40_v1 = vld [vmem:[%s608_s1 + $0x38] sm:$0xff]  ;;  %v39_v2 = vld [vmem:[%s608_s1 + $0x30] sm:$0xff] }
   0x2   :  { %428 = vmatprep.subr.mxu0 %v41_v0  ;;  %v29_v3 = vld [vmem:[%s609_s0] sm:$0xff]  ;;  %v38_v4 = vld [vmem:[%s608_s1 + $0x28] sm:$0xff]  ;;  %v36_v6 = vld [vmem:[%s608_s1 + $0x18] sm:$0xff] }
   0x3   :  { %429 = vmatpush3.msra.mxu0 %v41_v0  ;;  %446 = vmatprep.mubr.msk.f32.mxu0 %vm49_vm0, %v29_v3  ;;  %v37_v5 = vld [vmem:[%s608_s1 + $0x20] sm:$0xff]  ;;  %v35_v7 = vld [vmem:[%s608_s1 + $0x10] sm:$0xff]  ;;  %v34_v8 = vld [vmem:[%s608_s1 + $0x8] sm:$0xff] }
   0x4   :  { %430 = vmatprep.subr.mxu0 %v40_v1  ;;  %v33_v9 = vld [vmem:[%s608_s1] sm:$0xff]  ;;  %v30_v10 = vld [vmem:[%s609_s0 + $0x8] sm:$0xff]  ;;  %v31_v11 = vld [vmem:[%s609_s0 + $0x10] sm:$0xff] }
   0x5   :  { %431 = vmatpush3.msra.mxu0 %v40_v1  ;;  %v32_v12 = vld [vmem:[%s609_s0 + $0x18] sm:$0xff]  ;;  %v151_v13 = vld [vmem:[%s610_s3] sm:$0xff]  ;;  %v262_v14 = vld [vmem:[%s611_s6 + $0x8] sm:$0xff] }
   0x6   :  { %432 = vmatprep.subr.mxu0 %v39_v2  ;;  %452 = vmatprep.subr.mxu1 %v151_v13  ;;  %v389_v15 = vld [vmem:[%s612_s2] ss:$0 sm:$0xff]  ;;  %v258_v30 = vld [vmem:[%s613_s5 + $0x8] sm:$0xff]  ;;  %v259_v31 = vld [vmem:[%s613_s5 + $0x10] sm:$0xff] }
   0x7   :  { %433 = vmatpush3.msra.mxu0 %v39_v2  ;;  %453 = vmatpush3.msra.mxu1 %v151_v13  ;;  %v261_v26 = vld [vmem:[%s611_s6] sm:$0xff]  ;;  %v260_v32 = vld [vmem:[%s613_s5 + $0x18] sm:$0xff] }
   0x8   :  { %434 = vmatprep.subr.mxu0 %v38_v4  ;;  %460 = vmatprep.subr.mxu1 %v262_v14  ;;  %v257_v29 = vld [vmem:[%s613_s5] sm:$0xff] }
   0x9   :  { %435 = vmatpush3.msra.mxu0 %v38_v4  ;;  %v394_v35 = vld [vmem:[%s614_s4] ss:$0 sm:$0xff] }
   0xa   :  { %436 = vmatprep.subr.mxu0 %v37_v5  ;;  %v403_v40 = vld [vmem:[%s615_s7] ss:$0 sm:$0xff] }
   0xb   :  { %437 = vmatpush3.msra.mxu0 %v37_v5 }
   0xc   :  { %438 = vmatprep.subr.mxu0 %v36_v6 }
   0xd   :  { %439 = vmatpush3.msra.mxu0 %v36_v6 }
   0xe   :  { %440 = vmatprep.subr.mxu0 %v35_v7 }
   0xf   :  { %441 = vmatpush3.msra.mxu0 %v35_v7 }
  0x10   :  { %442 = vmatprep.subr.mxu0 %v34_v8 }
  0x11   :  { %443 = vmatpush3.msra.mxu0 %v34_v8 }
  0x12   :  { %444 = vmatprep.subr.mxu0 %v33_v9 }
  0x13   :  { %445 = vmatpush3.msra.mxu0 %v33_v9 }
  0x14   :  { %447 = vmatmul.mubr.msk.f32.vlgmr.msra.gmra.mxu0 %vm49_vm0, %v30_v10 }
  0x15   :  { %449 = vmatprep.mubr.msk.f32.mxu0 %vm49_vm0, %v31_v11 }
  0x18   :  { %450 = vmatmul.mubr.msk.f32.gmra.mxu0 %vm49_vm0, %v32_v12 }
  0xd4   :  { %v448_v16 = vpop.f32.mrf.mxu0 }
  0xd5   :  { %v134_v17 = vadd.f32 %v448_v16, %v389_v15 }
  0xd6   :  { %v128_v18 = vpop.f32.mrf.mxu0 }
  0xd7   :  { %v129_v19 = vadd.f32 %v389_v15, %v128_v18  ;;  %v148_v22 = vmax.f32 %v134_v17, 0.0 }
  0xd8   :  { %v451_v20 = vpop.f32.mrf.mxu0 }
  0xd9   :  { %v147_v21 = vmax.f32 %v129_v19, 0.0  ;;  %v144_v23 = vadd.f32 %v451_v20, %v389_v15 }
  0xda   :  { %v138_v24 = vpop.f32.mrf.mxu0 }
  0xdb   :  { %v139_v25 = vadd.f32 %v389_v15, %v138_v24  ;;  %454 = vmatprep.mubr.msk.f32.mxu1 %vm159_vm1, %v147_v21  ;;  %v150_v28 = vmax.f32 %v144_v23, 0.0 }
  0xdc   :  { %455 = vmatmul.mubr.msk.f32.vlgmr.msra.gmra.mxu1 %vm159_vm1, %v148_v22 }
  0xdd   :  { %v149_v27 = vmax.f32 %v139_v25, 0.0  ;;  %461 = vmatpush3.msra.mxu1 %v262_v14 }
  0xde   :  { %462 = vmatprep.subr.mxu1 %v261_v26 }
  0xdf   :  { %457 = vmatprep.mubr.msk.f32.mxu1 %vm159_vm1, %v149_v27  ;;  %463 = vmatpush3.msra.mxu1 %v261_v26 }
  0xe0   :  { %458 = vmatmul.mubr.msk.f32.gmra.mxu1 %vm159_vm1, %v150_v28 }
  0xe1   :  { %464 = vmatprep.mubr.msk.f32.mxu1 %vm263_vm2, %v257_v29 }
  0xe4   :  { %465 = vmatmul.mubr.msk.f32.vlgmr.msra.gmra.mxu1 %vm263_vm2, %v258_v30 }
  0xe5   :  { %467 = vmatprep.mubr.msk.f32.mxu1 %vm263_vm2, %v259_v31 }
  0xe8   :  { %468 = vmatmul.mubr.msk.f32.gmra.mxu1 %vm263_vm2, %v260_v32 }
 0x19c   :  { %v456_v33 = vpop.f32.mrf.mxu1 }
 0x19d   :  { %v244_v38 = vadd.f32 %v456_v33, %v394_v35 }
 0x19e   :  { %v238_v34 = vpop.f32.mrf.mxu1 }
 0x19f   :  { %v239_v41 = vadd.f32 %v394_v35, %v238_v34 }
 0x1a0   :  { %v459_v36 = vpop.f32.mrf.mxu1 }
 0x1a1   :  { %v254_v44 = vadd.f32 %v459_v36, %v394_v35 }
 0x1a2   :  { %v248_v37 = vpop.f32.mrf.mxu1 }
 0x1a3   :  { %v249_v48 = vadd.f32 %v394_v35, %v248_v37 }
 0x1a4   :  { %v466_v39 = vpop.f32.mrf.mxu1 }
 0x1a5   :  { %v362_v42 = vadd.f32 %v466_v39, %v244_v38 }
 0x1a6   :  { %v342_v43 = vpop.f32.mrf.mxu1 }
 0x1a7   :  { %v373_v45 = vadd.f32 %v403_v40, %v362_v42  ;;  %v361_v46 = vadd.f32 %v342_v43, %v239_v41 }
 0x1a8   :  { %v469_v47 = vpop.f32.mrf.mxu1 }
 0x1a9   :  { %v377_v49 = vmax.f32 %v373_v45, 0.0  ;;  %v372_v50 = vadd.f32 %v403_v40, %v361_v46  ;;  %v364_v51 = vadd.f32 %v469_v47, %v254_v44 }
 0x1aa   :  { %v352_v52 = vpop.f32.mrf.mxu1 }
 0x1ab   :  { %382 = vst.msk [vmem:[%s616_s8 + $0x8] sm:$0xff] %vm380_vm3, %v377_v49  ;;  %v376_v53 = vmax.f32 %v372_v50, 0.0  ;;  %v375_v54 = vadd.f32 %v403_v40, %v364_v51  ;;  %v363_v55 = vadd.f32 %v352_v52, %v249_v48 }
 0x1ad   :  { %381 = vst.msk [vmem:[%s616_s8] sm:$0xff] %vm380_vm3, %v376_v53  ;;  %v379_v56 = vmax.f32 %v375_v54, 0.0  ;;  %v374_v57 = vadd.f32 %v403_v40, %v363_v55 }
 0x1af   :  { %384 = vst.msk [vmem:[%s616_s8 + $0x18] sm:$0xff] %vm380_vm3, %v379_v56  ;;  %v378_v58 = vmax.f32 %v374_v57, 0.0 }
 0x1b1   :  { %383 = vst.msk [vmem:[%s616_s8 + $0x10] sm:$0xff] %vm380_vm3, %v378_v58 }

// kernel: _lambda_.46
= control target key start
LH: loop header
LB: loop body
LE: loop exit
PB: predicated region body
PF: predicated region fallthrough
CT: control target
= control target key end

     0   :  { %vm43_vm0 = vcmask 588800   ;;  %vm153_vm1 = vcmask 64512   ;;  %vm263_vm2 = vcmask 261120   ;;  %s447_s1 = inlined_call_operand.vmem [shape: f32[72,8], index: 1, kind: input, shape index: {}]   ;;  %s448_s0 = inlined_call_operand.vmem [shape: f32[32,72], index: 0, kind: input, shape index: {}]   ;;  %s449_s3 = inlined_call_operand.vmem [shape: f32[8,32], index: 3, kind: input, shape index: {}]   ;;  %s450_s2 = inlined_call_operand.vmem [shape: f32[1,8], index: 2, kind: input, shape index: {}]   ;;  %s451_s4 = inlined_call_operand.vmem [shape: f32[1,32], index: 4, kind: input, shape index: {}]   ;;  %s452_s5 = inlined_call_operand.vmem [shape: f32[32,32], index: 5, kind: input, shape index: {}]   ;;  %s453_s6 = inlined_call_operand.vmem [shape: f32[32,32], index: 6, kind: output, shape index: {}]  }
   0x1   :  { %v35_v0 = vld [vmem:[%s447_s1 + $0x40] sm:$0xff]  ;;  %v34_v1 = vld [vmem:[%s447_s1 + $0x38] sm:$0xff]  ;;  %v33_v2 = vld [vmem:[%s447_s1 + $0x30] sm:$0xff] }
   0x2   :  { %300 = vmatprep.subr.mxu0 %v35_v0  ;;  %v23_v3 = vld [vmem:[%s448_s0] sm:$0xff]  ;;  %v32_v4 = vld [vmem:[%s447_s1 + $0x28] sm:$0xff]  ;;  %v30_v6 = vld [vmem:[%s447_s1 + $0x18] sm:$0xff] }
   0x3   :  { %301 = vmatpush3.msra.mxu0 %v35_v0  ;;  %318 = vmatprep.mubr.msk.f32.mxu0 %vm43_vm0, %v23_v3  ;;  %v31_v5 = vld [vmem:[%s447_s1 + $0x20] sm:$0xff]  ;;  %v29_v7 = vld [vmem:[%s447_s1 + $0x10] sm:$0xff]  ;;  %v28_v8 = vld [vmem:[%s447_s1 + $0x8] sm:$0xff] }
   0x4   :  { %302 = vmatprep.subr.mxu0 %v34_v1  ;;  %v27_v9 = vld [vmem:[%s447_s1] sm:$0xff]  ;;  %v24_v10 = vld [vmem:[%s448_s0 + $0x8] sm:$0xff]  ;;  %v25_v11 = vld [vmem:[%s448_s0 + $0x10] sm:$0xff] }
   0x5   :  { %303 = vmatpush3.msra.mxu0 %v34_v1  ;;  %v26_v12 = vld [vmem:[%s448_s0 + $0x18] sm:$0xff]  ;;  %v145_v13 = vld [vmem:[%s449_s3] sm:$0xff]  ;;  %v252_v29 = vld [vmem:[%s452_s5 + $0x8] sm:$0xff] }
   0x6   :  { %304 = vmatprep.subr.mxu0 %v33_v2  ;;  %324 = vmatprep.subr.mxu1 %v145_v13  ;;  %v272_v14 = vld [vmem:[%s450_s2] ss:$0 sm:$0xff]  ;;  %v254_v36 = vld [vmem:[%s452_s5 + $0x18] sm:$0xff]  ;;  %v253_v41 = vld [vmem:[%s452_s5 + $0x10] sm:$0xff] }
   0x7   :  { %305 = vmatpush3.msra.mxu0 %v33_v2  ;;  %325 = vmatpush3.msra.mxu1 %v145_v13  ;;  %v277_v27 = vld [vmem:[%s451_s4] ss:$0 sm:$0xff] }
   0x8   :  { %306 = vmatprep.subr.mxu0 %v32_v4  ;;  %v251_v32 = vld [vmem:[%s452_s5] sm:$0xff] }
   0x9   :  { %307 = vmatpush3.msra.mxu0 %v32_v4 }
   0xa   :  { %308 = vmatprep.subr.mxu0 %v31_v5 }
   0xb   :  { %309 = vmatpush3.msra.mxu0 %v31_v5 }
   0xc   :  { %310 = vmatprep.subr.mxu0 %v30_v6 }
   0xd   :  { %311 = vmatpush3.msra.mxu0 %v30_v6 }
   0xe   :  { %312 = vmatprep.subr.mxu0 %v29_v7 }
   0xf   :  { %313 = vmatpush3.msra.mxu0 %v29_v7 }
  0x10   :  { %314 = vmatprep.subr.mxu0 %v28_v8 }
  0x11   :  { %315 = vmatpush3.msra.mxu0 %v28_v8 }
  0x12   :  { %316 = vmatprep.subr.mxu0 %v27_v9 }
  0x13   :  { %317 = vmatpush3.msra.mxu0 %v27_v9 }
  0x14   :  { %319 = vmatmul.mubr.msk.f32.vlgmr.msra.gmra.mxu0 %vm43_vm0, %v24_v10 }
  0x15   :  { %321 = vmatprep.mubr.msk.f32.mxu0 %vm43_vm0, %v25_v11 }
  0x18   :  { %322 = vmatmul.mubr.msk.f32.gmra.mxu0 %vm43_vm0, %v26_v12 }
  0xd4   :  { %v320_v15 = vpop.f32.mrf.mxu0 }
  0xd5   :  { %v128_v16 = vadd.f32 %v320_v15, %v272_v14 }
  0xd6   :  { %v122_v17 = vpop.f32.mrf.mxu0 }
  0xd7   :  { %v123_v18 = vadd.f32 %v272_v14, %v122_v17  ;;  %v142_v21 = vmax.f32 %v128_v16, 0.0 }
  0xd8   :  { %v323_v19 = vpop.f32.mrf.mxu0 }
  0xd9   :  { %v141_v20 = vmax.f32 %v123_v18, 0.0  ;;  %v138_v22 = vadd.f32 %v323_v19, %v272_v14 }
  0xda   :  { %v132_v23 = vpop.f32.mrf.mxu0 }
  0xdb   :  { %v133_v24 = vadd.f32 %v272_v14, %v132_v23  ;;  %326 = vmatprep.mubr.msk.f32.mxu1 %vm153_vm1, %v141_v20  ;;  %v144_v26 = vmax.f32 %v138_v22, 0.0 }
  0xdc   :  { %327 = vmatmul.mubr.msk.f32.vlgmr.msra.gmra.mxu1 %vm153_vm1, %v142_v21 }
  0xdd   :  { %v143_v25 = vmax.f32 %v133_v24, 0.0 }
  0xdf   :  { %329 = vmatprep.mubr.msk.f32.mxu1 %vm153_vm1, %v143_v25 }
  0xe0   :  { %330 = vmatmul.mubr.msk.f32.gmra.mxu1 %vm153_vm1, %v144_v26 }
 0x19c   :  { %v328_v28 = vpop.f32.mrf.mxu1 }
 0x19d   :  { %v238_v30 = vadd.f32 %v328_v28, %v277_v27 }
 0x19e   :  { %v232_v31 = vpop.f32.mrf.mxu1 }
 0x19f   :  { %v256_v33 = vadd.f32 %v252_v29, %v238_v30  ;;  %v233_v34 = vadd.f32 %v277_v27, %v232_v31 }
 0x1a0   :  { %v331_v35 = vpop.f32.mrf.mxu1 }
 0x1a1   :  { %v260_v37 = vmax.f32 %v256_v33, 0.0  ;;  %v255_v38 = vadd.f32 %v251_v32, %v233_v34  ;;  %v248_v39 = vadd.f32 %v331_v35, %v277_v27 }
 0x1a2   :  { %v242_v40 = vpop.f32.mrf.mxu1 }
 0x1a3   :  { %265 = vst.msk [vmem:[%s453_s6 + $0x8] sm:$0xff] %vm263_vm2, %v260_v37  ;;  %v259_v42 = vmax.f32 %v255_v38, 0.0  ;;  %v258_v43 = vadd.f32 %v254_v36, %v248_v39  ;;  %v243_v44 = vadd.f32 %v277_v27, %v242_v40 }
 0x1a5   :  { %264 = vst.msk [vmem:[%s453_s6] sm:$0xff] %vm263_vm2, %v259_v42  ;;  %v262_v45 = vmax.f32 %v258_v43, 0.0  ;;  %v257_v46 = vadd.f32 %v253_v41, %v243_v44 }
 0x1a7   :  { %267 = vst.msk [vmem:[%s453_s6 + $0x18] sm:$0xff] %vm263_vm2, %v262_v45  ;;  %v261_v47 = vmax.f32 %v257_v46, 0.0 }
 0x1a9   :  { %266 = vst.msk [vmem:[%s453_s6 + $0x10] sm:$0xff] %vm263_vm2, %v261_v47 }

// kernel: _lambda_.51
= control target key start
LH: loop header
LB: loop body
LE: loop exit
PB: predicated region body
PF: predicated region fallthrough
CT: control target
= control target key end

     0   :  { %vm29_vm0 = vcmask 261120   ;;  %vm131_vm1 = vcmask 130048   ;;  %s234_s1 = inlined_call_operand.vmem [shape: f32[32,16], index: 1, kind: input, shape index: {}]   ;;  %s235_s0 = inlined_call_operand.vmem [shape: f32[32,32], index: 0, kind: input, shape index: {}]   ;;  %s236_s2 = inlined_call_operand.vmem [shape: f32[1,16], index: 2, kind: input, shape index: {}]   ;;  %s237_s3 = inlined_call_operand.vmem [shape: f32[32,16], index: 3, kind: output, shape index: {}]  }
   0x1   :  { %v21_v0 = vld [vmem:[%s234_s1 + $0x18] sm:$0xff]  ;;  %v20_v1 = vld [vmem:[%s234_s1 + $0x10] sm:$0xff]  ;;  %v19_v2 = vld [vmem:[%s234_s1 + $0x8] sm:$0xff] }
   0x2   :  { %153 = vmatprep.subr.mxu0 %v21_v0  ;;  %167 = vmatprep.subr.mxu1 %v21_v0  ;;  %v18_v3 = vld [vmem:[%s234_s1] sm:$0xff]  ;;  %v16_v5 = vld [vmem:[%s235_s0 + $0x10] sm:$0xff]  ;;  %v15_v6 = vld [vmem:[%s235_s0 + $0x8] sm:$0xff] }
   0x3   :  { %154 = vmatpush3.msra.mxu0 %v21_v0  ;;  %171 = vmatpush3.msra.mxu1 %v21_v0  ;;  %v14_v4 = vld [vmem:[%s235_s0] sm:$0xff]  ;;  %v17_v7 = vld [vmem:[%s235_s0 + $0x18] sm:$0xff] }
   0x4   :  { %155 = vmatprep.subr.mxu0 %v20_v1  ;;  %168 = vmatprep.subr.mxu1 %v20_v1  ;;  %v140_v8 = vld [vmem:[%s236_s2] ss:$0 sm:$0xff] }
   0x5   :  { %156 = vmatpush3.msra.mxu0 %v20_v1  ;;  %172 = vmatpush3.msra.mxu1 %v20_v1 }
   0x6   :  { %157 = vmatprep.subr.mxu0 %v19_v2  ;;  %169 = vmatprep.subr.mxu1 %v19_v2 }
   0x7   :  { %158 = vmatpush3.msra.mxu0 %v19_v2  ;;  %173 = vmatpush3.msra.mxu1 %v19_v2 }
   0x8   :  { %159 = vmatprep.subr.mxu0 %v18_v3  ;;  %170 = vmatprep.subr.mxu1 %v18_v3 }
   0x9   :  { %160 = vmatpush3.msra.mxu0 %v18_v3  ;;  %174 = vmatpush3.msra.mxu1 %v18_v3 }
   0xa   :  { %161 = vmatprep.mubr.msk.f32.mxu0 %vm29_vm0, %v14_v4  ;;  %164 = vmatprep.mubr.msk.f32.mxu1 %vm29_vm0, %v16_v5 }
   0xb   :  { %162 = vmatmul.mubr.msk.f32.vlgmr.msra.gmra.mxu0 %vm29_vm0, %v15_v6  ;;  %165 = vmatmul.mubr.msk.f32.vlgmr.msra.gmra.mxu1 %vm29_vm0, %v17_v7 }
  0xcb   :  { %v163_v9 = vpop.f32.mrf.mxu0  ;;  %v166_v10 = vpop.f32.mrf.mxu1 }
  0xcc   :  { %v114_v11 = vadd.f32 %v163_v9, %v140_v8  ;;  %v124_v12 = vadd.f32 %v166_v10, %v140_v8 }
  0xcd   :  { %v108_v13 = vpop.f32.mrf.mxu0  ;;  %v118_v14 = vpop.f32.mrf.mxu1 }
  0xce   :  { %v128_v15 = vmax.f32 %v114_v11, 0.0  ;;  %v130_v16 = vmax.f32 %v124_v12, 0.0  ;;  %v109_v17 = vadd.f32 %v140_v8, %v108_v13  ;;  %v119_v18 = vadd.f32 %v140_v8, %v118_v14 }
  0xd0   :  { %133 = vst.msk [vmem:[%s237_s3 + $0x8] sm:$0xff] %vm131_vm1, %v128_v15  ;;  %135 = vst.msk [vmem:[%s237_s3 + $0x18] sm:$0xff] %vm131_vm1, %v130_v16  ;;  %v127_v19 = vmax.f32 %v109_v17, 0.0  ;;  %v129_v20 = vmax.f32 %v119_v18, 0.0 }
  0xd2   :  { %132 = vst.msk [vmem:[%s237_s3] sm:$0xff] %vm131_vm1, %v127_v19  ;;  %134 = vst.msk [vmem:[%s237_s3 + $0x10] sm:$0xff] %vm131_vm1, %v129_v20 }

// kernel: _lambda_.53
= control target key start
LH: loop header
LB: loop body
LE: loop exit
PB: predicated region body
PF: predicated region fallthrough
CT: control target
= control target key end

     0   :  { %v143_v0 = vmov 0.0   ;;  %vm144_vm0 = vmmov 0   ;;  %vm30_vm1 = vcmask 523264   ;;  %vm105_vm2 = vcmask 130048   ;;  %s198_s1 = inlined_call_operand.vmem [shape: f32[64,16], index: 1, kind: input, shape index: {}]   ;;  %s199_s0 = inlined_call_operand.vmem [shape: f32[8,64], index: 0, kind: input, shape index: {}]   ;;  %s200_s2 = inlined_call_operand.vmem [shape: f32[1,16], index: 2, kind: input, shape index: {}]   ;;  %s201_s3 = inlined_call_operand.vmem [shape: f32[8,16], index: 3, kind: output, shape index: {}]  }
   0x1   :  { %122 = vmatprep.subr.mxu0 %v143_v0  ;;  %v22_v1 = vld [vmem:[%s198_s1 + $0x38] sm:$0xff]  ;;  %v21_v2 = vld [vmem:[%s198_s1 + $0x30] sm:$0xff]  ;;  %138 = vmatprep.mubr.msk.f32.mxu0 %vm144_vm0, %v143_v0  ;;  %v20_v3 = vld [vmem:[%s198_s1 + $0x28] sm:$0xff] }
   0x2   :  { %123 = vmatpush3.msra.mxu0 %v22_v1  ;;  %v19_v4 = vld [vmem:[%s198_s1 + $0x20] sm:$0xff]  ;;  %v18_v5 = vld [vmem:[%s198_s1 + $0x18] sm:$0xff]  ;;  %v17_v6 = vld [vmem:[%s198_s1 + $0x10] sm:$0xff] }
   0x3   :  { %124 = vmatprep.subr.mxu0 %v143_v0  ;;  %v16_v7 = vld [vmem:[%s198_s1 + $0x8] sm:$0xff]  ;;  %v15_v8 = vld [vmem:[%s198_s1] sm:$0xff] }
   0x4   :  { %125 = vmatpush3.msra.mxu0 %v21_v2  ;;  %v14_v9 = vld [vmem:[%s199_s0] sm:$0xff] }
   0x5   :  { %126 = vmatprep.subr.mxu0 %v143_v0  ;;  %v111_v10 = vld [vmem:[%s200_s2] ss:$0 sm:$0xff] }
   0x6   :  { %127 = vmatpush3.msra.mxu0 %v20_v3 }
   0x7   :  { %128 = vmatprep.subr.mxu0 %v143_v0 }
   0x8   :  { %129 = vmatpush3.msra.mxu0 %v19_v4 }
   0x9   :  { %130 = vmatprep.subr.mxu0 %v143_v0 }
   0xa   :  { %131 = vmatpush3.msra.mxu0 %v18_v5 }
   0xb   :  { %132 = vmatprep.subr.mxu0 %v143_v0 }
   0xc   :  { %133 = vmatpush3.msra.mxu0 %v17_v6 }
   0xd   :  { %134 = vmatprep.subr.mxu0 %v143_v0 }
   0xe   :  { %135 = vmatpush3.msra.mxu0 %v16_v7 }
   0xf   :  { %136 = vmatprep.subr.mxu0 %v143_v0 }
  0x10   :  { %137 = vmatpush3.msra.mxu0 %v15_v8 }
  0x11   :  { %139 = vmatmul.mubr.msk.f32.vlgmr.msra.gmra.mxu0 %vm30_vm1, %v14_v9 }
  0xd1   :  { %v100_v11 = vpop.f32.mrf.mxu0 }
  0xd2   :  { %v101_v12 = vadd.f32 %v111_v10, %v100_v11 }
  0xd3   :  { %v140_v13 = vpop.f32.mrf.mxu0 }
  0xd4   :  { %v104_v14 = vmax.f32 %v101_v12, 0.0 }
  0xd6   :  { %106 = vst.msk [vmem:[%s201_s3] sm:$0xff] %vm105_vm2, %v104_v14 }

// kernel: _lambda_.54
= control target key start
LH: loop header
LB: loop body
LE: loop exit
PB: predicated region body
PF: predicated region fallthrough
CT: control target
= control target key end

     0   :  { %v232_v0 = vmov 0.0   ;;  %vm50_vm0 = vcmask 130048   ;;  %vm233_vm1 = vmmov 0   ;;  %vm210_vm2 = vcmask 523264   ;;  %s370_s1 = inlined_call_operand.vmem [shape: f32[144,16], index: 1, kind: input, shape index: {}]   ;;  %s371_s0 = inlined_call_operand.vmem [shape: f32[8,144], index: 0, kind: input, shape index: {}]   ;;  %s372_s3 = inlined_call_operand.vmem [shape: f32[16,64], index: 3, kind: input, shape index: {}]   ;;  %s373_s2 = inlined_call_operand.vmem [shape: f32[1,16], index: 2, kind: input, shape index: {}]   ;;  %s374_s4 = inlined_call_operand.vmem [shape: f32[1,64], index: 4, kind: input, shape index: {}]   ;;  %s375_s5 = inlined_call_operand.vmem [shape: f32[8,64], index: 5, kind: input, shape index: {}]   ;;  %s376_s6 = inlined_call_operand.vmem [shape: f32[8,64], index: 6, kind: output, shape index: {}]  }
   0x1   :  { %54 = vmatprep.subr.mxu0 %v232_v0  ;;  %v40_v1 = vld [vmem:[%s370_s1 + $0x78] sm:$0xff]  ;;  %v39_v2 = vld [vmem:[%s370_s1 + $0x70] sm:$0xff]  ;;  %223 = vmatprep.subr.mxu1 %v232_v0  ;;  %v38_v3 = vld [vmem:[%s370_s1 + $0x68] sm:$0xff] }
   0x2   :  { %55 = vmatpush1.msra.mxu0 %v40_v1  ;;  %v37_v4 = vld [vmem:[%s370_s1 + $0x60] sm:$0xff]  ;;  %v36_v5 = vld [vmem:[%s370_s1 + $0x58] sm:$0xff]  ;;  %v24_v6 = vld [vmem:[%s371_s0 + $0x8] sm:$0xff]  ;;  %227 = vmatprep.mubr.msk.f32.mxu1 %vm233_vm1, %v232_v0 }
   0x3   :  { %56 = vmatprep.subr.mxu0 %v232_v0  ;;  %217 = vmatprep.mubr.msk.f32.mxu0 %vm50_vm0, %v24_v6  ;;  %v35_v7 = vld [vmem:[%s370_s1 + $0x50] sm:$0xff]  ;;  %v34_v8 = vld [vmem:[%s370_s1 + $0x48] sm:$0xff]  ;;  %v33_v9 = vld [vmem:[%s370_s1 + $0x40] sm:$0xff] }
   0x4   :  { %57 = vmatpush1.msra.mxu0 %v39_v2  ;;  %v32_v10 = vld [vmem:[%s370_s1 + $0x38] sm:$0xff]  ;;  %v31_v11 = vld [vmem:[%s370_s1 + $0x30] sm:$0xff]  ;;  %v30_v12 = vld [vmem:[%s370_s1 + $0x28] sm:$0xff] }
   0x5   :  { %58 = vmatprep.subr.mxu0 %v232_v0  ;;  %v29_v13 = vld [vmem:[%s370_s1 + $0x20] sm:$0xff]  ;;  %v28_v14 = vld [vmem:[%s370_s1 + $0x18] sm:$0xff]  ;;  %v27_v15 = vld [vmem:[%s370_s1 + $0x10] sm:$0xff] }
   0x6   :  { %59 = vmatpush1.msra.mxu0 %v38_v3  ;;  %v26_v16 = vld [vmem:[%s370_s1 + $0x8] sm:$0xff]  ;;  %v25_v17 = vld [vmem:[%s370_s1] sm:$0xff] }
   0x7   :  { %60 = vmatprep.subr.mxu0 %v232_v0  ;;  %v42_v18 = vld [vmem:[%s370_s1 + $0x88] sm:$0xff]  ;;  %v41_v19 = vld [vmem:[%s370_s1 + $0x80] sm:$0xff] }
   0x8   :  { %61 = vmatpush1.msra.mxu0 %v37_v4  ;;  %v23_v20 = vld [vmem:[%s371_s0] sm:$0xff]  ;;  %v126_v21 = vld [vmem:[%s372_s3 + $0x8] sm:$0xff] }
   0x9   :  { %62 = vmatprep.subr.mxu0 %v232_v0  ;;  %224 = vmatpush3.msra.mxu1 %v126_v21  ;;  %v125_v22 = vld [vmem:[%s372_s3] sm:$0xff] }
   0xa   :  { %63 = vmatpush1.msra.mxu0 %v36_v5  ;;  %225 = vmatprep.subr.mxu1 %v232_v0  ;;  %v216_v23 = vld [vmem:[%s373_s2] ss:$0 sm:$0xff] }
   0xb   :  { %64 = vmatprep.subr.mxu0 %v232_v0  ;;  %226 = vmatpush3.msra.mxu1 %v125_v22  ;;  %v218_v28 = vld [vmem:[%s374_s4] ss:$0 sm:$0xff] }
   0xc   :  { %65 = vmatpush1.msra.mxu0 %v35_v7  ;;  %v207_v30 = vld [vmem:[%s375_s5] sm:$0xff] }
   0xd   :  { %66 = vmatprep.subr.mxu0 %v232_v0 }
   0xe   :  { %67 = vmatpush1.msra.mxu0 %v34_v8 }
   0xf   :  { %68 = vmatprep.subr.mxu0 %v232_v0 }
  0x10   :  { %69 = vmatpush1.msra.mxu0 %v33_v9 }
  0x11   :  { %70 = vmatprep.subr.mxu0 %v232_v0 }
  0x12   :  { %71 = vmatpush1.msra.mxu0 %v32_v10 }
  0x13   :  { %72 = vmatprep.subr.mxu0 %v232_v0 }
  0x14   :  { %73 = vmatpush1.msra.mxu0 %v31_v11 }
  0x15   :  { %74 = vmatprep.subr.mxu0 %v232_v0 }
  0x16   :  { %75 = vmatpush1.msra.mxu0 %v30_v12 }
  0x17   :  { %76 = vmatprep.subr.mxu0 %v232_v0 }
  0x18   :  { %77 = vmatpush1.msra.mxu0 %v29_v13 }
  0x19   :  { %78 = vmatprep.subr.mxu0 %v232_v0 }
  0x1a   :  { %79 = vmatpush1.msra.mxu0 %v28_v14 }
  0x1b   :  { %80 = vmatprep.subr.mxu0 %v232_v0 }
  0x1c   :  { %81 = vmatpush1.msra.mxu0 %v27_v15 }
  0x1d   :  { %82 = vmatprep.subr.mxu0 %v232_v0 }
  0x1e   :  { %83 = vmatpush1.msra.mxu0 %v26_v16 }
  0x1f   :  { %84 = vmatprep.subr.mxu0 %v232_v0 }
  0x20   :  { %85 = vmatpush1.msra.mxu0 %v25_v17 }
  0x21   :  { %114 = vmatprep.subr.mxu0 %v232_v0 }
  0x22   :  { %115 = vmatpush2.msra.mxu0 %v42_v18 }
  0x23   :  { %116 = vmatprep.subr.mxu0 %v232_v0 }
  0x24   :  { %117 = vmatpush2.msra.mxu0 %v41_v19 }
  0x25   :  { %119 = vmatmul.mubr.f32.vlgmr.msra.gmra.mxu0 %v23_v20 }
  0xe5   :  { %v120_v24 = vpop.f32.mrf.mxu0 }
  0xe6   :  { %v121_v25 = vadd.f32 %v216_v23, %v120_v24 }
  0xe7   :  { %v122_v26 = vpop.f32.mrf.mxu0 }
  0xe8   :  { %v124_v27 = vmax.f32 %v121_v25, 0.0 }
  0xea   :  { %228 = vmatmul.mubr.msk.f32.vlgmr.msra.gmra.mxu1 %vm50_vm0, %v124_v27 }
 0x1aa   :  { %v203_v29 = vpop.f32.mrf.mxu1 }
 0x1ab   :  { %v204_v31 = vadd.f32 %v218_v28, %v203_v29 }
 0x1ac   :  { %v229_v32 = vpop.f32.mrf.mxu1 }
 0x1ad   :  { %v208_v33 = vadd.f32 %v207_v30, %v204_v31 }
 0x1af   :  { %v209_v34 = vmax.f32 %v208_v33, 0.0 }
 0x1b1   :  { %211 = vst.msk [vmem:[%s376_s6] sm:$0xff] %vm210_vm2, %v209_v34 }

// kernel: _lambda_.63
= control target key start
LH: loop header
LB: loop body
LE: loop exit
PB: predicated region body
PF: predicated region fallthrough
CT: control target
= control target key end

     0   :  { %v143_v0 = vmov 0.0   ;;  %vm144_vm0 = vmmov 0   ;;  %vm30_vm1 = vcmask 523264   ;;  %vm105_vm2 = vcmask 261120   ;;  %s198_s1 = inlined_call_operand.vmem [shape: f32[64,32], index: 1, kind: input, shape index: {}]   ;;  %s199_s0 = inlined_call_operand.vmem [shape: f32[8,64], index: 0, kind: input, shape index: {}]   ;;  %s200_s2 = inlined_call_operand.vmem [shape: f32[1,32], index: 2, kind: input, shape index: {}]   ;;  %s201_s3 = inlined_call_operand.vmem [shape: f32[8,32], index: 3, kind: output, shape index: {}]  }
   0x1   :  { %122 = vmatprep.subr.mxu0 %v143_v0  ;;  %v22_v1 = vld [vmem:[%s198_s1 + $0x38] sm:$0xff]  ;;  %v21_v2 = vld [vmem:[%s198_s1 + $0x30] sm:$0xff]  ;;  %138 = vmatprep.mubr.msk.f32.mxu0 %vm144_vm0, %v143_v0  ;;  %v20_v3 = vld [vmem:[%s198_s1 + $0x28] sm:$0xff] }
   0x2   :  { %123 = vmatpush3.msra.mxu0 %v22_v1  ;;  %v19_v4 = vld [vmem:[%s198_s1 + $0x20] sm:$0xff]  ;;  %v18_v5 = vld [vmem:[%s198_s1 + $0x18] sm:$0xff]  ;;  %v17_v6 = vld [vmem:[%s198_s1 + $0x10] sm:$0xff] }
   0x3   :  { %124 = vmatprep.subr.mxu0 %v143_v0  ;;  %v16_v7 = vld [vmem:[%s198_s1 + $0x8] sm:$0xff]  ;;  %v15_v8 = vld [vmem:[%s198_s1] sm:$0xff] }
   0x4   :  { %125 = vmatpush3.msra.mxu0 %v21_v2  ;;  %v14_v9 = vld [vmem:[%s199_s0] sm:$0xff] }
   0x5   :  { %126 = vmatprep.subr.mxu0 %v143_v0  ;;  %v111_v10 = vld [vmem:[%s200_s2] ss:$0 sm:$0xff] }
   0x6   :  { %127 = vmatpush3.msra.mxu0 %v20_v3 }
   0x7   :  { %128 = vmatprep.subr.mxu0 %v143_v0 }
   0x8   :  { %129 = vmatpush3.msra.mxu0 %v19_v4 }
   0x9   :  { %130 = vmatprep.subr.mxu0 %v143_v0 }
   0xa   :  { %131 = vmatpush3.msra.mxu0 %v18_v5 }
   0xb   :  { %132 = vmatprep.subr.mxu0 %v143_v0 }
   0xc   :  { %133 = vmatpush3.msra.mxu0 %v17_v6 }
   0xd   :  { %134 = vmatprep.subr.mxu0 %v143_v0 }
   0xe   :  { %135 = vmatpush3.msra.mxu0 %v16_v7 }
   0xf   :  { %136 = vmatprep.subr.mxu0 %v143_v0 }
  0x10   :  { %137 = vmatpush3.msra.mxu0 %v15_v8 }
  0x11   :  { %139 = vmatmul.mubr.msk.f32.vlgmr.msra.gmra.mxu0 %vm30_vm1, %v14_v9 }
  0xd1   :  { %v100_v11 = vpop.f32.mrf.mxu0 }
  0xd2   :  { %v101_v12 = vadd.f32 %v111_v10, %v100_v11 }
  0xd3   :  { %v140_v13 = vpop.f32.mrf.mxu0 }
  0xd4   :  { %v104_v14 = vmax.f32 %v101_v12, 0.0 }
  0xd6   :  { %106 = vst.msk [vmem:[%s201_s3] sm:$0xff] %vm105_vm2, %v104_v14 }

// kernel: _lambda_.52
= control target key start
LH: loop header
LB: loop body
LE: loop exit
PB: predicated region body
PF: predicated region fallthrough
CT: control target
= control target key end

     0   :  { %v342_v0 = vmov 0.0   ;;  %vm56_vm0 = vcmask 130048   ;;  %vm343_vm1 = vmmov 0   ;;  %vm218_vm2 = vcmask 261120   ;;  %s510_s1 = inlined_call_operand.vmem [shape: f32[144,16], index: 1, kind: input, shape index: {}]   ;;  %s511_s0 = inlined_call_operand.vmem [shape: f32[8,144], index: 0, kind: input, shape index: {}]   ;;  %s512_s3 = inlined_call_operand.vmem [shape: f32[16,64], index: 3, kind: input, shape index: {}]   ;;  %s513_s2 = inlined_call_operand.vmem [shape: f32[1,16], index: 2, kind: input, shape index: {}]   ;;  %s514_s6 = inlined_call_operand.vmem [shape: f32[32,64], index: 6, kind: input, shape index: {}]   ;;  %s515_s5 = inlined_call_operand.vmem [shape: f32[8,32], index: 5, kind: input, shape index: {}]   ;;  %s516_s4 = inlined_call_operand.vmem [shape: f32[1,64], index: 4, kind: input, shape index: {}]   ;;  %s517_s7 = inlined_call_operand.vmem [shape: f32[1,64], index: 7, kind: input, shape index: {}]   ;;  %s518_s8 = inlined_call_operand.vmem [shape: f32[8,64], index: 8, kind: output, shape index: {}]  }
   0x1   :  { %60 = vmatprep.subr.mxu0 %v342_v0  ;;  %v46_v1 = vld [vmem:[%s510_s1 + $0x78] sm:$0xff]  ;;  %v45_v2 = vld [vmem:[%s510_s1 + $0x70] sm:$0xff]  ;;  %322 = vmatprep.subr.mxu1 %v342_v0  ;;  %v44_v3 = vld [vmem:[%s510_s1 + $0x68] sm:$0xff]  ;;  %vm302_vm3 = vcmask 523264  }
   0x2   :  { %61 = vmatpush1.msra.mxu0 %v46_v1  ;;  %v43_v4 = vld [vmem:[%s510_s1 + $0x60] sm:$0xff]  ;;  %v42_v5 = vld [vmem:[%s510_s1 + $0x58] sm:$0xff]  ;;  %v30_v6 = vld [vmem:[%s511_s0 + $0x8] sm:$0xff]  ;;  %326 = vmatprep.mubr.msk.f32.mxu1 %vm343_vm1, %v342_v0 }
   0x3   :  { %62 = vmatprep.subr.mxu0 %v342_v0  ;;  %309 = vmatprep.mubr.msk.f32.mxu0 %vm56_vm0, %v30_v6  ;;  %v41_v7 = vld [vmem:[%s510_s1 + $0x50] sm:$0xff]  ;;  %v40_v8 = vld [vmem:[%s510_s1 + $0x48] sm:$0xff]  ;;  %v39_v9 = vld [vmem:[%s510_s1 + $0x40] sm:$0xff] }
   0x4   :  { %63 = vmatpush1.msra.mxu0 %v45_v2  ;;  %v38_v10 = vld [vmem:[%s510_s1 + $0x38] sm:$0xff]  ;;  %v37_v11 = vld [vmem:[%s510_s1 + $0x30] sm:$0xff]  ;;  %v36_v12 = vld [vmem:[%s510_s1 + $0x28] sm:$0xff] }
   0x5   :  { %64 = vmatprep.subr.mxu0 %v342_v0  ;;  %v35_v13 = vld [vmem:[%s510_s1 + $0x20] sm:$0xff]  ;;  %v34_v14 = vld [vmem:[%s510_s1 + $0x18] sm:$0xff]  ;;  %v33_v15 = vld [vmem:[%s510_s1 + $0x10] sm:$0xff] }
   0x6   :  { %65 = vmatpush1.msra.mxu0 %v44_v3  ;;  %v32_v16 = vld [vmem:[%s510_s1 + $0x8] sm:$0xff]  ;;  %v31_v17 = vld [vmem:[%s510_s1] sm:$0xff]  ;;  %v217_v28 = vld [vmem:[%s514_s6 + $0x18] sm:$0xff] }
   0x7   :  { %66 = vmatprep.subr.mxu0 %v342_v0  ;;  %v48_v18 = vld [vmem:[%s510_s1 + $0x88] sm:$0xff]  ;;  %v47_v19 = vld [vmem:[%s510_s1 + $0x80] sm:$0xff]  ;;  %v216_v29 = vld [vmem:[%s514_s6 + $0x10] sm:$0xff] }
   0x8   :  { %67 = vmatpush1.msra.mxu0 %v43_v4  ;;  %v29_v20 = vld [vmem:[%s511_s0] sm:$0xff]  ;;  %v132_v21 = vld [vmem:[%s512_s3 + $0x8] sm:$0xff] }
   0x9   :  { %68 = vmatprep.subr.mxu0 %v342_v0  ;;  %323 = vmatpush3.msra.mxu1 %v132_v21  ;;  %v131_v22 = vld [vmem:[%s512_s3] sm:$0xff]  ;;  %v215_v30 = vld [vmem:[%s514_s6 + $0x8] sm:$0xff] }
   0xa   :  { %69 = vmatpush1.msra.mxu0 %v42_v5  ;;  %324 = vmatprep.subr.mxu1 %v342_v0  ;;  %v308_v23 = vld [vmem:[%s513_s2] ss:$0 sm:$0xff] }
   0xb   :  { %70 = vmatprep.subr.mxu0 %v342_v0  ;;  %325 = vmatpush3.msra.mxu1 %v131_v22  ;;  %v214_v31 = vld [vmem:[%s514_s6] sm:$0xff] }
   0xc   :  { %71 = vmatpush1.msra.mxu0 %v41_v7  ;;  %329 = vmatprep.subr.mxu1 %v342_v0  ;;  %v213_v32 = vld [vmem:[%s515_s5] sm:$0xff] }
   0xd   :  { %72 = vmatprep.subr.mxu0 %v342_v0  ;;  %v310_v35 = vld [vmem:[%s516_s4] ss:$0 sm:$0xff] }
   0xe   :  { %73 = vmatpush1.msra.mxu0 %v40_v8  ;;  %v313_v38 = vld [vmem:[%s517_s7] ss:$0 sm:$0xff] }
   0xf   :  { %74 = vmatprep.subr.mxu0 %v342_v0 }
  0x10   :  { %75 = vmatpush1.msra.mxu0 %v39_v9 }
  0x11   :  { %76 = vmatprep.subr.mxu0 %v342_v0 }
  0x12   :  { %77 = vmatpush1.msra.mxu0 %v38_v10 }
  0x13   :  { %78 = vmatprep.subr.mxu0 %v342_v0 }
  0x14   :  { %79 = vmatpush1.msra.mxu0 %v37_v11 }
  0x15   :  { %80 = vmatprep.subr.mxu0 %v342_v0 }
  0x16   :  { %81 = vmatpush1.msra.mxu0 %v36_v12 }
  0x17   :  { %82 = vmatprep.subr.mxu0 %v342_v0 }
  0x18   :  { %83 = vmatpush1.msra.mxu0 %v35_v13 }
  0x19   :  { %84 = vmatprep.subr.mxu0 %v342_v0 }
  0x1a   :  { %85 = vmatpush1.msra.mxu0 %v34_v14 }
  0x1b   :  { %86 = vmatprep.subr.mxu0 %v342_v0 }
  0x1c   :  { %87 = vmatpush1.msra.mxu0 %v33_v15 }
  0x1d   :  { %88 = vmatprep.subr.mxu0 %v342_v0 }
  0x1e   :  { %89 = vmatpush1.msra.mxu0 %v32_v16 }
  0x1f   :  { %90 = vmatprep.subr.mxu0 %v342_v0 }
  0x20   :  { %91 = vmatpush1.msra.mxu0 %v31_v17 }
  0x21   :  { %120 = vmatprep.subr.mxu0 %v342_v0 }
  0x22   :  { %121 = vmatpush2.msra.mxu0 %v48_v18 }
  0x23   :  { %122 = vmatprep.subr.mxu0 %v342_v0 }
  0x24   :  { %123 = vmatpush2.msra.mxu0 %v47_v19 }
  0x25   :  { %125 = vmatmul.mubr.f32.vlgmr.msra.gmra.mxu0 %v29_v20 }
  0xe5   :  { %v126_v24 = vpop.f32.mrf.mxu0 }
  0xe6   :  { %v127_v25 = vadd.f32 %v308_v23, %v126_v24 }
  0xe7   :  { %v128_v26 = vpop.f32.mrf.mxu0 }
  0xe8   :  { %v130_v27 = vmax.f32 %v127_v25, 0.0 }
  0xea   :  { %327 = vmatmul.mubr.msk.f32.vlgmr.msra.gmra.mxu1 %vm56_vm0, %v130_v27 }
  0xeb   :  { %330 = vmatpush3.msra.mxu1 %v217_v28  ;;  %337 = vmatprep.mubr.msk.f32.mxu1 %vm343_vm1, %v342_v0 }
  0xec   :  { %331 = vmatprep.subr.mxu1 %v342_v0 }
  0xed   :  { %332 = vmatpush3.msra.mxu1 %v216_v29 }
  0xee   :  { %333 = vmatprep.subr.mxu1 %v342_v0 }
  0xef   :  { %334 = vmatpush3.msra.mxu1 %v215_v30 }
  0xf0   :  { %335 = vmatprep.subr.mxu1 %v342_v0 }
  0xf1   :  { %336 = vmatpush3.msra.mxu1 %v214_v31 }
  0xf2   :  { %338 = vmatmul.mubr.msk.f32.vlgmr.msra.gmra.mxu1 %vm218_vm2, %v213_v32 }
 0x1aa   :  { %v209_v33 = vpop.f32.mrf.mxu1 }
 0x1ab   :  { %v210_v36 = vadd.f32 %v310_v35, %v209_v33 }
 0x1ac   :  { %v328_v34 = vpop.f32.mrf.mxu1 }
 0x1b2   :  { %v288_v37 = vpop.f32.mrf.mxu1 }
 0x1b3   :  { %v292_v39 = vadd.f32 %v288_v37, %v210_v36 }
 0x1b4   :  { %v339_v40 = vpop.f32.mrf.mxu1 }
 0x1b5   :  { %v300_v41 = vadd.f32 %v313_v38, %v292_v39 }
 0x1b7   :  { %v301_v42 = vmax.f32 %v300_v41, 0.0 }
 0x1b9   :  { %303 = vst.msk [vmem:[%s518_s8] sm:$0xff] %vm302_vm3, %v301_v42 }

// kernel: _lambda_.65
= control target key start
LH: loop header
LB: loop body
LE: loop exit
PB: predicated region body
PF: predicated region fallthrough
CT: control target
= control target key end

     0   :  { %v170_v0 = vmov 0.0   ;;  %vm171_vm0 = vmmov 0   ;;  %vm109_vm1 = vcmask 254976   ;;  %s249_s1 = inlined_call_operand.vmem [shape: f32[128,32], index: 1, kind: input, shape index: {}]   ;;  %s250_s0 = inlined_call_operand.vmem [shape: f32[2,128], index: 0, kind: input, shape index: {}]   ;;  %s251_s2 = inlined_call_operand.vmem [shape: f32[1,32], index: 2, kind: input, shape index: {}]   ;;  %s252_s3 = inlined_call_operand.vmem [shape: f32[2,32], index: 3, kind: output, shape index: {}]  }
   0x1   :  { %133 = vmatprep.subr.mxu0 %v170_v0  ;;  %v30_v1 = vld [vmem:[%s249_s1 + $0x78] sm:$0xff]  ;;  %v29_v2 = vld [vmem:[%s249_s1 + $0x70] sm:$0xff]  ;;  %165 = vmatprep.mubr.msk.f32.mxu0 %vm171_vm0, %v170_v0  ;;  %v28_v3 = vld [vmem:[%s249_s1 + $0x68] sm:$0xff] }
   0x2   :  { %134 = vmatpush3.msra.mxu0 %v30_v1  ;;  %v27_v4 = vld [vmem:[%s249_s1 + $0x60] sm:$0xff]  ;;  %v26_v5 = vld [vmem:[%s249_s1 + $0x58] sm:$0xff]  ;;  %v25_v6 = vld [vmem:[%s249_s1 + $0x50] sm:$0xff] }
   0x3   :  { %135 = vmatprep.subr.mxu0 %v170_v0  ;;  %v24_v7 = vld [vmem:[%s249_s1 + $0x48] sm:$0xff]  ;;  %v23_v8 = vld [vmem:[%s249_s1 + $0x40] sm:$0xff]  ;;  %v22_v9 = vld [vmem:[%s249_s1 + $0x38] sm:$0xff] }
   0x4   :  { %136 = vmatpush3.msra.mxu0 %v29_v2  ;;  %v21_v10 = vld [vmem:[%s249_s1 + $0x30] sm:$0xff]  ;;  %v20_v11 = vld [vmem:[%s249_s1 + $0x28] sm:$0xff]  ;;  %v19_v12 = vld [vmem:[%s249_s1 + $0x20] sm:$0xff] }
   0x5   :  { %137 = vmatprep.subr.mxu0 %v170_v0  ;;  %v18_v13 = vld [vmem:[%s249_s1 + $0x18] sm:$0xff]  ;;  %v17_v14 = vld [vmem:[%s249_s1 + $0x10] sm:$0xff]  ;;  %v16_v15 = vld [vmem:[%s249_s1 + $0x8] sm:$0xff] }
   0x6   :  { %138 = vmatpush3.msra.mxu0 %v28_v3  ;;  %v15_v16 = vld [vmem:[%s249_s1] sm:$0xff] }
   0x7   :  { %139 = vmatprep.subr.mxu0 %v170_v0  ;;  %v14_v17 = vld [vmem:[%s250_s0] sm:$0x3] }
   0x8   :  { %140 = vmatpush3.msra.mxu0 %v27_v4  ;;  %v115_v18 = vld [vmem:[%s251_s2] ss:$0 sm:$0xff] }
   0x9   :  { %141 = vmatprep.subr.mxu0 %v170_v0 }
   0xa   :  { %142 = vmatpush3.msra.mxu0 %v26_v5 }
   0xb   :  { %143 = vmatprep.subr.mxu0 %v170_v0 }
   0xc   :  { %144 = vmatpush3.msra.mxu0 %v25_v6 }
   0xd   :  { %145 = vmatprep.subr.mxu0 %v170_v0 }
   0xe   :  { %146 = vmatpush3.msra.mxu0 %v24_v7 }
   0xf   :  { %147 = vmatprep.subr.mxu0 %v170_v0 }
  0x10   :  { %148 = vmatpush3.msra.mxu0 %v23_v8 }
  0x11   :  { %149 = vmatprep.subr.mxu0 %v170_v0 }
  0x12   :  { %150 = vmatpush3.msra.mxu0 %v22_v9 }
  0x13   :  { %151 = vmatprep.subr.mxu0 %v170_v0 }
  0x14   :  { %152 = vmatpush3.msra.mxu0 %v21_v10 }
  0x15   :  { %153 = vmatprep.subr.mxu0 %v170_v0 }
  0x16   :  { %154 = vmatpush3.msra.mxu0 %v20_v11 }
  0x17   :  { %155 = vmatprep.subr.mxu0 %v170_v0 }
  0x18   :  { %156 = vmatpush3.msra.mxu0 %v19_v12 }
  0x19   :  { %157 = vmatprep.subr.mxu0 %v170_v0 }
  0x1a   :  { %158 = vmatpush3.msra.mxu0 %v18_v13 }
  0x1b   :  { %159 = vmatprep.subr.mxu0 %v170_v0 }
  0x1c   :  { %160 = vmatpush3.msra.mxu0 %v17_v14 }
  0x1d   :  { %161 = vmatprep.subr.mxu0 %v170_v0 }
  0x1e   :  { %162 = vmatpush3.msra.mxu0 %v16_v15 }
  0x1f   :  { %163 = vmatprep.subr.mxu0 %v170_v0 }
  0x20   :  { %164 = vmatpush3.msra.mxu0 %v15_v16 }
  0x21   :  { %166 = vmatmul.mubr.f32.vlgmr.msra.gmra.mxu0 %v14_v17 }
  0xe1   :  { %v104_v19 = vpop.f32.mrf.mxu0 }
  0xe2   :  { %v105_v20 = vadd.f32 %v115_v18, %v104_v19 }
  0xe3   :  { %v167_v21 = vpop.f32.mrf.mxu0 }
  0xe4   :  { %v108_v22 = vmax.f32 %v105_v20, 0.0 }
  0xe6   :  { %110 = vst.msk [vmem:[%s252_s3] sm:$0x3] %vm109_vm1, %v108_v22 }

// kernel: _lambda_.64
= control target key start
LH: loop header
LB: loop body
LE: loop exit
PB: predicated region body
PF: predicated region fallthrough
CT: control target
= control target key end

     0   :  { %v523_v3 = vmov 0.0   ;;  %v524_v4 = vmov 1983009808   ;;  %v78_v6 = vlaneseq  ;;  %vm525_vm0 = vmmov 0   ;;  %s757_s1 = inlined_call_operand.vmem [shape: f32[288,32], index: 1, kind: input, shape index: {}]   ;;  %s758_s0 = inlined_call_operand.vmem [shape: f32[2,288], index: 0, kind: input, shape index: {}]   ;;  %s759_s3 = inlined_call_operand.vmem [shape: f32[32,128], index: 3, kind: input, shape index: {}]   ;;  %s760_s2 = inlined_call_operand.vmem [shape: f32[1,32], index: 2, kind: input, shape index: {}]   ;;  %s761_s6 = inlined_call_operand.vmem [shape: f32[64,128], index: 6, kind: input, shape index: {}]   ;;  %s762_s5 = inlined_call_operand.vmem [shape: f32[2,64], index: 5, kind: input, shape index: {}]   ;;  %s763_s4 = inlined_call_operand.vmem [shape: f32[1,128], index: 4, kind: input, shape index: {}]   ;;  %s764_s7 = inlined_call_operand.vmem [shape: f32[1,128], index: 7, kind: input, shape index: {}]   ;;  %s765_s8 = inlined_call_operand.vmem [shape: f32[2,128], index: 8, kind: output, shape index: {}]  }
   0x1   :  { %v61_v0 = vld [vmem:[%s757_s1 + $0xf8] sm:$0xff]  ;;  %v60_v2 = vld [vmem:[%s757_s1 + $0xf0] sm:$0xff]  ;;  %478 = vmatprep.subr.mxu1 %v523_v3  ;;  %v76_v5 = vunpack.c.l.s4 %v524_v4  ;;  %486 = vmatprep.mubr.msk.f32.mxu1 %vm525_vm0, %v523_v3  ;;  %v59_v8 = vld [vmem:[%s757_s1 + $0xe8] sm:$0xff]  ;;  %vm92_vm1 = vcmask 261120   ;;  %vm329_vm2 = vcmask 523264  }
   0x2   :  { %v45_v1 = vld [vmem:[%s757_s1 + $0x78] sm:$0xff]  ;;  %424 = vmatprep.subr.mxu0 %v61_v0  ;;  %v44_v7 = vld [vmem:[%s757_s1 + $0x70] sm:$0xff]  ;;  %v43_v9 = vld [vmem:[%s757_s1 + $0x68] sm:$0xff]  ;;  %v79_v12 = vshrl.u32 %v78_v6, 7 }
   0x3   :  { %425 = vmatpush3.msra.mxu0 %v45_v1  ;;  %v58_v10 = vld [vmem:[%s757_s1 + $0xe0] sm:$0xff]  ;;  %v77_v11 = vunpack.c.0.s8 %v76_v5  ;;  %v57_v14 = vld [vmem:[%s757_s1 + $0xd8] sm:$0xff]  ;;  %v56_v16 = vld [vmem:[%s757_s1 + $0xd0] sm:$0xff] }
   0x4   :  { %426 = vmatprep.subr.mxu0 %v60_v2  ;;  %v42_v13 = vld [vmem:[%s757_s1 + $0x60] sm:$0xff]  ;;  %v41_v15 = vld [vmem:[%s757_s1 + $0x58] sm:$0xff]  ;;  %v40_v18 = vld [vmem:[%s757_s1 + $0x50] sm:$0xff] }
   0x5   :  { %427 = vmatpush3.msra.mxu0 %v44_v7  ;;  %v80_v17 = vsub.s32 %v77_v11, %v79_v12  ;;  %v55_v19 = vld [vmem:[%s757_s1 + $0xc8] sm:$0xff]  ;;  %v65_v20 = vld [vmem:[%s757_s1 + $0x118] sm:$0xff]  ;;  %v29_v22 = vld [vmem:[%s758_s0] sm:$0x3f] }
   0x6   :  { %428 = vmatprep.subr.mxu0 %v59_v8  ;;  %v39_v21 = vld [vmem:[%s757_s1 + $0x48] sm:$0xff]  ;;  %479 = vmatpush3.msra.mxu1 %v65_v20  ;;  %v64_v23 = vld [vmem:[%s757_s1 + $0x110] sm:$0xff]  ;;  %v54_v24 = vld [vmem:[%s757_s1 + $0xc0] sm:$0xff]  ;;  %v74_v25 = vcombine.high %v29_v22, %v29_v22 }
   0x7   :  { %429 = vmatpush3.msra.mxu0 %v43_v9  ;;  %480 = vmatprep.subr.mxu1 %v523_v3  ;;  %v81_v26 = vrot.slane %v29_v22, %v80_v17  ;;  %v63_v27 = vld [vmem:[%s757_s1 + $0x108] sm:$0xff]  ;;  %v38_v28 = vld [vmem:[%s757_s1 + $0x40] sm:$0xff]  ;;  %v53_v29 = vld [vmem:[%s757_s1 + $0xb8] sm:$0xff] }
   0x8   :  { %430 = vmatprep.subr.mxu0 %v58_v10  ;;  %481 = vmatpush3.msra.mxu1 %v64_v23  ;;  %v37_v31 = vld [vmem:[%s757_s1 + $0x38] sm:$0xff]  ;;  %v88_v32 = vrot.slane %v74_v25, %v80_v17  ;;  %v62_v33 = vld [vmem:[%s757_s1 + $0x100] sm:$0xff]  ;;  %v52_v34 = vld [vmem:[%s757_s1 + $0xb0] sm:$0xff] }
   0x9   :  { %431 = vmatpush3.msra.mxu0 %v42_v13  ;;  %v89_v30 = vcombine.high %v81_v26, %v81_v26  ;;  %482 = vmatprep.subr.mxu1 %v523_v3  ;;  %v36_v35 = vld [vmem:[%s757_s1 + $0x30] sm:$0xff]  ;;  %v51_v36 = vld [vmem:[%s757_s1 + $0xa8] sm:$0xff]  ;;  %v50_v38 = vld [vmem:[%s757_s1 + $0xa0] sm:$0xff] }
   0xa   :  { %432 = vmatprep.subr.mxu0 %v57_v14  ;;  %483 = vmatpush3.msra.mxu1 %v63_v27  ;;  %v35_v37 = vld [vmem:[%s757_s1 + $0x28] sm:$0xff]  ;;  %v34_v39 = vld [vmem:[%s757_s1 + $0x20] sm:$0xff]  ;;  %v49_v40 = vld [vmem:[%s757_s1 + $0x98] sm:$0xff] }
   0xb   :  { %433 = vmatpush3.msra.mxu0 %v41_v15  ;;  %159 = vmatprep.mubr.f32.mxu0 %v89_v30  ;;  %v33_v41 = vld [vmem:[%s757_s1 + $0x18] sm:$0xff]  ;;  %v48_v42 = vld [vmem:[%s757_s1 + $0x90] sm:$0xff]  ;;  %v47_v44 = vld [vmem:[%s757_s1 + $0x88] sm:$0xff] }
   0xc   :  { %434 = vmatprep.subr.mxu0 %v56_v16  ;;  %484 = vmatprep.subr.mxu1 %v523_v3  ;;  %v32_v43 = vld [vmem:[%s757_s1 + $0x10] sm:$0xff]  ;;  %v31_v45 = vld [vmem:[%s757_s1 + $0x8] sm:$0xff]  ;;  %v46_v46 = vld [vmem:[%s757_s1 + $0x80] sm:$0xff] }
   0xd   :  { %435 = vmatpush3.msra.mxu0 %v40_v18  ;;  %485 = vmatpush3.msra.mxu1 %v62_v33  ;;  %v30_v47 = vld [vmem:[%s757_s1] sm:$0xff]  ;;  %v239_v48 = vld [vmem:[%s759_s3 + $0x18] sm:$0xff]  ;;  %v238_v49 = vld [vmem:[%s759_s3 + $0x10] sm:$0xff] }
   0xe   :  { %436 = vmatprep.subr.mxu0 %v55_v19  ;;  %487 = vmatmul.mubr.msk.f32.vlgmr.msra.gmra.mxu1 %vm92_vm1, %v88_v32  ;;  %v237_v50 = vld [vmem:[%s759_s3 + $0x8] sm:$0xff]  ;;  %v236_v51 = vld [vmem:[%s759_s3] sm:$0xff]  ;;  %v328_v61 = vld [vmem:[%s761_s6 + $0x38] sm:$0xff] }
   0xf   :  { %437 = vmatpush3.msra.mxu0 %v39_v21  ;;  %489 = vmatprep.subr.mxu1 %v523_v3  ;;  %v418_v56 = vld [vmem:[%s760_s2] ss:$0 sm:$0xff]  ;;  %v327_v62 = vld [vmem:[%s761_s6 + $0x30] sm:$0xff]  ;;  %v326_v63 = vld [vmem:[%s761_s6 + $0x28] sm:$0xff] }
  0x10   :  { %438 = vmatprep.subr.mxu0 %v54_v24  ;;  %497 = vmatprep.mubr.msk.f32.mxu1 %vm525_vm0, %v523_v3  ;;  %v325_v0 = vld [vmem:[%s761_s6 + $0x20] sm:$0xff]  ;;  %v324_v1 = vld [vmem:[%s761_s6 + $0x18] sm:$0xff]  ;;  %v323_v2 = vld [vmem:[%s761_s6 + $0x10] sm:$0xff] }
  0x11   :  { %439 = vmatpush3.msra.mxu0 %v38_v28  ;;  %490 = vmatpush3.msra.mxu1 %v239_v48  ;;  %v322_v4 = vld [vmem:[%s761_s6 + $0x8] sm:$0xff]  ;;  %v321_v5 = vld [vmem:[%s761_s6] sm:$0xff] }
  0x12   :  { %440 = vmatprep.subr.mxu0 %v53_v29  ;;  %491 = vmatprep.subr.mxu1 %v523_v3  ;;  %v320_v6 = vld [vmem:[%s762_s5] sm:$0x3] }
  0x13   :  { %441 = vmatpush3.msra.mxu0 %v37_v31  ;;  %492 = vmatpush3.msra.mxu1 %v238_v49  ;;  %v420_v9 = vld [vmem:[%s763_s4] ss:$0 sm:$0xff] }
  0x14   :  { %442 = vmatprep.subr.mxu0 %v52_v34  ;;  %493 = vmatprep.subr.mxu1 %v523_v3  ;;  %v423_v12 = vld [vmem:[%s764_s7] ss:$0 sm:$0xff] }
  0x15   :  { %443 = vmatpush3.msra.mxu0 %v36_v35  ;;  %494 = vmatpush3.msra.mxu1 %v237_v50 }
  0x16   :  { %444 = vmatprep.subr.mxu0 %v51_v36  ;;  %495 = vmatprep.subr.mxu1 %v523_v3 }
  0x17   :  { %445 = vmatpush3.msra.mxu0 %v35_v37  ;;  %496 = vmatpush3.msra.mxu1 %v236_v51 }
  0x18   :  { %446 = vmatprep.subr.mxu0 %v50_v38  ;;  %500 = vmatprep.subr.mxu1 %v523_v3 }
  0x19   :  { %447 = vmatpush3.msra.mxu0 %v34_v39 }
  0x1a   :  { %448 = vmatprep.subr.mxu0 %v49_v40 }
  0x1b   :  { %449 = vmatpush3.msra.mxu0 %v33_v41 }
  0x1c   :  { %450 = vmatprep.subr.mxu0 %v48_v42 }
  0x1d   :  { %451 = vmatpush3.msra.mxu0 %v32_v43 }
  0x1e   :  { %452 = vmatprep.subr.mxu0 %v47_v44 }
  0x1f   :  { %453 = vmatpush3.msra.mxu0 %v31_v45 }
  0x20   :  { %454 = vmatprep.subr.mxu0 %v46_v46 }
  0x21   :  { %455 = vmatpush3.msra.mxu0 %v30_v47 }
  0x22   :  { %160 = vmatmul.mubr.f32.vlgmr.msra.gmra.mxu0 %v81_v26 }
  0xce   :  { %v231_v52 = vpop.f32.mrf.mxu1 }
  0xd0   :  { %v488_v53 = vpop.f32.mrf.mxu1 }
  0xe2   :  { %v456_v54 = vpop.f32.mrf.mxu0 }
  0xe4   :  { %v457_v55 = vpop.f32.mrf.mxu0 }
  0xe5   :  { %v458_v57 = vadd.f32 %v457_v55, %v456_v54 }
  0xe7   :  { %v162_v58 = vadd.f32 %v458_v57, %v418_v56 }
  0xe9   :  { %v232_v59 = vadd.f32 %v231_v52, %v162_v58 }
  0xeb   :  { %v235_v60 = vmax.f32 %v232_v59, 0.0 }
  0xed   :  { %498 = vmatmul.mubr.msk.f32.vlgmr.msra.gmra.mxu1 %vm92_vm1, %v235_v60 }
  0xee   :  { %501 = vmatpush3.msra.mxu1 %v328_v61  ;;  %516 = vmatprep.mubr.msk.f32.mxu1 %vm525_vm0, %v523_v3 }
  0xef   :  { %502 = vmatprep.subr.mxu1 %v523_v3 }
  0xf0   :  { %503 = vmatpush3.msra.mxu1 %v327_v62 }
  0xf1   :  { %504 = vmatprep.subr.mxu1 %v523_v3 }
  0xf2   :  { %505 = vmatpush3.msra.mxu1 %v326_v63 }
  0xf3   :  { %506 = vmatprep.subr.mxu1 %v523_v3 }
  0xf4   :  { %507 = vmatpush3.msra.mxu1 %v325_v0 }
  0xf5   :  { %508 = vmatprep.subr.mxu1 %v523_v3 }
  0xf6   :  { %509 = vmatpush3.msra.mxu1 %v324_v1 }
  0xf7   :  { %510 = vmatprep.subr.mxu1 %v523_v3 }
  0xf8   :  { %511 = vmatpush3.msra.mxu1 %v323_v2 }
  0xf9   :  { %512 = vmatprep.subr.mxu1 %v523_v3 }
  0xfa   :  { %513 = vmatpush3.msra.mxu1 %v322_v4 }
  0xfb   :  { %514 = vmatprep.subr.mxu1 %v523_v3 }
  0xfc   :  { %515 = vmatpush3.msra.mxu1 %v321_v5 }
  0xfd   :  { %517 = vmatmul.mubr.msk.f32.vlgmr.msra.gmra.mxu1 %vm329_vm2, %v320_v6 }
 0x1ad   :  { %v316_v7 = vpop.f32.mrf.mxu1 }
 0x1ae   :  { %v317_v10 = vadd.f32 %v420_v9, %v316_v7 }
 0x1af   :  { %v499_v8 = vpop.f32.mrf.mxu1 }
 0x1bd   :  { %v399_v11 = vpop.f32.mrf.mxu1 }
 0x1be   :  { %v403_v13 = vadd.f32 %v399_v11, %v317_v10 }
 0x1bf   :  { %v518_v14 = vpop.f32.mrf.mxu1 }
 0x1c0   :  { %v411_v15 = vadd.f32 %v423_v12, %v403_v13 }
 0x1c2   :  { %v412_v16 = vmax.f32 %v411_v15, 0.0 }
 0x1c4   :  { %413 = vst [vmem:[%s765_s8] sm:$0x3] %v412_v16 }

// kernel: _lambda_.69
= control target key start
LH: loop header
LB: loop body
LE: loop exit
PB: predicated region body
PF: predicated region fallthrough
CT: control target
= control target key end

     0   :  { %v204_v1 = vmov 0.0   ;;  %vm205_vm0 = vmmov 0   ;;  %s284_s0 = inlined_call_operand.vmem [shape: f32[1,2,128], index: 0, kind: input, shape index: {}]   ;;  %s285_s1 = inlined_call_operand.vmem [shape: f32[128,10], index: 1, kind: input, shape index: {}]   ;;  %s286_s2 = inlined_call_operand.vmem [shape: f32[1,10], index: 2, kind: input, shape index: {}]   ;;  %s287_s3 = inlined_call_operand.hbm [shape: f32[2,10], index: 3, kind: output, shape index: {}]  }
   0x1   :  { %v32_v0 = vld [vmem:[%s285_s1 + $0x78] sm:$0xff]  ;;  %144 = vmatprep.subr.mxu0 %v204_v1  ;;  %v31_v2 = vld [vmem:[%s285_s1 + $0x70] sm:$0xff]  ;;  %176 = vmatprep.mubr.msk.f32.mxu0 %vm205_vm0, %v204_v1  ;;  %v30_v3 = vld [vmem:[%s285_s1 + $0x68] sm:$0xff] }
   0x2   :  { %145 = vmatpush3.msra.mxu0 %v32_v0  ;;  %v29_v4 = vld [vmem:[%s285_s1 + $0x60] sm:$0xff] }
   0x3   :  { %146 = vmatprep.subr.mxu0 %v204_v1 }
   0x4   :  { %147 = vmatpush3.msra.mxu0 %v31_v2 }
   0x5   :  { %148 = vmatprep.subr.mxu0 %v204_v1 }
   0x6   :  { %149 = vmatpush3.msra.mxu0 %v30_v3 }
   0x7   :  { %8 = vsyncpa [#allocation3], 0  ;;  %150 = vmatprep.subr.mxu0 %v204_v1  ;;  %v28_v5 = vld [vmem:[%s285_s1 + $0x58] sm:$0xff]  ;;  %v27_v6 = vld [vmem:[%s285_s1 + $0x50] sm:$0xff]  ;;  %s206_s21 = smov [#allocation2]   ;;  %vm110_vm1 = vcmask 74752  }
   0x8   :  { %151 = vmatpush3.msra.mxu0 %v29_v4  ;;  %v26_v7 = vld [vmem:[%s285_s1 + $0x48] sm:$0xff]  ;;  %v25_v8 = vld [vmem:[%s285_s1 + $0x40] sm:$0xff]  ;;  %v24_v9 = vld [vmem:[%s285_s1 + $0x38] sm:$0xff]  ;;  %s118_s22 = sshll.u32 %s206_s21, 4  ;;  %s119_s22 = int_to_ptr.vmem [resolvable:$true] %s118_s22 }
   0x9   :  { %152 = vmatprep.subr.mxu0 %v204_v1  ;;  %v23_v10 = vld [vmem:[%s285_s1 + $0x30] sm:$0xff]  ;;  %v22_v11 = vld [vmem:[%s285_s1 + $0x28] sm:$0xff]  ;;  %v21_v12 = vld [vmem:[%s285_s1 + $0x20] sm:$0xff]  ;;  %p187_p1 = scmp.lt.s32.totalorder %s119_s22, %s119_s22 }
   0xa   :  { %153 = vmatpush3.msra.mxu0 %v28_v5  ;;  %v20_v13 = vld [vmem:[%s285_s1 + $0x18] sm:$0xff]  ;;  %v19_v14 = vld [vmem:[%s285_s1 + $0x10] sm:$0xff]  ;;  %v18_v15 = vld [vmem:[%s285_s1 + $0x8] sm:$0xff] }
   0xb   :  { %154 = vmatprep.subr.mxu0 %v204_v1  ;;  %v17_v16 = vld [vmem:[%s285_s1] sm:$0xff]  ;;  %s182_s1 = scalar_lea.vmem %s119_s22, 32 }
   0xc   :  { %155 = vmatpush3.msra.mxu0 %v27_v6  ;;  %v15_v17 = vld [vmem:[%s284_s0] sm:$0x3]  ;;  %p183_p0 = scmp.ne.s32.totalorder %s119_s22, %s182_s1  ;;  %p188_p2 = scmp.lt.s32.totalorder %s182_s1, %s182_s1 }
   0xd   :  { %156 = vmatprep.subr.mxu0 %v204_v1  ;;  %v126_v18 = vld [vmem:[%s286_s2] ss:$0 sm:$0xff] }
   0xe   :  { %157 = vmatpush3.msra.mxu0 %v26_v7  ;;  %p189_p3 = por %p188_p2, %p187_p1 }
   0xf   :  { %158 = vmatprep.subr.mxu0 %v204_v1 }
  0x10   :  { %159 = vmatpush3.msra.mxu0 %v25_v8  ;;  %p190_p4 = pnand %p189_p3, %p183_p0 }
  0x11   :  { %160 = vmatprep.subr.mxu0 %v204_v1 }
  0x12   :  { %161 = vmatpush3.msra.mxu0 %v24_v9 }
  0x13   :  { %162 = vmatprep.subr.mxu0 %v204_v1 }
  0x14   :  { %163 = vmatpush3.msra.mxu0 %v23_v10 }
  0x15   :  { %164 = vmatprep.subr.mxu0 %v204_v1 }
  0x16   :  { %165 = vmatpush3.msra.mxu0 %v22_v11 }
  0x17   :  { %166 = vmatprep.subr.mxu0 %v204_v1 }
  0x18   :  { %167 = vmatpush3.msra.mxu0 %v21_v12 }
  0x19   :  { %168 = vmatprep.subr.mxu0 %v204_v1 }
  0x1a   :  { %169 = vmatpush3.msra.mxu0 %v20_v13 }
  0x1b   :  { %170 = vmatprep.subr.mxu0 %v204_v1 }
  0x1c   :  { %171 = vmatpush3.msra.mxu0 %v19_v14 }
  0x1d   :  { %172 = vmatprep.subr.mxu0 %v204_v1 }
  0x1e   :  { %173 = vmatpush3.msra.mxu0 %v18_v15 }
  0x1f   :  { %174 = vmatprep.subr.mxu0 %v204_v1 }
  0x20   :  { %175 = vmatpush3.msra.mxu0 %v17_v16 }
  0x21   :  { %177 = vmatmul.mubr.f32.vlgmr.msra.gmra.mxu0 %v15_v17 }
  0xe1   :  { %v106_v19 = vpop.f32.mrf.mxu0 }
  0xe2   :  { %v107_v20 = vadd.f32 %v126_v18, %v106_v19 }
  0xe3   :  { %v178_v21 = vpop.f32.mrf.mxu0 }
  0xe4   :  { %111 = vst.msk [vmem:[#allocation2] sm:$0x3] %vm110_vm1, %v107_v20 }
  0xe5   :  { %193 = shalt.err (!%p190_p4)
}
  0xe6   :  { %121 = dma.vmem_to_hbm [thread:$0]  %s119_s22, 32, %s287_s3, [#allocation3]  }
  0xe7   :  { %202 = dma.done.wait [#allocation3], 32  }
  0xe8   :  { %203 = vsyncadd [#allocation3], 4294967264 }
  0xe9   :  { %125 = vsyncpa [#allocation3], 1 }

// kernel: _lambda_.66
= control target key start
LH: loop header
LB: loop body
LE: loop exit
PB: predicated region body
PF: predicated region fallthrough
CT: control target
= control target key end

     0   :  { %v397_v3 = vmov 0.0   ;;  %v398_v4 = vmov 1983009808   ;;  %v72_v6 = vlaneseq  ;;  %vm399_vm0 = vmmov 0   ;;  %s584_s1 = inlined_call_operand.vmem [shape: f32[288,32], index: 1, kind: input, shape index: {}]   ;;  %s585_s0 = inlined_call_operand.vmem [shape: f32[2,288], index: 0, kind: input, shape index: {}]   ;;  %s586_s3 = inlined_call_operand.vmem [shape: f32[32,128], index: 3, kind: input, shape index: {}]   ;;  %s587_s2 = inlined_call_operand.vmem [shape: f32[1,32], index: 2, kind: input, shape index: {}]   ;;  %s588_s4 = inlined_call_operand.vmem [shape: f32[1,128], index: 4, kind: input, shape index: {}]   ;;  %s589_s5 = inlined_call_operand.vmem [shape: f32[2,128], index: 5, kind: input, shape index: {}]   ;;  %s590_s6 = inlined_call_operand.vmem [shape: f32[2,128], index: 6, kind: output, shape index: {}]  }
   0x1   :  { %v55_v0 = vld [vmem:[%s584_s1 + $0xf8] sm:$0xff]  ;;  %v54_v2 = vld [vmem:[%s584_s1 + $0xf0] sm:$0xff]  ;;  %371 = vmatprep.subr.mxu1 %v397_v3  ;;  %v70_v5 = vunpack.c.l.s4 %v398_v4  ;;  %379 = vmatprep.mubr.msk.f32.mxu1 %vm399_vm0, %v397_v3  ;;  %v53_v8 = vld [vmem:[%s584_s1 + $0xe8] sm:$0xff]  ;;  %vm86_vm1 = vcmask 261120  }
   0x2   :  { %v39_v1 = vld [vmem:[%s584_s1 + $0x78] sm:$0xff]  ;;  %326 = vmatprep.subr.mxu0 %v55_v0  ;;  %v38_v7 = vld [vmem:[%s584_s1 + $0x70] sm:$0xff]  ;;  %v37_v9 = vld [vmem:[%s584_s1 + $0x68] sm:$0xff]  ;;  %v73_v12 = vshrl.u32 %v72_v6, 7 }
   0x3   :  { %327 = vmatpush3.msra.mxu0 %v39_v1  ;;  %v52_v10 = vld [vmem:[%s584_s1 + $0xe0] sm:$0xff]  ;;  %v71_v11 = vunpack.c.0.s8 %v70_v5  ;;  %v51_v14 = vld [vmem:[%s584_s1 + $0xd8] sm:$0xff]  ;;  %v50_v16 = vld [vmem:[%s584_s1 + $0xd0] sm:$0xff] }
   0x4   :  { %328 = vmatprep.subr.mxu0 %v54_v2  ;;  %v36_v13 = vld [vmem:[%s584_s1 + $0x60] sm:$0xff]  ;;  %v35_v15 = vld [vmem:[%s584_s1 + $0x58] sm:$0xff]  ;;  %v34_v18 = vld [vmem:[%s584_s1 + $0x50] sm:$0xff] }
   0x5   :  { %329 = vmatpush3.msra.mxu0 %v38_v7  ;;  %v74_v17 = vsub.s32 %v71_v11, %v73_v12  ;;  %v49_v19 = vld [vmem:[%s584_s1 + $0xc8] sm:$0xff]  ;;  %v59_v20 = vld [vmem:[%s584_s1 + $0x118] sm:$0xff]  ;;  %v23_v22 = vld [vmem:[%s585_s0] sm:$0x3f] }
   0x6   :  { %330 = vmatprep.subr.mxu0 %v53_v8  ;;  %v33_v21 = vld [vmem:[%s584_s1 + $0x48] sm:$0xff]  ;;  %372 = vmatpush3.msra.mxu1 %v59_v20  ;;  %v58_v23 = vld [vmem:[%s584_s1 + $0x110] sm:$0xff]  ;;  %v48_v24 = vld [vmem:[%s584_s1 + $0xc0] sm:$0xff]  ;;  %v68_v25 = vcombine.high %v23_v22, %v23_v22 }
   0x7   :  { %331 = vmatpush3.msra.mxu0 %v37_v9  ;;  %373 = vmatprep.subr.mxu1 %v397_v3  ;;  %v75_v26 = vrot.slane %v23_v22, %v74_v17  ;;  %v57_v27 = vld [vmem:[%s584_s1 + $0x108] sm:$0xff]  ;;  %v32_v28 = vld [vmem:[%s584_s1 + $0x40] sm:$0xff]  ;;  %v47_v29 = vld [vmem:[%s584_s1 + $0xb8] sm:$0xff] }
   0x8   :  { %332 = vmatprep.subr.mxu0 %v52_v10  ;;  %374 = vmatpush3.msra.mxu1 %v58_v23  ;;  %v31_v31 = vld [vmem:[%s584_s1 + $0x38] sm:$0xff]  ;;  %v82_v32 = vrot.slane %v68_v25, %v74_v17  ;;  %v56_v33 = vld [vmem:[%s584_s1 + $0x100] sm:$0xff]  ;;  %v46_v34 = vld [vmem:[%s584_s1 + $0xb0] sm:$0xff] }
   0x9   :  { %333 = vmatpush3.msra.mxu0 %v36_v13  ;;  %v83_v30 = vcombine.high %v75_v26, %v75_v26  ;;  %375 = vmatprep.subr.mxu1 %v397_v3  ;;  %v30_v35 = vld [vmem:[%s584_s1 + $0x30] sm:$0xff]  ;;  %v45_v36 = vld [vmem:[%s584_s1 + $0xa8] sm:$0xff]  ;;  %v44_v38 = vld [vmem:[%s584_s1 + $0xa0] sm:$0xff] }
   0xa   :  { %334 = vmatprep.subr.mxu0 %v51_v14  ;;  %376 = vmatpush3.msra.mxu1 %v57_v27  ;;  %v29_v37 = vld [vmem:[%s584_s1 + $0x28] sm:$0xff]  ;;  %v28_v39 = vld [vmem:[%s584_s1 + $0x20] sm:$0xff]  ;;  %v43_v40 = vld [vmem:[%s584_s1 + $0x98] sm:$0xff] }
   0xb   :  { %335 = vmatpush3.msra.mxu0 %v35_v15  ;;  %153 = vmatprep.mubr.f32.mxu0 %v83_v30  ;;  %v27_v41 = vld [vmem:[%s584_s1 + $0x18] sm:$0xff]  ;;  %v42_v42 = vld [vmem:[%s584_s1 + $0x90] sm:$0xff]  ;;  %v41_v44 = vld [vmem:[%s584_s1 + $0x88] sm:$0xff] }
   0xc   :  { %336 = vmatprep.subr.mxu0 %v50_v16  ;;  %377 = vmatprep.subr.mxu1 %v397_v3  ;;  %v26_v43 = vld [vmem:[%s584_s1 + $0x10] sm:$0xff]  ;;  %v25_v45 = vld [vmem:[%s584_s1 + $0x8] sm:$0xff]  ;;  %v40_v46 = vld [vmem:[%s584_s1 + $0x80] sm:$0xff] }
   0xd   :  { %337 = vmatpush3.msra.mxu0 %v34_v18  ;;  %378 = vmatpush3.msra.mxu1 %v56_v33  ;;  %v24_v47 = vld [vmem:[%s584_s1] sm:$0xff]  ;;  %v233_v48 = vld [vmem:[%s586_s3 + $0x18] sm:$0xff]  ;;  %v232_v49 = vld [vmem:[%s586_s3 + $0x10] sm:$0xff] }
   0xe   :  { %338 = vmatprep.subr.mxu0 %v49_v19  ;;  %380 = vmatmul.mubr.msk.f32.vlgmr.msra.gmra.mxu1 %vm86_vm1, %v82_v32  ;;  %v231_v50 = vld [vmem:[%s586_s3 + $0x8] sm:$0xff]  ;;  %v230_v51 = vld [vmem:[%s586_s3] sm:$0xff] }
   0xf   :  { %339 = vmatpush3.msra.mxu0 %v33_v21  ;;  %382 = vmatprep.subr.mxu1 %v397_v3  ;;  %v322_v56 = vld [vmem:[%s587_s2] ss:$0 sm:$0xff] }
  0x10   :  { %340 = vmatprep.subr.mxu0 %v48_v24  ;;  %390 = vmatprep.mubr.msk.f32.mxu1 %vm399_vm0, %v397_v3  ;;  %v324_v61 = vld [vmem:[%s588_s4] ss:$0 sm:$0xff] }
  0x11   :  { %341 = vmatpush3.msra.mxu0 %v32_v28  ;;  %383 = vmatpush3.msra.mxu1 %v233_v48  ;;  %v314_v63 = vld [vmem:[%s589_s5] sm:$0x3] }
  0x12   :  { %342 = vmatprep.subr.mxu0 %v47_v29  ;;  %384 = vmatprep.subr.mxu1 %v397_v3 }
  0x13   :  { %343 = vmatpush3.msra.mxu0 %v31_v31  ;;  %385 = vmatpush3.msra.mxu1 %v232_v49 }
  0x14   :  { %344 = vmatprep.subr.mxu0 %v46_v34  ;;  %386 = vmatprep.subr.mxu1 %v397_v3 }
  0x15   :  { %345 = vmatpush3.msra.mxu0 %v30_v35  ;;  %387 = vmatpush3.msra.mxu1 %v231_v50 }
  0x16   :  { %346 = vmatprep.subr.mxu0 %v45_v36  ;;  %388 = vmatprep.subr.mxu1 %v397_v3 }
  0x17   :  { %347 = vmatpush3.msra.mxu0 %v29_v37  ;;  %389 = vmatpush3.msra.mxu1 %v230_v51 }
  0x18   :  { %348 = vmatprep.subr.mxu0 %v44_v38 }
  0x19   :  { %349 = vmatpush3.msra.mxu0 %v28_v39 }
  0x1a   :  { %350 = vmatprep.subr.mxu0 %v43_v40 }
  0x1b   :  { %351 = vmatpush3.msra.mxu0 %v27_v41 }
  0x1c   :  { %352 = vmatprep.subr.mxu0 %v42_v42 }
  0x1d   :  { %353 = vmatpush3.msra.mxu0 %v26_v43 }
  0x1e   :  { %354 = vmatprep.subr.mxu0 %v41_v44 }
  0x1f   :  { %355 = vmatpush3.msra.mxu0 %v25_v45 }
  0x20   :  { %356 = vmatprep.subr.mxu0 %v40_v46 }
  0x21   :  { %357 = vmatpush3.msra.mxu0 %v24_v47 }
  0x22   :  { %154 = vmatmul.mubr.f32.vlgmr.msra.gmra.mxu0 %v75_v26 }
  0xce   :  { %v225_v52 = vpop.f32.mrf.mxu1 }
  0xd0   :  { %v381_v53 = vpop.f32.mrf.mxu1 }
  0xe2   :  { %v358_v54 = vpop.f32.mrf.mxu0 }
  0xe4   :  { %v359_v55 = vpop.f32.mrf.mxu0 }
  0xe5   :  { %v360_v57 = vadd.f32 %v359_v55, %v358_v54 }
  0xe7   :  { %v156_v58 = vadd.f32 %v360_v57, %v322_v56 }
  0xe9   :  { %v226_v59 = vadd.f32 %v225_v52, %v156_v58 }
  0xeb   :  { %v229_v60 = vmax.f32 %v226_v59, 0.0 }
  0xed   :  { %391 = vmatmul.mubr.msk.f32.vlgmr.msra.gmra.mxu1 %vm86_vm1, %v229_v60 }
 0x1ad   :  { %v310_v62 = vpop.f32.mrf.mxu1 }
 0x1ae   :  { %v311_v0 = vadd.f32 %v324_v61, %v310_v62 }
 0x1af   :  { %v392_v1 = vpop.f32.mrf.mxu1 }
 0x1b0   :  { %v315_v2 = vadd.f32 %v314_v63, %v311_v0 }
 0x1b2   :  { %v316_v3 = vmax.f32 %v315_v2, 0.0 }
 0x1b4   :  { %317 = vst [vmem:[%s590_s6] sm:$0x3] %v316_v3 }

</bundles_post_ra>
